<compile_context>
chip_gen: v7x
topology: tpu7x:2x2x1
jax: 0.10.0
libtpu: 0.0.40
codegen_flags: <defaults>
</compile_context>

<pallas_src>
import functools

import jax
import jax.numpy as jnp
from jax import lax
from jax.experimental import pallas as pl
from jax.experimental.pallas import tpu as pltpu


def residual_stack_kernel(x_ref, b3_ref, b1_ref, o_ref, acc_ref, pad_ref, *,
                          num_layers: int, row_top: int):
    """Fused ResidualStack forward for one batch element (lane-dense layout).

    x_ref:   (1, H, W*C)                input block
    b3_ref:  (L, 3, W*C, W*Cr)          banded 3x3-conv weights (one per dy)
    b1_ref:  (L, W*Cr, W*C)             block-diagonal 1x1-conv weights
    o_ref:   (1, H, W*C)                output block
    acc_ref: (H, W*C) f32               resident residual accumulator
    pad_ref: (row_top + H + 1, W*C)     dy-halo ReLU buffer (matmul dtype);
                                        interior rows [row_top, row_top+H)
    """
    _, H, WC = x_ref.shape
    WCr = b3_ref.shape[-1]

    # Residual state stays in f32 VMEM for the whole stack.
    acc_ref[...] = x_ref[0].astype(jnp.float32)

    # Zero only the two halo rows actually read (they are never overwritten).
    zero_row = jnp.zeros((1, WC), pad_ref.dtype)
    pad_ref[row_top - 1:row_top, :] = zero_row
    pad_ref[row_top + H:row_top + H + 1, :] = zero_row

    # L is small here; Python unroll is fine.  (For large L: lax.fori_loop with
    # dynamic weight slices, or an "arbitrary" grid axis over layers.)
    for l in range(num_layers):
        # Single ReLU pass per layer, stored lane-dense into the halo buffer's
        # sublane-aligned interior (also the MXU feed, possibly bf16).
        r = jnp.maximum(acc_ref[...], 0.0).astype(pad_ref.dtype)
        pad_ref[row_top:row_top + H, :] = r

        # 3x3 conv == 3 banded matmuls (one per dy); dx taps + W-edge zero
        # padding are encoded in the banded weight matrix.
        yf = jnp.zeros((H, WCr), jnp.float32)
        for dy in range(3):
            if dy == 1:
                lhs = r                                    # already in vregs
            else:
                lhs = pad_ref[row_top - 1 + dy:row_top - 1 + dy + H, :]
            yf = yf + jnp.dot(lhs, b3_ref[l, dy],
                              preferred_element_type=jnp.float32)

        # ReLU, then the 1x1 conv as one block-diagonal matmul -> lane-dense z.
        y = jnp.maximum(yf, 0.0).astype(b1_ref.dtype)
        z = jnp.dot(y, b1_ref[l], preferred_element_type=jnp.float32)

        acc_ref[...] = acc_ref[...] + z

    # Final ReLU fused into the single lane-dense output store.
    o_ref[0] = jnp.maximum(acc_ref[...], 0.0).astype(o_ref.dtype)


def residual_stack_forward(x_nchw, w3_stack, w1_stack, *,
                           matmul_dtype=jnp.float32):
    """ResidualStack.forward.

    x_nchw:   (N, C, H, W)                 like PyTorch
    w3_stack: (L, 3, 3, C, Cr)             3x3 conv weights, HWIO per layer.
                                           (PyTorch Conv2d weight is OIHW
                                           (Cr, C, 3, 3): convert with
                                           w.transpose(2, 3, 1, 0).)
    w1_stack: (L, Cr, C)                   1x1 conv weights (PyTorch weight
                                           (C, Cr, 1, 1) -> w[:, :, 0, 0].T).
    matmul_dtype: dtype fed to the MXU (jnp.bfloat16 recommended on v6e/v7x);
                  accumulation is always f32.
    """
    N, C, H, W = x_nchw.shape
    L = w3_stack.shape[0]
    if L == 0:                       # degenerate: stack == ReLU
        return jax.nn.relu(x_nchw)
    Cr = w1_stack.shape[1]
    WC, WCr = W * C, W * Cr

    # Lane-dense layout glue (XLA): NCHW -> NHWC -> (N, H, W*C).
    x = jnp.transpose(x_nchw, (0, 2, 3, 1)).reshape(N, H, WC)

    # Fold the kw (dx) taps into banded (W*C, W*Cr) matrices, one per kh (dy).
    # shift[dx][wp, w] = 1  iff  wp == w + dx - 1; missing off-edge blocks give
    # the W-direction "same" zero padding for free.
    shift = jnp.stack(
        [jnp.eye(W, W, 1 - dx, dtype=jnp.float32) for dx in range(3)])
    b3 = jnp.einsum('xpw,ldxck->ldpcwk', shift, w3_stack.astype(jnp.float32))
    b3 = b3.reshape(L, 3, WC, WCr).astype(matmul_dtype)

    # 1x1 conv as a block-diagonal (W*Cr, W*C) matrix (keeps z lane-dense).
    b1 = jnp.einsum('pw,lck->lpcwk', jnp.eye(W, dtype=jnp.float32),
                    w1_stack.astype(jnp.float32))
    b1 = b1.reshape(L, WCr, WC).astype(matmul_dtype)

    # Sublane-aligned interior start for the halo scratch (8 rows for f32,
    # 16 for bf16); only 1 halo row above/below is actually read.
    row_top = 32 // jnp.dtype(matmul_dtype).itemsize

    kern = functools.partial(residual_stack_kernel,
                             num_layers=L, row_top=row_top)

    out = pl.pallas_call(
        kern,
        out_shape=jax.ShapeDtypeStruct((N, H, WC), x.dtype),
        grid=(N,),
        in_specs=[
            pl.BlockSpec((1, H, WC), lambda n: (n, 0, 0)),
            pl.BlockSpec((L, 3, WC, WCr), lambda n: (0, 0, 0, 0)),  # resident
            pl.BlockSpec((L, WCr, WC), lambda n: (0, 0, 0)),        # resident
        ],
        out_specs=pl.BlockSpec((1, H, WC), lambda n: (n, 0, 0)),
        scratch_shapes=[
            pltpu.VMEM((H, WC), jnp.float32),                 # f32 accumulator
            pltpu.VMEM((row_top + H + 1, WC), matmul_dtype),  # dy-halo buffer
        ],
        compiler_params=pltpu.CompilerParams(
            dimension_semantics=("parallel",),       # shards over TCs on v7x
            vmem_limit_bytes=32 * 1024 * 1024),
    )(x, b3, b1)

    return jnp.transpose(out.reshape(N, H, W, C), (0, 3, 1, 2))


def reference_forward(x_nchw, w3_stack, w1_stack):
    """Pure-JAX reference (lax.conv) matching the PyTorch module."""
    x = x_nchw
    for l in range(w3_stack.shape[0]):
        h = jax.nn.relu(x)
        y = lax.conv_general_dilated(
            h, w3_stack[l], window_strides=(1, 1), padding="SAME",
            dimension_numbers=("NCHW", "HWIO", "NCHW"))
        y = jax.nn.relu(y)
        z = lax.conv_general_dilated(
            y, w1_stack[l][None, None], window_strides=(1, 1), padding="SAME",
            dimension_numbers=("NCHW", "HWIO", "NCHW"))
        x = x + z
    return jax.nn.relu(x)


if __name__ == "__main__":
    # Module config: in_channels == num_hiddens (required for the residual add)
    batch = 2
    num_hiddens = 32          # in_channels == num_hiddens
    num_residual_hiddens = 16
    num_residual_layers = 2
    H = W = 16

    key = jax.random.PRNGKey(0)
    kx, k3, k1 = jax.random.split(key, 3)

    x = jax.random.normal(kx, (batch, num_hiddens, H, W), dtype=jnp.float32)
    # Conv2d(in=num_hiddens, out=num_residual_hiddens, k=3, bias=False): HWIO
    w3_stack = 0.1 * jax.random.normal(
        k3, (num_residual_layers, 3, 3, num_hiddens, num_residual_hiddens),
        dtype=jnp.float32)
    # Conv2d(in=num_residual_hiddens, out=num_hiddens, k=1, bias=False): (Cr, C)
    w1_stack = 0.1 * jax.random.normal(
        k1, (num_residual_layers, num_residual_hiddens, num_hiddens),
        dtype=jnp.float32)

    ref = reference_forward(x, w3_stack, w1_stack)

    # f32 MXU feed: exact path, tight tolerance.
    out = jax.jit(residual_stack_forward)(x, w3_stack, w1_stack)
    out = jax.block_until_ready(out)
    assert out.shape == (batch, num_hiddens, H, W)
    err = float(jnp.max(jnp.abs(out - ref)))
    assert err < 1e-4, f"f32 path max abs error vs reference: {err}"

    # bf16 MXU feed (v6e/v7x recommendation), f32 accumulation: loose tolerance.
    out_bf16 = jax.jit(
        functools.partial(residual_stack_forward, matmul_dtype=jnp.bfloat16)
    )(x, w3_stack, w1_stack)
    out_bf16 = jax.block_until_ready(out_bf16)
    err_bf16 = float(jnp.max(jnp.abs(out_bf16 - ref)))
    assert err_bf16 < 1e-1, f"bf16 path max abs error vs reference: {err_bf16}"

    print("KERNEL_OK")
</pallas_src>

<mosaic_0001>
module attributes {stable_mosaic.version = 11 : i64} {
  func.func @residual_stack_kernel(%arg0: i32, %arg1: memref<1x16x512xf32, #tpu.memory_space<vmem>>, %arg2: memref<2x3x512x256xf32, #tpu.memory_space<vmem>>, %arg3: memref<2x256x512xf32, #tpu.memory_space<vmem>>, %arg4: memref<1x16x512xf32, #tpu.memory_space<vmem>>, %arg5: memref<16x512xf32, #tpu.memory_space<vmem>>, %arg6: memref<25x512xf32, #tpu.memory_space<vmem>>) attributes {dimension_semantics = [#tpu.dimension_semantics<parallel>], iteration_bounds = array<i64: 2>, scalar_prefetch = 0 : i64, scratch_operands = 2 : i64, tpu.core_type = #tpu.core_type<tc>, window_params = [{transform_indices = @transform_0, window_bounds = array<i64: 1, 16, 512>}, {pipeline_mode = #tpu.pipeline_mode<synchronous>, transform_indices = @transform_1, window_bounds = array<i64: 2, 3, 512, 256>}, {pipeline_mode = #tpu.pipeline_mode<synchronous>, transform_indices = @transform_2, window_bounds = array<i64: 2, 256, 512>}, {transform_indices = @transform_3, window_bounds = array<i64: 1, 16, 512>}]} {
    %c0 = arith.constant 0 : index
    %c0_0 = arith.constant 0 : index
    %c0_1 = arith.constant 0 : index
    %0 = vector.load %arg1[%c0, %c0_0, %c0_1] : memref<1x16x512xf32, #tpu.memory_space<vmem>>, vector<1x16x512xf32>
    %1 = vector.shape_cast %0 : vector<1x16x512xf32> to vector<16x512xf32>
    %c0_2 = arith.constant 0 : index
    %c0_3 = arith.constant 0 : index
    %2 = vector.load %arg5[%c0_2, %c0_3] : memref<16x512xf32, #tpu.memory_space<vmem>>, vector<16x512xf32>
    tpu.vector_store %arg5[%c0_2, %c0_3], %1 {strides = array<i32>} : memref<16x512xf32, #tpu.memory_space<vmem>>, vector<16x512xf32>,
    %cst = arith.constant 0.000000e+00 : f32
    %3 = vector.broadcast %cst : f32 to vector<1x512xf32>
    %c7 = arith.constant 7 : index
    %c0_4 = arith.constant 0 : index
    %4 = vector.load %arg6[%c7, %c0_4] : memref<25x512xf32, #tpu.memory_space<vmem>>, vector<1x512xf32>
    tpu.vector_store %arg6[%c7, %c0_4], %3 {strides = array<i32>} : memref<25x512xf32, #tpu.memory_space<vmem>>, vector<1x512xf32>,
    %c24 = arith.constant 24 : index
    %c0_5 = arith.constant 0 : index
    %5 = vector.load %arg6[%c24, %c0_5] : memref<25x512xf32, #tpu.memory_space<vmem>>, vector<1x512xf32>
    tpu.vector_store %arg6[%c24, %c0_5], %3 {strides = array<i32>} : memref<25x512xf32, #tpu.memory_space<vmem>>, vector<1x512xf32>,
    %c0_6 = arith.constant 0 : index
    %c0_7 = arith.constant 0 : index
    %6 = vector.load %arg5[%c0_6, %c0_7] : memref<16x512xf32, #tpu.memory_space<vmem>>, vector<16x512xf32>
    %cst_8 = arith.constant 0.000000e+00 : f32
    %7 = vector.broadcast %cst_8 : f32 to vector<16x512xf32>
    %8 = arith.maximumf %6, %7 : vector<16x512xf32>
    %c8 = arith.constant 8 : index
    %c0_9 = arith.constant 0 : index
    %9 = vector.load %arg6[%c8, %c0_9] : memref<25x512xf32, #tpu.memory_space<vmem>>, vector<16x512xf32>
    tpu.vector_store %arg6[%c8, %c0_9], %8 {strides = array<i32>} : memref<25x512xf32, #tpu.memory_space<vmem>>, vector<16x512xf32>,
    %cst_10 = arith.constant 0.000000e+00 : f32
    %10 = vector.broadcast %cst_10 : f32 to vector<16x256xf32>
    %c7_11 = arith.constant 7 : index
    %c0_12 = arith.constant 0 : index
    %11 = vector.load %arg6[%c7_11, %c0_12] : memref<25x512xf32, #tpu.memory_space<vmem>>, vector<16x512xf32>
    %c0_13 = arith.constant 0 : index
    %c0_14 = arith.constant 0 : index
    %c0_15 = arith.constant 0 : index
    %c0_16 = arith.constant 0 : index
    %12 = vector.load %arg2[%c0_13, %c0_14, %c0_15, %c0_16] : memref<2x3x512x256xf32, #tpu.memory_space<vmem>>, vector<1x1x512x256xf32>
    %13 = vector.shape_cast %12 : vector<1x1x512x256xf32> to vector<512x256xf32>
    %cst_17 = arith.constant dense<0.000000e+00> : vector<16x256xf32>
    %14 = tpu.matmul %11, %13, %cst_17 {dimension_numbers = #tpu.dot_dimension_numbers<[1], [0], [0], [1], [0, 0, 1, 1], [], []>} : vector<16x512xf32>, vector<512x256xf32>, vector<16x256xf32> -> vector<16x256xf32>
    %15 = arith.addf %10, %14 : vector<16x256xf32>
    %c0_18 = arith.constant 0 : index
    %c1 = arith.constant 1 : index
    %c0_19 = arith.constant 0 : index
    %c0_20 = arith.constant 0 : index
    %16 = vector.load %arg2[%c0_18, %c1, %c0_19, %c0_20] : memref<2x3x512x256xf32, #tpu.memory_space<vmem>>, vector<1x1x512x256xf32>
    %17 = vector.shape_cast %16 : vector<1x1x512x256xf32> to vector<512x256xf32>
    %cst_21 = arith.constant dense<0.000000e+00> : vector<16x256xf32>
    %18 = tpu.matmul %8, %17, %cst_21 {dimension_numbers = #tpu.dot_dimension_numbers<[1], [0], [0], [1], [0, 0, 1, 1], [], []>} : vector<16x512xf32>, vector<512x256xf32>, vector<16x256xf32> -> vector<16x256xf32>
    %19 = arith.addf %15, %18 : vector<16x256xf32>
    %c9 = arith.constant 9 : index
    %c0_22 = arith.constant 0 : index
    %20 = vector.load %arg6[%c9, %c0_22] : memref<25x512xf32, #tpu.memory_space<vmem>>, vector<16x512xf32>
    %c0_23 = arith.constant 0 : index
    %c2 = arith.constant 2 : index
    %c0_24 = arith.constant 0 : index
    %c0_25 = arith.constant 0 : index
    %21 = vector.load %arg2[%c0_23, %c2, %c0_24, %c0_25] : memref<2x3x512x256xf32, #tpu.memory_space<vmem>>, vector<1x1x512x256xf32>
    %22 = vector.shape_cast %21 : vector<1x1x512x256xf32> to vector<512x256xf32>
    %cst_26 = arith.constant dense<0.000000e+00> : vector<16x256xf32>
    %23 = tpu.matmul %20, %22, %cst_26 {dimension_numbers = #tpu.dot_dimension_numbers<[1], [0], [0], [1], [0, 0, 1, 1], [], []>} : vector<16x512xf32>, vector<512x256xf32>, vector<16x256xf32> -> vector<16x256xf32>
    %24 = arith.addf %19, %23 : vector<16x256xf32>
    %cst_27 = arith.constant 0.000000e+00 : f32
    %25 = vector.broadcast %cst_27 : f32 to vector<16x256xf32>
    %26 = arith.maximumf %24, %25 : vector<16x256xf32>
    %c0_28 = arith.constant 0 : index
    %c0_29 = arith.constant 0 : index
    %c0_30 = arith.constant 0 : index
    %27 = vector.load %arg3[%c0_28, %c0_29, %c0_30] : memref<2x256x512xf32, #tpu.memory_space<vmem>>, vector<1x256x512xf32>
    %28 = vector.shape_cast %27 : vector<1x256x512xf32> to vector<256x512xf32>
    %cst_31 = arith.constant dense<0.000000e+00> : vector<16x512xf32>
    %29 = tpu.matmul %26, %28, %cst_31 {dimension_numbers = #tpu.dot_dimension_numbers<[1], [0], [0], [1], [0, 0, 1, 1], [], []>} : vector<16x256xf32>, vector<256x512xf32>, vector<16x512xf32> -> vector<16x512xf32>
    %c0_32 = arith.constant 0 : index
    %c0_33 = arith.constant 0 : index
    %30 = vector.load %arg5[%c0_32, %c0_33] : memref<16x512xf32, #tpu.memory_space<vmem>>, vector<16x512xf32>
    %31 = arith.addf %30, %29 : vector<16x512xf32>
    %c0_34 = arith.constant 0 : index
    %c0_35 = arith.constant 0 : index
    %32 = vector.load %arg5[%c0_34, %c0_35] : memref<16x512xf32, #tpu.memory_space<vmem>>, vector<16x512xf32>
    tpu.vector_store %arg5[%c0_34, %c0_35], %31 {strides = array<i32>} : memref<16x512xf32, #tpu.memory_space<vmem>>, vector<16x512xf32>,
    %c0_36 = arith.constant 0 : index
    %c0_37 = arith.constant 0 : index
    %33 = vector.load %arg5[%c0_36, %c0_37] : memref<16x512xf32, #tpu.memory_space<vmem>>, vector<16x512xf32>
    %cst_38 = arith.constant 0.000000e+00 : f32
    %34 = vector.broadcast %cst_38 : f32 to vector<16x512xf32>
    %35 = arith.maximumf %33, %34 : vector<16x512xf32>
    %c8_39 = arith.constant 8 : index
    %c0_40 = arith.constant 0 : index
    %36 = vector.load %arg6[%c8_39, %c0_40] : memref<25x512xf32, #tpu.memory_space<vmem>>, vector<16x512xf32>
    tpu.vector_store %arg6[%c8_39, %c0_40], %35 {strides = array<i32>} : memref<25x512xf32, #tpu.memory_space<vmem>>, vector<16x512xf32>,
    %cst_41 = arith.constant 0.000000e+00 : f32
    %37 = vector.broadcast %cst_41 : f32 to vector<16x256xf32>
    %c7_42 = arith.constant 7 : index
    %c0_43 = arith.constant 0 : index
    %38 = vector.load %arg6[%c7_42, %c0_43] : memref<25x512xf32, #tpu.memory_space<vmem>>, vector<16x512xf32>
    %c1_44 = arith.constant 1 : index
    %c0_45 = arith.constant 0 : index
    %c0_46 = arith.constant 0 : index
    %c0_47 = arith.constant 0 : index
    %39 = vector.load %arg2[%c1_44, %c0_45, %c0_46, %c0_47] : memref<2x3x512x256xf32, #tpu.memory_space<vmem>>, vector<1x1x512x256xf32>
    %40 = vector.shape_cast %39 : vector<1x1x512x256xf32> to vector<512x256xf32>
    %cst_48 = arith.constant dense<0.000000e+00> : vector<16x256xf32>
    %41 = tpu.matmul %38, %40, %cst_48 {dimension_numbers = #tpu.dot_dimension_numbers<[1], [0], [0], [1], [0, 0, 1, 1], [], []>} : vector<16x512xf32>, vector<512x256xf32>, vector<16x256xf32> -> vector<16x256xf32>
    %42 = arith.addf %37, %41 : vector<16x256xf32>
    %c1_49 = arith.constant 1 : index
    %c1_50 = arith.constant 1 : index
    %c0_51 = arith.constant 0 : index
    %c0_52 = arith.constant 0 : index
    %43 = vector.load %arg2[%c1_49, %c1_50, %c0_51, %c0_52] : memref<2x3x512x256xf32, #tpu.memory_space<vmem>>, vector<1x1x512x256xf32>
    %44 = vector.shape_cast %43 : vector<1x1x512x256xf32> to vector<512x256xf32>
    %cst_53 = arith.constant dense<0.000000e+00> : vector<16x256xf32>
    %45 = tpu.matmul %35, %44, %cst_53 {dimension_numbers = #tpu.dot_dimension_numbers<[1], [0], [0], [1], [0, 0, 1, 1], [], []>} : vector<16x512xf32>, vector<512x256xf32>, vector<16x256xf32> -> vector<16x256xf32>
    %46 = arith.addf %42, %45 : vector<16x256xf32>
    %c9_54 = arith.constant 9 : index
    %c0_55 = arith.constant 0 : index
    %47 = vector.load %arg6[%c9_54, %c0_55] : memref<25x512xf32, #tpu.memory_space<vmem>>, vector<16x512xf32>
    %c1_56 = arith.constant 1 : index
    %c2_57 = arith.constant 2 : index
    %c0_58 = arith.constant 0 : index
    %c0_59 = arith.constant 0 : index
    %48 = vector.load %arg2[%c1_56, %c2_57, %c0_58, %c0_59] : memref<2x3x512x256xf32, #tpu.memory_space<vmem>>, vector<1x1x512x256xf32>
    %49 = vector.shape_cast %48 : vector<1x1x512x256xf32> to vector<512x256xf32>
    %cst_60 = arith.constant dense<0.000000e+00> : vector<16x256xf32>
    %50 = tpu.matmul %47, %49, %cst_60 {dimension_numbers = #tpu.dot_dimension_numbers<[1], [0], [0], [1], [0, 0, 1, 1], [], []>} : vector<16x512xf32>, vector<512x256xf32>, vector<16x256xf32> -> vector<16x256xf32>
    %51 = arith.addf %46, %50 : vector<16x256xf32>
    %cst_61 = arith.constant 0.000000e+00 : f32
    %52 = vector.broadcast %cst_61 : f32 to vector<16x256xf32>
    %53 = arith.maximumf %51, %52 : vector<16x256xf32>
    %c1_62 = arith.constant 1 : index
    %c0_63 = arith.constant 0 : index
    %c0_64 = arith.constant 0 : index
    %54 = vector.load %arg3[%c1_62, %c0_63, %c0_64] : memref<2x256x512xf32, #tpu.memory_space<vmem>>, vector<1x256x512xf32>
    %55 = vector.shape_cast %54 : vector<1x256x512xf32> to vector<256x512xf32>
    %cst_65 = arith.constant dense<0.000000e+00> : vector<16x512xf32>
    %56 = tpu.matmul %53, %55, %cst_65 {dimension_numbers = #tpu.dot_dimension_numbers<[1], [0], [0], [1], [0, 0, 1, 1], [], []>} : vector<16x256xf32>, vector<256x512xf32>, vector<16x512xf32> -> vector<16x512xf32>
    %c0_66 = arith.constant 0 : index
    %c0_67 = arith.constant 0 : index
    %57 = vector.load %arg5[%c0_66, %c0_67] : memref<16x512xf32, #tpu.memory_space<vmem>>, vector<16x512xf32>
    %58 = arith.addf %57, %56 : vector<16x512xf32>
    %c0_68 = arith.constant 0 : index
    %c0_69 = arith.constant 0 : index
    %59 = vector.load %arg5[%c0_68, %c0_69] : memref<16x512xf32, #tpu.memory_space<vmem>>, vector<16x512xf32>
    tpu.vector_store %arg5[%c0_68, %c0_69], %58 {strides = array<i32>} : memref<16x512xf32, #tpu.memory_space<vmem>>, vector<16x512xf32>,
    %c0_70 = arith.constant 0 : index
    %c0_71 = arith.constant 0 : index
    %60 = vector.load %arg5[%c0_70, %c0_71] : memref<16x512xf32, #tpu.memory_space<vmem>>, vector<16x512xf32>
    %cst_72 = arith.constant 0.000000e+00 : f32
    %61 = vector.broadcast %cst_72 : f32 to vector<16x512xf32>
    %62 = arith.maximumf %60, %61 : vector<16x512xf32>
    %c0_73 = arith.constant 0 : index
    %c0_74 = arith.constant 0 : index
    %c0_75 = arith.constant 0 : index
    %63 = vector.load %arg4[%c0_73, %c0_74, %c0_75] : memref<1x16x512xf32, #tpu.memory_space<vmem>>, vector<1x16x512xf32>
    %64 = vector.shape_cast %63 : vector<1x16x512xf32> to vector<16x512xf32>
    %65 = vector.shape_cast %62 : vector<16x512xf32> to vector<1x16x512xf32>
    tpu.vector_store %arg4[%c0_73, %c0_74, %c0_75], %65 {strides = array<i32>} : memref<1x16x512xf32, #tpu.memory_space<vmem>>, vector<1x16x512xf32>,
    return
  }
  func.func @transform_0(%arg0: i32) -> (i32, i32, i32) {
    %c0_i32 = arith.constant 0 : i32
    %c0_i32_0 = arith.constant 0 : i32
    %c0_i32_1 = arith.constant 0 : i32
    return %arg0, %c0_i32, %c0_i32_0 : i32, i32, i32
  }
  func.func @transform_1(%arg0: i32) -> (i32, i32, i32, i32) {
    %c0_i32 = arith.constant 0 : i32
    %c0_i32_0 = arith.constant 0 : i32
    %c0_i32_1 = arith.constant 0 : i32
    %c0_i32_2 = arith.constant 0 : i32
    %c0_i32_3 = arith.constant 0 : i32
    return %c0_i32, %c0_i32_0, %c0_i32_1, %c0_i32_2 : i32, i32, i32, i32
  }
  func.func @transform_2(%arg0: i32) -> (i32, i32, i32) {
    %c0_i32 = arith.constant 0 : i32
    %c0_i32_0 = arith.constant 0 : i32
    %c0_i32_1 = arith.constant 0 : i32
    %c0_i32_2 = arith.constant 0 : i32
    return %c0_i32, %c0_i32_0, %c0_i32_1 : i32, i32, i32
  }
  func.func @transform_3(%arg0: i32) -> (i32, i32, i32) {
    %c0_i32 = arith.constant 0 : i32
    %c0_i32_0 = arith.constant 0 : i32
    %c0_i32_1 = arith.constant 0 : i32
    return %arg0, %c0_i32, %c0_i32_0 : i32, i32, i32
  }
}

</mosaic_0001>

<bundles_post_ra>
// kernel: residual_stack_forward.1
= control target key start
LH: loop header
LB: loop body
LE: loop exit
PB: predicated region body
PF: predicated region fallthrough
CT: control target
= control target key end

     0   :  { %s4755_s12 = smov 0   ;;  %s8088_s0 = inlined_call_operand.vmem [shape: f32[2,16,512], index: 0, kind: input, shape index: {}]   ;;  %s8089_s1 = inlined_call_operand.vmem [shape: f32[2,3,512,256], index: 1, kind: input, shape index: {}]   ;;  %s8090_s2 = inlined_call_operand.vmem [shape: f32[2,256,512], index: 2, kind: input, shape index: {}]   ;;  %s8091_s3 = inlined_call_operand.vmem [shape: f32[2,16,512], index: 3, kind: output, shape index: {}]  }
   0x1 LB: > { %s2860_s13 = sadd.s32 4294967295, %s4732_s12   ;;  %p2864_p0 = scmp.ge.s32.totalorder %s4732_s12, 1  ;;  %s4732_s12 = sphi %s4755_s12, %s13_s12  }
   0x2   : > { %p137_p1 = scmp.lt.s32.totalorder %s4732_s12, 3 }
   0x4   : > { %p138_p2 = pnand %p2864_p0, %p137_p1 }
   0x5   : > { %v2870_v0 = vld [vmem:[%s8089_s1 + $0x408] sm:$0xff] (!%p138_p2)  ;;  %v2872_v1 = vld [vmem:[%s8089_s1 + $0x418] sm:$0xff] (!%p138_p2)  ;;  %v2869_v2 = vld [vmem:[%s8089_s1 + $0x400] sm:$0xff] (!%p138_p2)  ;;  %p161_p3 = scmp.lt.s32.totalorder (!%p138_p2), %s2860_s13, 1  ;;  %vm656_vm1 = vcmask (!%p138_p2), 1040384   ;;  %vm992_vm2 = vcmask (!%p138_p2), 1046528  }
   0x6   : > { %141 = sbr.rel (%p138_p2) target bundleno = 1648 (0x670), region = 32  ;;  %v3641_v3 = vpack.c.bf16 (!%p138_p2), %v2872_v1, %v2870_v0  ;;  %v2871_v4 = vld [vmem:[%s8089_s1 + $0x410] sm:$0xff] (!%p138_p2)  ;;  %v2874_v5 = vld [vmem:[%s8089_s1 + $0x428] sm:$0xff] (!%p138_p2)  ;;  %v2876_v6 = vld [vmem:[%s8089_s1 + $0x438] sm:$0xff] (!%p138_p2) }
   0x7   : > { %v3643_v7 = vpack.c.bf16 (!%p138_p2), %v2871_v4, %v2869_v2  ;;  %v3645_v8 = vpack.c.bf16 (!%p138_p2), %v2876_v6, %v2874_v5  ;;  %v2873_v9 = vld [vmem:[%s8089_s1 + $0x420] sm:$0xff] (!%p138_p2)  ;;  %v2875_v10 = vld [vmem:[%s8089_s1 + $0x430] sm:$0xff] (!%p138_p2)  ;;  %v2878_v11 = vld [vmem:[%s8089_s1 + $0x448] sm:$0xff] (!%p138_p2) }
   0x8   : > { %3642 = vmatprep.subr.bf16.mxu0 (!%p138_p2), %v3641_v3  ;;  %v2880_v12 = vld [vmem:[%s8089_s1 + $0x458] sm:$0xff] (!%p138_p2)  ;;  %v3647_v13 = vpack.c.bf16 (!%p138_p2), %v2875_v10, %v2873_v9  ;;  %v2877_v15 = vld [vmem:[%s8089_s1 + $0x440] sm:$0xff] (!%p138_p2)  ;;  %v2879_v16 = vld [vmem:[%s8089_s1 + $0x450] sm:$0xff] (!%p138_p2) }
   0x9   : > { %3644 = vmatpush1.bf16.msra.mxu0 (!%p138_p2), %v3643_v7  ;;  %v3649_v14 = vpack.c.bf16 (!%p138_p2), %v2880_v12, %v2878_v11  ;;  %v2882_v17 = vld [vmem:[%s8089_s1 + $0x468] sm:$0xff] (!%p138_p2)  ;;  %v2884_v18 = vld [vmem:[%s8089_s1 + $0x478] sm:$0xff] (!%p138_p2)  ;;  %v3651_v19 = vpack.c.bf16 (!%p138_p2), %v2879_v16, %v2877_v15  ;;  %v2881_v21 = vld [vmem:[%s8089_s1 + $0x460] sm:$0xff] (!%p138_p2) }
   0xa   : > { %3646 = vmatprep.subr.bf16.mxu0 (!%p138_p2), %v3645_v8  ;;  %v3653_v20 = vpack.c.bf16 (!%p138_p2), %v2884_v18, %v2882_v17  ;;  %v2883_v22 = vld [vmem:[%s8089_s1 + $0x470] sm:$0xff] (!%p138_p2)  ;;  %v2886_v23 = vld [vmem:[%s8089_s1 + $0x488] sm:$0xff] (!%p138_p2)  ;;  %v2888_v24 = vld [vmem:[%s8089_s1 + $0x498] sm:$0xff] (!%p138_p2) }
   0xb   : > { %v3655_v25 = vpack.c.bf16 (!%p138_p2), %v2883_v22, %v2881_v21  ;;  %v3657_v26 = vpack.c.bf16 (!%p138_p2), %v2888_v24, %v2886_v23  ;;  %v2885_v27 = vld [vmem:[%s8089_s1 + $0x480] sm:$0xff] (!%p138_p2)  ;;  %v2887_v28 = vld [vmem:[%s8089_s1 + $0x490] sm:$0xff] (!%p138_p2)  ;;  %v2890_v29 = vld [vmem:[%s8089_s1 + $0x4a8] sm:$0xff] (!%p138_p2) }
   0xc   : > { %v2892_v30 = vld [vmem:[%s8089_s1 + $0x4b8] sm:$0xff] (!%p138_p2)  ;;  %v3659_v31 = vpack.c.bf16 (!%p138_p2), %v2887_v28, %v2885_v27  ;;  %v2889_v33 = vld [vmem:[%s8089_s1 + $0x4a0] sm:$0xff] (!%p138_p2)  ;;  %v2891_v34 = vld [vmem:[%s8089_s1 + $0x4b0] sm:$0xff] (!%p138_p2) }
   0xd   : > { %3648 = vmatpush1.bf16.msra.mxu0 %v3647_v13  ;;  %s8093_s13 = smov (!%p161_p3, %s2860_s13), 1  ;;  %v3661_v32 = vpack.c.bf16 %v2892_v30, %v2890_v29  ;;  %v2894_v35 = vld [vmem:[%s8089_s1 + $0x4c8] sm:$0xff]  ;;  %v2896_v36 = vld [vmem:[%s8089_s1 + $0x4d8] sm:$0xff]  ;;  %v3663_v37 = vpack.c.bf16 %v2891_v34, %v2889_v33  ;;  %v2893_v39 = vld [vmem:[%s8089_s1 + $0x4c0] sm:$0xff] }
   0xe   : > { %3650 = vmatprep.subr.bf16.mxu0 %v3649_v14  ;;  %s3639_s6 = sshll.u32 %s8093_s13, 6  ;;  %v3665_v38 = vpack.c.bf16 %v2896_v36, %v2894_v35  ;;  %v2895_v40 = vld [vmem:[%s8089_s1 + $0x4d0] sm:$0xff]  ;;  %v2898_v42 = vld [vmem:[%s8089_s1 + $0x4e8] sm:$0xff]  ;;  %v2900_v43 = vld [vmem:[%s8089_s1 + $0x4f8] sm:$0xff] }
   0xf   : > { %s4853_s19 = scalar_lea.vmem %s8088_s0, %s3639_s6  ;;  %v3667_v47 = vpack.c.bf16 %v2895_v40, %v2893_v39  ;;  %v3669_v48 = vpack.c.bf16 %v2900_v43, %v2898_v42  ;;  %v2897_v49 = vld [vmem:[%s8089_s1 + $0x4e0] sm:$0xff]  ;;  %v2899_v50 = vld [vmem:[%s8089_s1 + $0x4f0] sm:$0xff]  ;;  %v2902_v51 = vld [vmem:[%s8089_s1 + $0x508] sm:$0xff]  ;;  %s170_s4 = scalar_lea.vmem %s8091_s3, %s3639_s6 }
  0x10   : > { %v172_v41 = vld [vmem:[%s4853_s19 + $0x8] sm:$0xff]  ;;  %v171_v45 = vld [vmem:[%s4853_s19] sm:$0xff]  ;;  %v2904_v52 = vld [vmem:[%s8089_s1 + $0x518] sm:$0xff]  ;;  %v3671_v53 = vpack.c.bf16 %v2899_v50, %v2897_v49 }
  0x11   : > { %3652 = vmatpush1.bf16.msra.mxu0 %v3651_v19  ;;  %v4868_v44 = vmax.f32 %v172_v41, 0.0  ;;  %v4871_v46 = vmax.f32 %v171_v45, 0.0  ;;  %v3673_v54 = vpack.c.bf16 %v2904_v52, %v2902_v51  ;;  %v2901_v55 = vld [vmem:[%s8089_s1 + $0x500] sm:$0xff]  ;;  %v2903_v56 = vld [vmem:[%s8089_s1 + $0x510] sm:$0xff]  ;;  %v2906_v57 = vld [vmem:[%s8089_s1 + $0x528] sm:$0xff]  ;;  %v4734_v41 = vmov 0.0  }
  0x12   : > { %3654 = vmatprep.subr.bf16.mxu0 %v3653_v20  ;;  %v2908_v58 = vld [vmem:[%s8089_s1 + $0x538] sm:$0xff]  ;;  %v3675_v59 = vpack.c.bf16 %v2903_v56, %v2901_v55  ;;  %v2905_v61 = vld [vmem:[%s8089_s1 + $0x520] sm:$0xff]  ;;  %v2907_v62 = vld [vmem:[%s8089_s1 + $0x530] sm:$0xff] }
  0x13   : > { %214 = vst [vmem:[#allocation3 + $0x28] sm:$0xff] %v4868_v44  ;;  %554 = vmatprep.mubr.f32.mxu0 %v4868_v44  ;;  %213 = vst [vmem:[#allocation3 + $0x20] sm:$0xff] %v4871_v46  ;;  %v3677_v60 = vpack.c.bf16 %v2908_v58, %v2906_v57  ;;  %v2910_v63 = vld [vmem:[%s8089_s1 + $0x548] sm:$0xff]  ;;  %v2912_v0 = vld [vmem:[%s8089_s1 + $0x558] sm:$0xff]  ;;  %v3679_v1 = vpack.c.bf16 %v2907_v62, %v2905_v61 }
  0x14   : > { %v3681_v2 = vpack.c.bf16 %v2912_v0, %v2910_v63  ;;  %v2909_v3 = vld [vmem:[%s8089_s1 + $0x540] sm:$0xff]  ;;  %v2911_v4 = vld [vmem:[%s8089_s1 + $0x550] sm:$0xff]  ;;  %v2914_v5 = vld [vmem:[%s8089_s1 + $0x568] sm:$0xff] }
  0x15   : > { %3656 = vmatpush1.bf16.msra.mxu0 %v3655_v25  ;;  %v2916_v6 = vld [vmem:[%s8089_s1 + $0x578] sm:$0xff]  ;;  %v3683_v7 = vpack.c.bf16 %v2911_v4, %v2909_v3  ;;  %v2913_v9 = vld [vmem:[%s8089_s1 + $0x560] sm:$0xff]  ;;  %v2915_v10 = vld [vmem:[%s8089_s1 + $0x570] sm:$0xff] }
  0x16   : > { %3658 = vmatprep.subr.bf16.mxu0 %v3657_v26  ;;  %v3685_v8 = vpack.c.bf16 %v2916_v6, %v2914_v5  ;;  %v2918_v11 = vld [vmem:[%s8089_s1 + $0x588] sm:$0xff]  ;;  %v2920_v12 = vld [vmem:[%s8089_s1 + $0x598] sm:$0xff]  ;;  %v4940_v15 = vld [vmem:[%s4853_s19 + $0x20] sm:$0xff]  ;;  %v3687_v16 = vpack.c.bf16 %v2915_v10, %v2913_v9 }
  0x17   : > { %v176_v13 = vld [vmem:[%s4853_s19 + $0x28] sm:$0xff]  ;;  %v209_v17 = vmax.f32 %v4940_v15, 0.0  ;;  %v174_v18 = vld [vmem:[%s4853_s19 + $0x18] sm:$0xff]  ;;  %v3689_v19 = vpack.c.bf16 %v2920_v12, %v2918_v11  ;;  %v2917_v20 = vld [vmem:[%s8089_s1 + $0x580] sm:$0xff] }
  0x18   : > { %v4937_v14 = vmax.f32 %v176_v13, 0.0  ;;  %v2919_v21 = vld [vmem:[%s8089_s1 + $0x590] sm:$0xff]  ;;  %v4951_v22 = vmax.f32 %v174_v18, 0.0  ;;  %v2922_v24 = vld [vmem:[%s8089_s1 + $0x5a8] sm:$0xff]  ;;  %v2924_v25 = vld [vmem:[%s8089_s1 + $0x5b8] sm:$0xff] }
  0x19   : > { %3660 = vmatpush1.bf16.msra.mxu0 %v3659_v31  ;;  %v173_v23 = vld [vmem:[%s4853_s19 + $0x10] sm:$0xff]  ;;  %217 = vst [vmem:[#allocation3 + $0x40] sm:$0xff] %v209_v17  ;;  %v3691_v27 = vpack.c.bf16 %v2919_v21, %v2917_v20  ;;  %v3693_v28 = vpack.c.bf16 %v2924_v25, %v2922_v24  ;;  %v2921_v29 = vld [vmem:[%s8089_s1 + $0x5a0] sm:$0xff]  ;;  %v2926_v31 = vld [vmem:[%s8089_s1 + $0x5c8] sm:$0xff] }
  0x1a   : > { %3662 = vmatprep.subr.bf16.mxu0 %v3661_v32  ;;  %218 = vst [vmem:[#allocation3 + $0x48] sm:$0xff] %v4937_v14  ;;  %v4962_v26 = vmax.f32 %v173_v23, 0.0  ;;  %216 = vst [vmem:[#allocation3 + $0x38] sm:$0xff] %v4951_v22  ;;  %v2923_v30 = vld [vmem:[%s8089_s1 + $0x5b0] sm:$0xff]  ;;  %v2928_v32 = vld [vmem:[%s8089_s1 + $0x5d8] sm:$0xff] }
  0x1b   : > { %v3695_v33 = vpack.c.bf16 %v2923_v30, %v2921_v29  ;;  %v3697_v34 = vpack.c.bf16 %v2928_v32, %v2926_v31  ;;  %v2925_v35 = vld [vmem:[%s8089_s1 + $0x5c0] sm:$0xff]  ;;  %v2927_v36 = vld [vmem:[%s8089_s1 + $0x5d0] sm:$0xff]  ;;  %v2932_v39 = vld [vmem:[%s8089_s1 + $0x5f8] sm:$0xff] }
  0x1c   : > { %215 = vst [vmem:[#allocation3 + $0x30] sm:$0xff] %v4962_v26  ;;  %v3699_v40 = vpack.c.bf16 %v2927_v36, %v2925_v35  ;;  %v2929_v43 = vld [vmem:[%s8089_s1 + $0x5e0] sm:$0xff]  ;;  %v2931_v45 = vld [vmem:[%s8089_s1 + $0x5f0] sm:$0xff]  ;;  %v5015_v56 = vld [vmem:[%s4853_s19 + $0x38] sm:$0xff] }
  0x1d   : > { %3664 = vmatpush1.bf16.msra.mxu0 %v3663_v37  ;;  %v187_v37 = vlaneseq  ;;  %v3703_v49 = vpack.c.bf16 %v2931_v45, %v2929_v43  ;;  %v2933_v51 = vld [vmem:[%s8089_s1 + $0x600] sm:$0xff]  ;;  %v2935_v52 = vld [vmem:[%s8089_s1 + $0x610] sm:$0xff]  ;;  %v2942_v62 = vld [vmem:[%s8089_s1 + $0x648] sm:$0xff] }
  0x1e   : > { %3666 = vmatprep.subr.bf16.mxu0 %v3665_v38  ;;  %v2930_v38 = vld [vmem:[%s8089_s1 + $0x5e8] sm:$0xff]  ;;  %v3707_v55 = vpack.c.bf16 %v2935_v52, %v2933_v51  ;;  %v2937_v58 = vld [vmem:[%s8089_s1 + $0x620] sm:$0xff]  ;;  %v5025_v61 = vld [vmem:[%s4853_s19 + $0x30] sm:$0xff] }
  0x1f   : > { %vm189_vm0 = vcmp.lt.s32.totalorder %v187_v37, 512  ;;  %v3701_v42 = vpack.c.bf16 %v2932_v39, %v2930_v38  ;;  %v2944_v63 = vld [vmem:[%s8089_s1 + $0x658] sm:$0xff]  ;;  %v211_v0 = vmax.f32 %v5025_v61, 0.0  ;;  %v2941_v3 = vld [vmem:[%s8089_s1 + $0x640] sm:$0xff]  ;;  %v2943_v4 = vld [vmem:[%s8089_s1 + $0x650] sm:$0xff] }
  0x20   : > { %192 = vst.msk [vmem:[#allocation3 + $0x7] ss:$8 sm:$0xf] %vm189_vm0, %v4734_v41  ;;  %195 = vst.msk [vmem:[#allocation3 + $0x60] ss:$8 sm:$0xf] %vm189_vm0, %v4734_v41 }
  0x21   : > { %3668 = vmatpush1.bf16.msra.mxu0 %v3667_v47  ;;  %v2934_v47 = vld [vmem:[%s8089_s1 + $0x608] sm:$0xff]  ;;  %219 = vst [vmem:[#allocation3 + $0x50] sm:$0xff] %v211_v0  ;;  %v2948_v6 = vld [vmem:[%s8089_s1 + $0x678] sm:$0xff]  ;;  %v2945_v9 = vld [vmem:[%s8089_s1 + $0x660] sm:$0xff] }
  0x22   : > { %3670 = vmatprep.subr.bf16.mxu0 %v3669_v48  ;;  %v2936_v48 = vld [vmem:[%s8089_s1 + $0x618] sm:$0xff]  ;;  %v2946_v5 = vld [vmem:[%s8089_s1 + $0x668] sm:$0xff]  ;;  %v2947_v10 = vld [vmem:[%s8089_s1 + $0x670] sm:$0xff] }
  0x23   : > { %v3705_v50 = vpack.c.bf16 %v2936_v48, %v2934_v47  ;;  %v2950_v11 = vld [vmem:[%s8089_s1 + $0x688] sm:$0xff]  ;;  %v2952_v12 = vld [vmem:[%s8089_s1 + $0x698] sm:$0xff]  ;;  %v3719_v13 = vpack.c.bf16 %v2947_v10, %v2945_v9  ;;  %v2953_v23 = vld [vmem:[%s8089_s1 + $0x6a0] sm:$0xff] }
  0x24   : > { %v3721_v15 = vpack.c.bf16 %v2952_v12, %v2950_v11  ;;  %v2954_v18 = vld [vmem:[%s8089_s1 + $0x6a8] sm:$0xff]  ;;  %v2955_v24 = vld [vmem:[%s8089_s1 + $0x6b0] sm:$0xff]  ;;  %v2957_v30 = vld [vmem:[%s8089_s1 + $0x6c0] sm:$0xff] }
  0x25   : > { %3672 = vmatpush1.bf16.msra.mxu0 %v3671_v53  ;;  %v2938_v53 = vld [vmem:[%s8089_s1 + $0x628] sm:$0xff]  ;;  %v2959_v31 = vld [vmem:[%s8089_s1 + $0x6d0] sm:$0xff]  ;;  %v2961_v36 = vld [vmem:[%s8089_s1 + $0x6e0] sm:$0xff] }
  0x26   : > { %3674 = vmatprep.subr.bf16.mxu0 %v3673_v54  ;;  %v2940_v54 = vld [vmem:[%s8089_s1 + $0x638] sm:$0xff]  ;;  %v2958_v25 = vld [vmem:[%s8089_s1 + $0x6c8] sm:$0xff]  ;;  %v2963_v37 = vld [vmem:[%s8089_s1 + $0x6f0] sm:$0xff] }
  0x27   : > { %v3709_v57 = vpack.c.bf16 %v2940_v54, %v2938_v53  ;;  %v2962_v32 = vld [vmem:[%s8089_s1 + $0x6e8] sm:$0xff]  ;;  %v2968_v39 = vld [vmem:[%s8089_s1 + $0x718] sm:$0xff]  ;;  %v2967_v43 = vld [vmem:[%s8089_s1 + $0x710] sm:$0xff] }
  0x28   : > { %v2966_v38 = vld [vmem:[%s8089_s1 + $0x708] sm:$0xff]  ;;  %v2972_v47 = vld [vmem:[%s8089_s1 + $0x738] sm:$0xff]  ;;  %v2971_v51 = vld [vmem:[%s8089_s1 + $0x730] sm:$0xff] }
  0x29   : > { %3676 = vmatpush1.bf16.msra.mxu0 %v3675_v59  ;;  %v2939_v59 = vld [vmem:[%s8089_s1 + $0x630] sm:$0xff]  ;;  %v3737_v41 = vpack.c.bf16 %v2968_v39, %v2966_v38  ;;  %v2970_v45 = vld [vmem:[%s8089_s1 + $0x728] sm:$0xff]  ;;  %v2976_v53 = vld [vmem:[%s8089_s1 + $0x758] sm:$0xff] }
  0x2a   : > { %3678 = vmatprep.subr.bf16.mxu0 %v3677_v60  ;;  %v212_v60 = vmax.f32 %v5015_v56, 0.0  ;;  %v2974_v52 = vld [vmem:[%s8089_s1 + $0x748] sm:$0xff]  ;;  %v2983_v9 = vld [vmem:[%s8089_s1 + $0x790] sm:$0xff]  ;;  %v2988_v11 = vld [vmem:[%s8089_s1 + $0x7b8] sm:$0xff] }
  0x2b   : > { %v2986_v10 = vld [vmem:[%s8089_s1 + $0x7a8] sm:$0xff]  ;;  %v240_v38 = vld [vmem:[%s8089_s1 + $0x38] sm:$0xff] }
  0x2c   : > { %220 = vst [vmem:[#allocation3 + $0x58] sm:$0xff] %v212_v60  ;;  %v222_v39 = vld [vmem:[#allocation3 + $0x8] sm:$0x80]  ;;  %v248_v56 = vld [vmem:[%s8089_s1 + $0x78] sm:$0xff] }
  0x2d   : > { %3680 = vmatpush1.bf16.msra.mxu0 %v3679_v1  ;;  %v3711_v1 = vpack.c.bf16 %v2939_v59, %v2937_v58  ;;  %v2975_v58 = vld [vmem:[%s8089_s1 + $0x750] sm:$0xff]  ;;  %v2978_v59 = vld [vmem:[%s8089_s1 + $0x768] sm:$0xff]  ;;  %v252_v61 = vld [vmem:[%s8089_s1 + $0x98] sm:$0xff] }
  0x2e   : > { %3682 = vmatprep.subr.bf16.mxu0 %v3681_v2  ;;  %v3713_v2 = vpack.c.bf16 %v2944_v63, %v2942_v62  ;;  %v2980_v62 = vld [vmem:[%s8089_s1 + $0x778] sm:$0xff] }
  0x31   : > { %3684 = vmatpush1.bf16.msra.mxu0 %v3683_v7  ;;  %v3715_v7 = vpack.c.bf16 %v2943_v4, %v2941_v3  ;;  %v2979_v3 = vld [vmem:[%s8089_s1 + $0x770] sm:$0xff]  ;;  %v2982_v4 = vld [vmem:[%s8089_s1 + $0x788] sm:$0xff] }
  0x32   : > { %3686 = vmatprep.subr.bf16.mxu0 %v3685_v8  ;;  %v3717_v8 = vpack.c.bf16 %v2948_v6, %v2946_v5  ;;  %v2984_v5 = vld [vmem:[%s8089_s1 + $0x798] sm:$0xff] }
  0x35   : > { %3688 = vmatpush1.bf16.msra.mxu0 %v3687_v16  ;;  %v2949_v16 = vld [vmem:[%s8089_s1 + $0x680] sm:$0xff] }
  0x36   : > { %3690 = vmatprep.subr.bf16.mxu0 %v3689_v19  ;;  %v2956_v19 = vld [vmem:[%s8089_s1 + $0x6b8] sm:$0xff] }
  0x37   : > { %v3725_v21 = vpack.c.bf16 %v2956_v19, %v2954_v18  ;;  %v2992_v18 = vld [vmem:[%s8089_s1 + $0x7d8] sm:$0xff] }
  0x39   : > { %3692 = vmatpush1.bf16.msra.mxu0 %v3691_v27  ;;  %v2960_v27 = vld [vmem:[%s8089_s1 + $0x6d8] sm:$0xff] }
  0x3a   : > { %3694 = vmatprep.subr.bf16.mxu0 %v3693_v28  ;;  %v3727_v28 = vpack.c.bf16 %v2955_v24, %v2953_v23  ;;  %v3729_v29 = vpack.c.bf16 %v2960_v27, %v2958_v25  ;;  %v2991_v23 = vld [vmem:[%s8089_s1 + $0x7d0] sm:$0xff]  ;;  %v2994_v24 = vld [vmem:[%s8089_s1 + $0x7e8] sm:$0xff]  ;;  %v2996_v25 = vld [vmem:[%s8089_s1 + $0x7f8] sm:$0xff] }
  0x3d   : > { %3696 = vmatpush1.bf16.msra.mxu0 %v3695_v33  ;;  %v2964_v33 = vld [vmem:[%s8089_s1 + $0x6f8] sm:$0xff] }
  0x3e   : > { %3698 = vmatprep.subr.bf16.mxu0 %v3697_v34  ;;  %v3731_v34 = vpack.c.bf16 %v2959_v31, %v2957_v30  ;;  %v3733_v35 = vpack.c.bf16 %v2964_v33, %v2962_v32  ;;  %v2995_v30 = vld [vmem:[%s8089_s1 + $0x7f0] sm:$0xff]  ;;  %v234_v31 = vld [vmem:[%s8089_s1 + $0x8] sm:$0xff]  ;;  %v236_v32 = vld [vmem:[%s8089_s1 + $0x18] sm:$0xff] }
  0x41   : > { %3700 = vmatpush1.bf16.msra.mxu0 %v3699_v40  ;;  %v3735_v40 = vpack.c.bf16 %v2963_v37, %v2961_v36  ;;  %v235_v36 = vld [vmem:[%s8089_s1 + $0x10] sm:$0xff]  ;;  %v238_v37 = vld [vmem:[%s8089_s1 + $0x28] sm:$0xff] }
  0x42   : > { %3702 = vmatprep.subr.bf16.mxu0 %v3701_v42  ;;  %v2965_v42 = vld [vmem:[%s8089_s1 + $0x700] sm:$0xff] }
  0x43   : > { %v3739_v48 = vpack.c.bf16 %v2967_v43, %v2965_v42  ;;  %v237_v42 = vld [vmem:[%s8089_s1 + $0x20] sm:$0xff]  ;;  %v239_v43 = vld [vmem:[%s8089_s1 + $0x30] sm:$0xff] }
  0x45   : > { %3704 = vmatpush1.bf16.msra.mxu0 %v3703_v49  ;;  %v3741_v49 = vpack.c.bf16 %v2972_v47, %v2970_v45  ;;  %v660_v45 = vrot.slane %v222_v39, 7  ;;  %v661_v47 = vrot.slane %v4868_v44, 7 }
  0x46   : > { %3706 = vmatprep.subr.bf16.mxu0 %v3705_v50  ;;  %v2969_v50 = vld [vmem:[%s8089_s1 + $0x720] sm:$0xff] }
  0x47   : > { %v3743_v54 = vpack.c.bf16 %v2971_v51, %v2969_v50  ;;  %v3775_v50 = vpack.c.bf16 %v239_v43, %v237_v42  ;;  %v278_v42 = vld [vmem:[%s8089_s1 + $0x168] sm:$0xff]  ;;  %v280_v43 = vld [vmem:[%s8089_s1 + $0x178] sm:$0xff] }
  0x48   : > { %555 = vmatmul.mubr.f32.vlgmr.msra.gmra.mrb[0].mxu0 %v4871_v46 }
  0x49   : > { %3708 = vmatpush1.bf16.msra.mxu0 %v3707_v55  ;;  %560 = vmatprep.mubr.f32.mxu0 %v4937_v14  ;;  %v3745_v55 = vpack.c.bf16 %v2976_v53, %v2974_v52  ;;  %v241_v52 = vld [vmem:[%s8089_s1 + $0x40] sm:$0xff]  ;;  %v243_v53 = vld [vmem:[%s8089_s1 + $0x50] sm:$0xff] }
  0x4a   : > { %3710 = vmatprep.subr.bf16.mxu0 %v3709_v57  ;;  %v2973_v57 = vld [vmem:[%s8089_s1 + $0x740] sm:$0xff] }
  0x4b   : > { %v3747_v63 = vpack.c.bf16 %v2975_v58, %v2973_v57  ;;  %v245_v58 = vld [vmem:[%s8089_s1 + $0x60] sm:$0xff] }
  0x4c   : > { %561 = vmatmul.mubr.f32.gmra.mrb[2].mxu0 %v209_v17  ;;  %v2951_v17 = vld [vmem:[%s8089_s1 + $0x690] sm:$0xff] }
  0x4d   : > { %3712 = vmatpush1.bf16.msra.mxu0 %v3711_v1  ;;  %631 = vmatprep.mubr.f32.mxu0 %v4951_v22  ;;  %v3723_v20 = vpack.c.bf16 %v2951_v17, %v2949_v16  ;;  %v3749_v1 = vpack.c.bf16 %v2980_v62, %v2978_v59  ;;  %v2987_v16 = vld [vmem:[%s8089_s1 + $0x7b0] sm:$0xff]  ;;  %v2990_v17 = vld [vmem:[%s8089_s1 + $0x7c8] sm:$0xff] }
  0x4e   : > { %3714 = vmatprep.subr.bf16.mxu0 %v3713_v2  ;;  %v2977_v2 = vld [vmem:[%s8089_s1 + $0x760] sm:$0xff]  ;;  %v247_v59 = vld [vmem:[%s8089_s1 + $0x70] sm:$0xff]  ;;  %v250_v62 = vld [vmem:[%s8089_s1 + $0x88] sm:$0xff] }
  0x4f   : > { %v3751_v6 = vpack.c.bf16 %v2979_v3, %v2977_v2  ;;  %v251_v2 = vld [vmem:[%s8089_s1 + $0x90] sm:$0xff]  ;;  %v254_v3 = vld [vmem:[%s8089_s1 + $0xa8] sm:$0xff] }
  0x51   : > { %3716 = vmatpush1.bf16.msra.mxu0 %v3715_v7  ;;  %v3753_v7 = vpack.c.bf16 %v2984_v5, %v2982_v4  ;;  %v256_v4 = vld [vmem:[%s8089_s1 + $0xb8] sm:$0xff] }
  0x52   : > { %3718 = vmatprep.subr.bf16.mxu0 %v3717_v8  ;;  %v2981_v8 = vld [vmem:[%s8089_s1 + $0x780] sm:$0xff] }
  0x53   : > { %v3755_v12 = vpack.c.bf16 %v2983_v9, %v2981_v8  ;;  %v255_v8 = vld [vmem:[%s8089_s1 + $0xb0] sm:$0xff]  ;;  %v258_v9 = vld [vmem:[%s8089_s1 + $0xc8] sm:$0xff] }
  0x55   : > { %3720 = vmatpush1.bf16.msra.mxu0 %v3719_v13  ;;  %v3757_v13 = vpack.c.bf16 %v2988_v11, %v2986_v10  ;;  %v260_v10 = vld [vmem:[%s8089_s1 + $0xd8] sm:$0xff] }
  0x56   : > { %3722 = vmatprep.subr.bf16.mxu0 %v3721_v15  ;;  %v2985_v15 = vld [vmem:[%s8089_s1 + $0x7a0] sm:$0xff] }
  0x57   : > { %v3759_v19 = vpack.c.bf16 %v2987_v16, %v2985_v15  ;;  %v259_v15 = vld [vmem:[%s8089_s1 + $0xd0] sm:$0xff]  ;;  %v262_v16 = vld [vmem:[%s8089_s1 + $0xe8] sm:$0xff] }
  0x59   : > { %3724 = vmatpush1.bf16.msra.mxu0 %v3723_v20  ;;  %v3761_v20 = vpack.c.bf16 %v2992_v18, %v2990_v17  ;;  %v264_v17 = vld [vmem:[%s8089_s1 + $0xf8] sm:$0xff] }
  0x5a   : > { %3726 = vmatprep.subr.bf16.mxu0 %v3725_v21  ;;  %v2989_v21 = vld [vmem:[%s8089_s1 + $0x7c0] sm:$0xff] }
  0x5b   : > { %v3763_v27 = vpack.c.bf16 %v2991_v23, %v2989_v21  ;;  %v263_v21 = vld [vmem:[%s8089_s1 + $0xf0] sm:$0xff]  ;;  %v266_v23 = vld [vmem:[%s8089_s1 + $0x108] sm:$0xff] }
  0x5d   : > { %3728 = vmatpush1.bf16.msra.mxu0 %v3727_v28  ;;  %v3765_v28 = vpack.c.bf16 %v2996_v25, %v2994_v24  ;;  %v268_v24 = vld [vmem:[%s8089_s1 + $0x118] sm:$0xff] }
  0x5e   : > { %3730 = vmatprep.subr.bf16.mxu0 %v3729_v29  ;;  %v2993_v29 = vld [vmem:[%s8089_s1 + $0x7e0] sm:$0xff] }
  0x5f   : > { %v3767_v33 = vpack.c.bf16 %v2995_v30, %v2993_v29  ;;  %v267_v29 = vld [vmem:[%s8089_s1 + $0x110] sm:$0xff]  ;;  %v270_v30 = vld [vmem:[%s8089_s1 + $0x128] sm:$0xff] }
  0x61   : > { %3732 = vmatpush1.bf16.msra.mxu0 %v3731_v34  ;;  %v3769_v34 = vpack.c.bf16 %v236_v32, %v234_v31  ;;  %v272_v31 = vld [vmem:[%s8089_s1 + $0x138] sm:$0xff] }
  0x62   : > { %3734 = vmatprep.subr.bf16.mxu0 %v3733_v35  ;;  %v233_v35 = vld [vmem:[%s8089_s1] sm:$0xff] }
  0x65   : > { %3736 = vmatpush1.bf16.msra.mxu0 %v3735_v40  ;;  %v3771_v40 = vpack.c.bf16 %v235_v36, %v233_v35  ;;  %v271_v35 = vld [vmem:[%s8089_s1 + $0x130] sm:$0xff]  ;;  %v274_v36 = vld [vmem:[%s8089_s1 + $0x148] sm:$0xff] }
  0x66   : > { %3738 = vmatprep.subr.bf16.mxu0 %v3737_v41  ;;  %v3773_v41 = vpack.c.bf16 %v240_v38, %v238_v37  ;;  %v276_v37 = vld [vmem:[%s8089_s1 + $0x158] sm:$0xff] }
  0x67   : > { %v3809_v39 = vpack.c.bf16 %v276_v37, %v274_v36  ;;  %v667_v36 = vrot.slane %v4951_v22, 7  ;;  %v306_v37 = vld [vmem:[%s8089_s1 + $0x248] sm:$0xff] }
  0x69   : > { %3740 = vmatpush1.bf16.msra.mxu0 %v3739_v48  ;;  %v242_v48 = vld [vmem:[%s8089_s1 + $0x48] sm:$0xff] }
  0x6a   : > { %3742 = vmatprep.subr.bf16.mxu0 %v3741_v49  ;;  %v244_v49 = vld [vmem:[%s8089_s1 + $0x58] sm:$0xff] }
  0x6b   : > { %v3777_v51 = vpack.c.bf16 %v244_v49, %v242_v48  ;;  %v3813_v48 = vpack.c.bf16 %v280_v43, %v278_v42  ;;  %v277_v49 = vld [vmem:[%s8089_s1 + $0x160] sm:$0xff]  ;;  %v310_v43 = vld [vmem:[%s8089_s1 + $0x268] sm:$0xff] }
  0x6d   : > { %3744 = vmatpush1.bf16.msra.mxu0 %v3743_v54  ;;  %v662_v54 = vsel %vm656_vm1, %v660_v45, %v661_v47 }
  0x6e   : > { %3746 = vmatprep.subr.bf16.mxu0 %v3745_v55  ;;  %v246_v55 = vld [vmem:[%s8089_s1 + $0x68] sm:$0xff] }
  0x6f   : > { %v3781_v57 = vpack.c.bf16 %v248_v56, %v246_v55  ;;  %v281_v55 = vld [vmem:[%s8089_s1 + $0x180] sm:$0xff]  ;;  %v283_v56 = vld [vmem:[%s8089_s1 + $0x190] sm:$0xff] }
  0x71   : > { %3748 = vmatpush1.bf16.msra.mxu0 %v3747_v63  ;;  %v3785_v63 = vpack.c.bf16 %v252_v61, %v250_v62  ;;  %v285_v62 = vld [vmem:[%s8089_s1 + $0x1a0] sm:$0xff]  ;;  %v287_v61 = vld [vmem:[%s8089_s1 + $0x1b0] sm:$0xff] }
  0x72   : > { %3750 = vmatprep.subr.bf16.mxu0 %v3749_v1  ;;  %v249_v1 = vld [vmem:[%s8089_s1 + $0x80] sm:$0xff] }
  0x73   : > { %v3787_v5 = vpack.c.bf16 %v251_v2, %v249_v1  ;;  %v3823_v1 = vpack.c.bf16 %v287_v61, %v285_v62  ;;  %v317_v61 = vld [vmem:[%s8089_s1 + $0x2a0] sm:$0xff] }
  0x75   : > { %3752 = vmatpush1.bf16.msra.mxu0 %v3751_v6  ;;  %v3789_v6 = vpack.c.bf16 %v256_v4, %v254_v3  ;;  %v289_v3 = vld [vmem:[%s8089_s1 + $0x1c0] sm:$0xff]  ;;  %v291_v4 = vld [vmem:[%s8089_s1 + $0x1d0] sm:$0xff] }
  0x76   : > { %3754 = vmatprep.subr.bf16.mxu0 %v3753_v7  ;;  %v253_v7 = vld [vmem:[%s8089_s1 + $0xa0] sm:$0xff] }
  0x77   : > { %v3791_v11 = vpack.c.bf16 %v255_v8, %v253_v7  ;;  %v3827_v7 = vpack.c.bf16 %v291_v4, %v289_v3  ;;  %v321_v4 = vld [vmem:[%s8089_s1 + $0x2c0] sm:$0xff] }
  0x79   : > { %3756 = vmatpush1.bf16.msra.mxu0 %v3755_v12  ;;  %v3793_v12 = vpack.c.bf16 %v260_v10, %v258_v9  ;;  %v293_v9 = vld [vmem:[%s8089_s1 + $0x1e0] sm:$0xff]  ;;  %v295_v10 = vld [vmem:[%s8089_s1 + $0x1f0] sm:$0xff] }
  0x7a   : > { %3758 = vmatprep.subr.bf16.mxu0 %v3757_v13  ;;  %v257_v13 = vld [vmem:[%s8089_s1 + $0xc0] sm:$0xff] }
  0x7b   : > { %v3795_v18 = vpack.c.bf16 %v259_v15, %v257_v13  ;;  %v300_v13 = vld [vmem:[%s8089_s1 + $0x218] sm:$0xff]  ;;  %v230_v15 = vld [vmem:[#allocation3 + $0x48] sm:$0x7f] }
  0x7d   : > { %3760 = vmatpush1.bf16.msra.mxu0 %v3759_v19  ;;  %v3797_v19 = vpack.c.bf16 %v264_v17, %v262_v16  ;;  %v3831_v16 = vpack.c.bf16 %v295_v10, %v293_v9  ;;  %v325_v10 = vld [vmem:[%s8089_s1 + $0x2e0] sm:$0xff] }
  0x7e   : > { %3762 = vmatprep.subr.bf16.mxu0 %v3761_v20  ;;  %v261_v20 = vld [vmem:[%s8089_s1 + $0xe0] sm:$0xff] }
  0x7f   : > { %v3799_v25 = vpack.c.bf16 %v263_v21, %v261_v20  ;;  %v297_v20 = vld [vmem:[%s8089_s1 + $0x200] sm:$0xff]  ;;  %v299_v21 = vld [vmem:[%s8089_s1 + $0x210] sm:$0xff] }
  0x81   : > { %3764 = vmatpush1.bf16.msra.mxu0 %v3763_v27  ;;  %v3801_v27 = vpack.c.bf16 %v268_v24, %v266_v23  ;;  %v671_v23 = vrot.slane %v230_v15, 7  ;;  %v229_v24 = vld [vmem:[#allocation3 + $0x40] sm:$0x7f] }
  0x82   : > { %3766 = vmatprep.subr.bf16.mxu0 %v3765_v28  ;;  %v265_v28 = vld [vmem:[%s8089_s1 + $0x100] sm:$0xff] }
  0x83   : > { %v3803_v32 = vpack.c.bf16 %v267_v29, %v265_v28  ;;  %v3835_v29 = vpack.c.bf16 %v299_v21, %v297_v20  ;;  %v336_v20 = vld [vmem:[%s8089_s1 + $0x338] sm:$0xff] }
  0x85   : > { %3768 = vmatpush1.bf16.msra.mxu0 %v3767_v33  ;;  %v3805_v33 = vpack.c.bf16 %v272_v31, %v270_v30  ;;  %v669_v30 = vrot.slane %v229_v24, 7  ;;  %v333_v24 = vld [vmem:[%s8089_s1 + $0x320] sm:$0xff] }
  0x86   : > { %3770 = vmatprep.subr.bf16.mxu0 %v3769_v34  ;;  %v269_v34 = vld [vmem:[%s8089_s1 + $0x120] sm:$0xff] }
  0x87   : > { %v3807_v38 = vpack.c.bf16 %v271_v35, %v269_v34  ;;  %v672_v34 = vsel %vm656_vm1, %v661_v47, %v671_v23  ;;  %v305_v47 = vld [vmem:[%s8089_s1 + $0x240] sm:$0xff] }
  0x88   : > { %632 = vmatmul.mubr.f32.vlgmr.msra.gmra.mrb[0].mxu0 %v4962_v26 }
  0x89   : > { %3772 = vmatpush1.bf16.msra.mxu0 %v3771_v40  ;;  %637 = vmatprep.mubr.f32.mxu0 %v212_v60  ;;  %v3779_v60 = vpack.c.bf16 %v243_v53, %v241_v52  ;;  %v273_v40 = vld [vmem:[%s8089_s1 + $0x140] sm:$0xff]  ;;  %v284_v52 = vld [vmem:[%s8089_s1 + $0x198] sm:$0xff] }
  0x8a   : > { %3774 = vmatprep.subr.bf16.mxu0 %v3773_v41  ;;  %v275_v41 = vld [vmem:[%s8089_s1 + $0x150] sm:$0xff] }
  0x8b   : > { %v3811_v45 = vpack.c.bf16 %v275_v41, %v273_v40  ;;  %v307_v41 = vld [vmem:[%s8089_s1 + $0x250] sm:$0xff] }
  0x8c   : > { %638 = vmatmul.mubr.f32.gmra.mrb[2].mxu0 %v211_v0  ;;  %v3783_v0 = vpack.c.bf16 %v247_v59, %v245_v58  ;;  %v3819_v58 = vpack.c.bf16 %v283_v56, %v281_v55  ;;  %v313_v56 = vld [vmem:[%s8089_s1 + $0x280] sm:$0xff] }
  0x8d   : > { %3776 = vmatpush1.bf16.msra.mxu0 %v3775_v50  ;;  %749 = vmatprep.mubr.f32.mxu0 %v662_v54  ;;  %v279_v50 = vld [vmem:[%s8089_s1 + $0x170] sm:$0xff] }
  0x8e   : > { %3778 = vmatprep.subr.bf16.mxu0 %v3777_v51  ;;  %v282_v51 = vld [vmem:[%s8089_s1 + $0x188] sm:$0xff]  ;;  %v3815_v53 = vpack.c.bf16 %v279_v50, %v277_v49  ;;  %v309_v50 = vld [vmem:[%s8089_s1 + $0x260] sm:$0xff] }
  0x8f   : > { %v3817_v54 = vpack.c.bf16 %v284_v52, %v282_v51  ;;  %v311_v51 = vld [vmem:[%s8089_s1 + $0x270] sm:$0xff]  ;;  %v314_v52 = vld [vmem:[%s8089_s1 + $0x288] sm:$0xff] }
  0x91   : > { %3780 = vmatpush1.bf16.msra.mxu0 %v3779_v60  ;;  %v286_v60 = vld [vmem:[%s8089_s1 + $0x1a8] sm:$0xff] }
  0x92   : > { %3782 = vmatprep.subr.bf16.mxu0 %v3781_v57  ;;  %v288_v57 = vld [vmem:[%s8089_s1 + $0x1b8] sm:$0xff] }
  0x93   : > { %v3821_v59 = vpack.c.bf16 %v288_v57, %v286_v60  ;;  %v315_v60 = vld [vmem:[%s8089_s1 + $0x290] sm:$0xff]  ;;  %v318_v57 = vld [vmem:[%s8089_s1 + $0x2a8] sm:$0xff] }
  0x95   : > { %3784 = vmatpush1.bf16.msra.mxu0 %v3783_v0  ;;  %v290_v0 = vld [vmem:[%s8089_s1 + $0x1c8] sm:$0xff] }
  0x96   : > { %3786 = vmatprep.subr.bf16.mxu0 %v3785_v63  ;;  %v292_v63 = vld [vmem:[%s8089_s1 + $0x1d8] sm:$0xff] }
  0x97   : > { %v3825_v2 = vpack.c.bf16 %v292_v63, %v290_v0  ;;  %v319_v0 = vld [vmem:[%s8089_s1 + $0x2b0] sm:$0xff]  ;;  %v322_v63 = vld [vmem:[%s8089_s1 + $0x2c8] sm:$0xff] }
  0x99   : > { %3788 = vmatpush1.bf16.msra.mxu0 %v3787_v5  ;;  %v294_v5 = vld [vmem:[%s8089_s1 + $0x1e8] sm:$0xff] }
  0x9a   : > { %3790 = vmatprep.subr.bf16.mxu0 %v3789_v6  ;;  %v296_v6 = vld [vmem:[%s8089_s1 + $0x1f8] sm:$0xff] }
  0x9b   : > { %v3829_v8 = vpack.c.bf16 %v296_v6, %v294_v5  ;;  %v323_v5 = vld [vmem:[%s8089_s1 + $0x2d0] sm:$0xff]  ;;  %v326_v6 = vld [vmem:[%s8089_s1 + $0x2e8] sm:$0xff] }
  0x9d   : > { %3792 = vmatpush1.bf16.msra.mxu0 %v3791_v11  ;;  %v221_v11 = vld [vmem:[#allocation3] sm:$0x80] }
  0x9e   : > { %3794 = vmatprep.subr.bf16.mxu0 %v3793_v12  ;;  %v298_v12 = vld [vmem:[%s8089_s1 + $0x208] sm:$0xff]  ;;  %v657_v17 = vrot.slane %v221_v11, 7  ;;  %v327_v11 = vld [vmem:[%s8089_s1 + $0x2f0] sm:$0xff] }
  0x9f   : > { %v3863_v15 = vpack.c.bf16 %v327_v11, %v325_v10  ;;  %v231_v11 = vld [vmem:[#allocation3 + $0x50] sm:$0x7f] }
  0xa1   : > { %3796 = vmatpush1.bf16.msra.mxu0 %v3795_v18  ;;  %v658_v18 = vrot.slane %v4871_v46, 7  ;;  %v304_v46 = vld [vmem:[%s8089_s1 + $0x238] sm:$0xff] }
  0xa2   : > { %3798 = vmatprep.subr.bf16.mxu0 %v3797_v19  ;;  %v3833_v19 = vpack.c.bf16 %v300_v13, %v298_v12  ;;  %v330_v12 = vld [vmem:[%s8089_s1 + $0x308] sm:$0xff]  ;;  %v332_v13 = vld [vmem:[%s8089_s1 + $0x318] sm:$0xff] }
  0xa3   : > { %v659_v28 = vsel %vm656_vm1, %v657_v17, %v658_v18  ;;  %v670_v40 = vsel %vm656_vm1, %v658_v18, %v669_v30  ;;  %v329_v17 = vld [vmem:[%s8089_s1 + $0x300] sm:$0xff]  ;;  %v331_v18 = vld [vmem:[%s8089_s1 + $0x310] sm:$0xff] }
  0xa4   : > { %v3867_v21 = vpack.c.bf16 %v331_v18, %v329_v17  ;;  %v337_v30 = vld [vmem:[%s8089_s1 + $0x340] sm:$0xff]  ;;  %v673_v17 = vrot.slane %v231_v11, 7  ;;  %v1220_v11 = vld [vmem:[%s8090_s2 + $0x128] sm:$0xff] }
  0xa5   : > { %3800 = vmatpush1.bf16.msra.mxu0 %v3799_v25  ;;  %v302_v25 = vld [vmem:[%s8089_s1 + $0x228] sm:$0xff] }
  0xa6   : > { %3802 = vmatprep.subr.bf16.mxu0 %v3801_v27  ;;  %v224_v27 = vld [vmem:[#allocation3 + $0x18] sm:$0x80]  ;;  %v3837_v31 = vpack.c.bf16 %v304_v46, %v302_v25  ;;  %v335_v25 = vld [vmem:[%s8089_s1 + $0x330] sm:$0xff]  ;;  %v338_v46 = vld [vmem:[%s8089_s1 + $0x348] sm:$0xff] }
  0xa7   : > { %v666_v35 = vrot.slane %v224_v27, 7  ;;  %v340_v27 = vld [vmem:[%s8089_s1 + $0x358] sm:$0xff] }
  0xa9   : > { %3804 = vmatpush1.bf16.msra.mxu0 %v3803_v32  ;;  %v301_v32 = vld [vmem:[%s8089_s1 + $0x220] sm:$0xff]  ;;  %v668_v42 = vsel %vm656_vm1, %v666_v35, %v667_v36 }
  0xaa   : > { %3806 = vmatprep.subr.bf16.mxu0 %v3805_v33  ;;  %v303_v33 = vld [vmem:[%s8089_s1 + $0x230] sm:$0xff] }
  0xad   : > { %3808 = vmatpush1.bf16.msra.mxu0 %v3807_v38  ;;  %v308_v38 = vld [vmem:[%s8089_s1 + $0x258] sm:$0xff] }
  0xae   : > { %3810 = vmatprep.subr.bf16.mxu0 %v3809_v39  ;;  %v3839_v39 = vpack.c.bf16 %v303_v33, %v301_v32  ;;  %v3841_v44 = vpack.c.bf16 %v308_v38, %v306_v37  ;;  %v342_v32 = vld [vmem:[%s8089_s1 + $0x368] sm:$0xff]  ;;  %v344_v33 = vld [vmem:[%s8089_s1 + $0x378] sm:$0xff]  ;;  %v341_v37 = vld [vmem:[%s8089_s1 + $0x360] sm:$0xff] }
  0xaf   : > { %v3877_v35 = vpack.c.bf16 %v344_v33, %v342_v32  ;;  %v343_v38 = vld [vmem:[%s8089_s1 + $0x370] sm:$0xff]  ;;  %v3012_v32 = vld [vmem:[%s8089_s1 + $0x878] sm:$0xff]  ;;  %v3009_v33 = vld [vmem:[%s8089_s1 + $0x860] sm:$0xff] }
  0xb1   : > { %3812 = vmatpush1.bf16.msra.mxu0 %v3811_v45  ;;  %v312_v45 = vld [vmem:[%s8089_s1 + $0x278] sm:$0xff] }
  0xb2   : > { %3814 = vmatprep.subr.bf16.mxu0 %v3813_v48  ;;  %v3843_v48 = vpack.c.bf16 %v307_v41, %v305_v47  ;;  %v3845_v49 = vpack.c.bf16 %v312_v45, %v310_v43  ;;  %v345_v41 = vld [vmem:[%s8089_s1 + $0x380] sm:$0xff]  ;;  %v350_v43 = vld [vmem:[%s8089_s1 + $0x3a8] sm:$0xff]  ;;  %v352_v45 = vld [vmem:[%s8089_s1 + $0x3b8] sm:$0xff] }
  0xb5   : > { %3816 = vmatpush1.bf16.msra.mxu0 %v3815_v53  ;;  %v316_v53 = vld [vmem:[%s8089_s1 + $0x298] sm:$0xff] }
  0xb6   : > { %3818 = vmatprep.subr.bf16.mxu0 %v3817_v54  ;;  %v3847_v54 = vpack.c.bf16 %v311_v51, %v309_v50  ;;  %v3849_v55 = vpack.c.bf16 %v316_v53, %v314_v52  ;;  %v349_v50 = vld [vmem:[%s8089_s1 + $0x3a0] sm:$0xff]  ;;  %v351_v51 = vld [vmem:[%s8089_s1 + $0x3b0] sm:$0xff]  ;;  %v354_v52 = vld [vmem:[%s8089_s1 + $0x3c8] sm:$0xff] }
  0xb7   : > { %v356_v53 = vld [vmem:[%s8089_s1 + $0x3d8] sm:$0xff] }
  0xb9   : > { %3820 = vmatpush1.bf16.msra.mxu0 %v3819_v58  ;;  %v320_v58 = vld [vmem:[%s8089_s1 + $0x2b8] sm:$0xff] }
  0xba   : > { %3822 = vmatprep.subr.bf16.mxu0 %v3821_v59  ;;  %v3851_v59 = vpack.c.bf16 %v315_v60, %v313_v56  ;;  %v3853_v62 = vpack.c.bf16 %v320_v58, %v318_v57  ;;  %v353_v56 = vld [vmem:[%s8089_s1 + $0x3c0] sm:$0xff]  ;;  %v355_v60 = vld [vmem:[%s8089_s1 + $0x3d0] sm:$0xff]  ;;  %v358_v57 = vld [vmem:[%s8089_s1 + $0x3e8] sm:$0xff] }
  0xbb   : > { %v360_v58 = vld [vmem:[%s8089_s1 + $0x3f8] sm:$0xff] }
  0xbd   : > { %3824 = vmatpush1.bf16.msra.mxu0 %v3823_v1  ;;  %v324_v1 = vld [vmem:[%s8089_s1 + $0x2d8] sm:$0xff] }
  0xbe   : > { %3826 = vmatprep.subr.bf16.mxu0 %v3825_v2  ;;  %v3855_v2 = vpack.c.bf16 %v319_v0, %v317_v61  ;;  %v3857_v3 = vpack.c.bf16 %v324_v1, %v322_v63  ;;  %v357_v61 = vld [vmem:[%s8089_s1 + $0x3e0] sm:$0xff]  ;;  %v359_v0 = vld [vmem:[%s8089_s1 + $0x3f0] sm:$0xff]  ;;  %v2998_v1 = vld [vmem:[%s8089_s1 + $0x808] sm:$0xff] }
  0xbf   : > { %v223_v63 = vld [vmem:[#allocation3 + $0x10] sm:$0x80] }
  0xc1   : > { %3828 = vmatpush1.bf16.msra.mxu0 %v3827_v7  ;;  %v328_v7 = vld [vmem:[%s8089_s1 + $0x2f8] sm:$0xff] }
  0xc2   : > { %3830 = vmatprep.subr.bf16.mxu0 %v3829_v8  ;;  %v3859_v8 = vpack.c.bf16 %v323_v5, %v321_v4  ;;  %v3861_v9 = vpack.c.bf16 %v328_v7, %v326_v6  ;;  %v3895_v4 = vpack.c.bf16 %v359_v0, %v357_v61  ;;  %v663_v5 = vrot.slane %v223_v63, 7  ;;  %v1208_v61 = vld [vmem:[%s8090_s2 + $0xc8] sm:$0xff] }
  0xc3   : > { %v664_v6 = vrot.slane %v4962_v26, 7  ;;  %v3004_v26 = vld [vmem:[%s8089_s1 + $0x838] sm:$0xff]  ;;  %v1212_v0 = vld [vmem:[%s8090_s2 + $0xe8] sm:$0xff] }
  0xc4   : > { %v3018_v63 = vld [vmem:[%s8089_s1 + $0x8a8] sm:$0xff] }
  0xc5   : > { %3832 = vmatpush1.bf16.msra.mxu0 %v3831_v16  ;;  %v3865_v16 = vpack.c.bf16 %v332_v13, %v330_v12  ;;  %v3002_v12 = vld [vmem:[%s8089_s1 + $0x828] sm:$0xff]  ;;  %v674_v22 = vsel %vm656_vm1, %v664_v6, %v673_v17 }
  0xc6   : > { %3834 = vmatprep.subr.bf16.mxu0 %v3833_v19  ;;  %v334_v19 = vld [vmem:[%s8089_s1 + $0x328] sm:$0xff]  ;;  %v3901_v18 = vpack.c.bf16 %v3004_v26, %v3002_v12  ;;  %v3024_v26 = vld [vmem:[%s8089_s1 + $0x8d8] sm:$0xff] }
  0xc7   : > { %v3869_v23 = vpack.c.bf16 %v336_v20, %v334_v19  ;;  %v840_v13 = vld [vmem:[#allocation3 + $0x28] sm:$0xfe]  ;;  %v3001_v19 = vld [vmem:[%s8089_s1 + $0x820] sm:$0xff]  ;;  %v3003_v20 = vld [vmem:[%s8089_s1 + $0x830] sm:$0xff] }
  0xc8   : > { %750 = vmatmul.mubr.f32.vlgmr.msra.gmra.mrb[0].mxu0 %v659_v28  ;;  %v3871_v28 = vpack.c.bf16 %v335_v25, %v333_v24  ;;  %v997_v24 = vrot.slane %v4937_v14, 1  ;;  %v3006_v25 = vld [vmem:[%s8089_s1 + $0x848] sm:$0xff] }
  0xc9   : > { %3836 = vmatpush1.bf16.msra.mxu0 %v3835_v29  ;;  %755 = vmatprep.mubr.f32.mxu0 %v672_v34  ;;  %v3873_v29 = vpack.c.bf16 %v340_v27, %v338_v46  ;;  %v3008_v46 = vld [vmem:[%s8089_s1 + $0x858] sm:$0xff]  ;;  %v3903_v27 = vpack.c.bf16 %v3003_v20, %v3001_v19  ;;  %v3022_v12 = vld [vmem:[%s8089_s1 + $0x8c8] sm:$0xff]  ;;  %v1219_v19 = vld [vmem:[%s8090_s2 + $0x120] sm:$0xff] }
  0xca   : > { %3838 = vmatprep.subr.bf16.mxu0 %v3837_v31  ;;  %v339_v31 = vld [vmem:[%s8089_s1 + $0x350] sm:$0xff]  ;;  %v3921_v20 = vpack.c.bf16 %v3024_v26, %v3022_v12 }
  0xcb   : > { %v3875_v34 = vpack.c.bf16 %v339_v31, %v337_v30  ;;  %v3010_v31 = vld [vmem:[%s8089_s1 + $0x868] sm:$0xff] }
  0xcc   : > { %756 = vmatmul.mubr.f32.gmra.mrb[2].mxu0 %v670_v40  ;;  %v348_v40 = vld [vmem:[%s8089_s1 + $0x398] sm:$0xff] }
  0xcd   : > { %3840 = vmatpush1.bf16.msra.mxu0 %v3839_v39  ;;  %826 = vmatprep.mubr.f32.mxu0 %v668_v42  ;;  %v346_v39 = vld [vmem:[%s8089_s1 + $0x388] sm:$0xff]  ;;  %v347_v42 = vld [vmem:[%s8089_s1 + $0x390] sm:$0xff] }
  0xce   : > { %3842 = vmatprep.subr.bf16.mxu0 %v3841_v44  ;;  %v3879_v44 = vpack.c.bf16 %v343_v38, %v341_v37  ;;  %v3881_v47 = vpack.c.bf16 %v348_v40, %v346_v39  ;;  %v1188_v37 = vld [vmem:[%s8090_s2 + $0x28] sm:$0xff]  ;;  %v1183_v38 = vld [vmem:[%s8090_s2] sm:$0xff] }
  0xd1   : > { %3844 = vmatpush1.bf16.msra.mxu0 %v3843_v48  ;;  %v3883_v48 = vpack.c.bf16 %v347_v42, %v345_v41  ;;  %v1196_v41 = vld [vmem:[%s8090_s2 + $0x68] sm:$0xff]  ;;  %v3909_v42 = vpack.c.bf16 %v3012_v32, %v3010_v31  ;;  %v1227_v31 = vld [vmem:[%s8090_s2 + $0x160] sm:$0xff] }
  0xd2   : > { %3846 = vmatprep.subr.bf16.mxu0 %v3845_v49  ;;  %v3885_v49 = vpack.c.bf16 %v352_v45, %v350_v43 }
  0xd5   : > { %3848 = vmatpush1.bf16.msra.mxu0 %v3847_v54  ;;  %v3887_v54 = vpack.c.bf16 %v351_v51, %v349_v50  ;;  %v1200_v50 = vld [vmem:[%s8090_s2 + $0x88] sm:$0xff] }
  0xd6   : > { %3850 = vmatprep.subr.bf16.mxu0 %v3849_v55  ;;  %v3889_v55 = vpack.c.bf16 %v356_v53, %v354_v52  ;;  %v3014_v51 = vld [vmem:[%s8089_s1 + $0x888] sm:$0xff]  ;;  %v3016_v52 = vld [vmem:[%s8089_s1 + $0x898] sm:$0xff] }
  0xd7   : > { %v1204_v53 = vld [vmem:[%s8090_s2 + $0xa8] sm:$0xff] }
  0xd9   : > { %3852 = vmatpush1.bf16.msra.mxu0 %v3851_v59  ;;  %v3891_v59 = vpack.c.bf16 %v355_v60, %v353_v56  ;;  %v3013_v56 = vld [vmem:[%s8089_s1 + $0x880] sm:$0xff]  ;;  %v4033_v60 = vpack.c.bf16 %v1204_v53, %v1200_v50  ;;  %v3034_v50 = vld [vmem:[%s8089_s1 + $0x928] sm:$0xff] }
  0xda   : > { %3854 = vmatprep.subr.bf16.mxu0 %v3853_v62  ;;  %v3893_v62 = vpack.c.bf16 %v360_v58, %v358_v57  ;;  %v1199_v57 = vld [vmem:[%s8090_s2 + $0x80] sm:$0xff] }
  0xdb   : > { %v1203_v58 = vld [vmem:[%s8090_s2 + $0xa0] sm:$0xff] }
  0xdd   : > { %3856 = vmatpush1.bf16.msra.mxu0 %v3855_v2  ;;  %v3000_v2 = vld [vmem:[%s8089_s1 + $0x818] sm:$0xff] }
  0xde   : > { %3858 = vmatprep.subr.bf16.mxu0 %v3857_v3  ;;  %v232_v3 = vld [vmem:[#allocation3 + $0x58] sm:$0x7f]  ;;  %v3897_v7 = vpack.c.bf16 %v3000_v2, %v2998_v1  ;;  %v4035_v2 = vpack.c.bf16 %v1203_v58, %v1199_v57  ;;  %v3035_v58 = vld [vmem:[%s8089_s1 + $0x930] sm:$0xff] }
  0xdf   : > { %v675_v10 = vrot.slane %v232_v3, 7  ;;  %v3020_v1 = vld [vmem:[%s8089_s1 + $0x8b8] sm:$0xff] }
  0xe1   : > { %3860 = vmatpush1.bf16.msra.mxu0 %v3859_v8  ;;  %v2997_v8 = vld [vmem:[%s8089_s1 + $0x800] sm:$0xff] }
  0xe2   : > { %3862 = vmatprep.subr.bf16.mxu0 %v3861_v9  ;;  %v2999_v9 = vld [vmem:[%s8089_s1 + $0x810] sm:$0xff] }
  0xe5   : > { %3864 = vmatpush1.bf16.msra.mxu0 %v3863_v15  ;;  %v665_v15 = vsel %vm656_vm1, %v663_v5, %v664_v6  ;;  %v4037_v5 = vpack.c.bf16 %v1212_v0, %v1208_v61  ;;  %v1207_v6 = vld [vmem:[%s8090_s2 + $0xc0] sm:$0xff]  ;;  %v3038_v61 = vld [vmem:[%s8089_s1 + $0x948] sm:$0xff]  ;;  %v3040_v0 = vld [vmem:[%s8089_s1 + $0x958] sm:$0xff] }
  0xe6   : > { %3866 = vmatprep.subr.bf16.mxu0 %v3865_v16  ;;  %v3899_v16 = vpack.c.bf16 %v2999_v9, %v2997_v8  ;;  %v3917_v8 = vpack.c.bf16 %v3020_v1, %v3018_v63  ;;  %v3019_v9 = vld [vmem:[%s8089_s1 + $0x8b0] sm:$0xff] }
  0xe9   : > { %3868 = vmatpush1.bf16.msra.mxu0 %v3867_v21  ;;  %v676_v21 = vsel %vm656_vm1, %v667_v36, %v675_v10  ;;  %v3905_v36 = vpack.c.bf16 %v3008_v46, %v3006_v25  ;;  %v1216_v10 = vld [vmem:[%s8090_s2 + $0x108] sm:$0xff] }
  0xea   : > { %3870 = vmatprep.subr.bf16.mxu0 %v3869_v23  ;;  %v996_v23 = vrot.slane %v840_v13, 1  ;;  %v4041_v17 = vpack.c.bf16 %v1220_v11, %v1216_v10  ;;  %v1228_v25 = vld [vmem:[%s8090_s2 + $0x168] sm:$0xff]  ;;  %v3044_v11 = vld [vmem:[%s8089_s1 + $0x978] sm:$0xff] }
  0xeb   : > { %v3026_v46 = vld [vmem:[%s8089_s1 + $0x8e8] sm:$0xff] }
  0xec   : > { %v998_v30 = vsel %vm992_vm2, %v996_v23, %v997_v24  ;;  %v1224_v23 = vld [vmem:[%s8090_s2 + $0x148] sm:$0xff] }
  0xed   : > { %3872 = vmatpush1.bf16.msra.mxu0 %v3871_v28  ;;  %v3005_v28 = vld [vmem:[%s8089_s1 + $0x840] sm:$0xff]  ;;  %v3042_v10 = vld [vmem:[%s8089_s1 + $0x968] sm:$0xff] }
  0xee   : > { %3874 = vmatprep.subr.bf16.mxu0 %v3873_v29  ;;  %v3007_v29 = vld [vmem:[%s8089_s1 + $0x850] sm:$0xff] }
  0xef   : > { %v3907_v39 = vpack.c.bf16 %v3007_v29, %v3005_v28  ;;  %v3025_v28 = vld [vmem:[%s8089_s1 + $0x8e0] sm:$0xff]  ;;  %v4045_v29 = vpack.c.bf16 %v1228_v25, %v1224_v23  ;;  %v3046_v23 = vld [vmem:[%s8089_s1 + $0x988] sm:$0xff]  ;;  %v3048_v25 = vld [vmem:[%s8089_s1 + $0x998] sm:$0xff] }
  0xf1   : > { %3876 = vmatpush1.bf16.msra.mxu0 %v3875_v34  ;;  %v3011_v34 = vld [vmem:[%s8089_s1 + $0x870] sm:$0xff] }
  0xf2   : > { %3878 = vmatprep.subr.bf16.mxu0 %v3877_v35  ;;  %v1184_v35 = vld [vmem:[%s8090_s2 + $0x8] sm:$0xff] }
  0xf3   : > { %v4025_v40 = vpack.c.bf16 %v1188_v37, %v1184_v35  ;;  %v1236_v35 = vld [vmem:[%s8090_s2 + $0x1a8] sm:$0xff] }
  0xf4   : > { %v3030_v37 = vld [vmem:[%s8089_s1 + $0x908] sm:$0xff] }
  0xf5   : > { %3880 = vmatpush1.bf16.msra.mxu0 %v3879_v44  ;;  %v1187_v44 = vld [vmem:[%s8090_s2 + $0x20] sm:$0xff]  ;;  %4026 = vmatprep.subr.bf16.mxu1 %v4025_v40 }
  0xf6   : > { %3882 = vmatprep.subr.bf16.mxu0 %v3881_v47  ;;  %v1192_v47 = vld [vmem:[%s8090_s2 + $0x48] sm:$0xff]  ;;  %v4027_v43 = vpack.c.bf16 %v1187_v44, %v1183_v38  ;;  %v3032_v38 = vld [vmem:[%s8089_s1 + $0x918] sm:$0xff]  ;;  %v3029_v44 = vld [vmem:[%s8089_s1 + $0x900] sm:$0xff] }
  0xf7   : > { %v4029_v45 = vpack.c.bf16 %v1196_v41, %v1192_v47  ;;  %v1231_v41 = vld [vmem:[%s8090_s2 + $0x180] sm:$0xff] }
  0xf8   : > { %4028 = vmatpush1.bf16.msra.mxu1 %v4027_v43  ;;  %v3929_v43 = vpack.c.bf16 %v3032_v38, %v3030_v37 }
  0xf9   : > { %3884 = vmatpush1.bf16.msra.mxu0 %v3883_v48  ;;  %v1191_v48 = vld [vmem:[%s8090_s2 + $0x40] sm:$0xff]  ;;  %4030 = vmatprep.subr.bf16.mxu1 %v4029_v45  ;;  %v3031_v45 = vld [vmem:[%s8089_s1 + $0x910] sm:$0xff] }
  0xfa   : > { %3886 = vmatprep.subr.bf16.mxu0 %v3885_v49  ;;  %v1195_v49 = vld [vmem:[%s8090_s2 + $0x60] sm:$0xff]  ;;  %v3931_v53 = vpack.c.bf16 %v3031_v45, %v3029_v44  ;;  %v1284_v45 = vld [vmem:[%s8090_s2 + $0x328] sm:$0xff] }
  0xfb   : > { %v1271_v44 = vld [vmem:[%s8090_s2 + $0x2c0] sm:$0xff] }
  0xfd   : > { %3888 = vmatpush1.bf16.msra.mxu0 %v3887_v54  ;;  %v4031_v54 = vpack.c.bf16 %v1195_v49, %v1191_v48  ;;  %v1240_v48 = vld [vmem:[%s8090_s2 + $0x1c8] sm:$0xff] }
  0xfe   : > { %3890 = vmatprep.subr.bf16.mxu0 %v3889_v55  ;;  %v3911_v55 = vpack.c.bf16 %v3011_v34, %v3009_v33  ;;  %v3027_v33 = vld [vmem:[%s8089_s1 + $0x8f0] sm:$0xff]  ;;  %v1232_v34 = vld [vmem:[%s8090_s2 + $0x188] sm:$0xff] }
  0xff   : > { %4032 = vmatpush1.bf16.msra.mxu1 %v4031_v54  ;;  %v3927_v40 = vpack.c.bf16 %v3027_v33, %v3025_v28  ;;  %v4049_v47 = vpack.c.bf16 %v1236_v35, %v1232_v34  ;;  %v1244_v49 = vld [vmem:[%s8090_s2 + $0x1e8] sm:$0xff]  ;;  %v3033_v54 = vld [vmem:[%s8089_s1 + $0x920] sm:$0xff]  ;;  %v3052_v35 = vld [vmem:[%s8089_s1 + $0x9b8] sm:$0xff] }
 0x100   : > { %4034 = vmatprep.subr.bf16.mxu1 %v4033_v60  ;;  %v1243_v60 = vld [vmem:[%s8090_s2 + $0x1e0] sm:$0xff]  ;;  %v3935_v1 = vpack.c.bf16 %v3035_v58, %v3033_v54  ;;  %v1276_v33 = vld [vmem:[%s8090_s2 + $0x2e8] sm:$0xff] }
 0x101   : > { %3892 = vmatpush1.bf16.msra.mxu0 %v3891_v59  ;;  %v3913_v59 = vpack.c.bf16 %v3016_v52, %v3014_v51  ;;  %v3036_v51 = vld [vmem:[%s8089_s1 + $0x938] sm:$0xff]  ;;  %v1263_v28 = vld [vmem:[%s8090_s2 + $0x280] sm:$0xff]  ;;  %v3050_v34 = vld [vmem:[%s8089_s1 + $0x9a8] sm:$0xff] }
 0x102   : > { %3894 = vmatprep.subr.bf16.mxu0 %v3893_v62  ;;  %v3015_v62 = vld [vmem:[%s8089_s1 + $0x890] sm:$0xff]  ;;  %v3933_v57 = vpack.c.bf16 %v3036_v51, %v3034_v50  ;;  %v1279_v54 = vld [vmem:[%s8090_s2 + $0x300] sm:$0xff]  ;;  %v1292_v58 = vld [vmem:[%s8090_s2 + $0x368] sm:$0xff] }
 0x103   : > { %v3915_v3 = vpack.c.bf16 %v3015_v62, %v3013_v56  ;;  %4036 = vmatpush1.bf16.msra.mxu1 %v4035_v2  ;;  %v1239_v56 = vld [vmem:[%s8090_s2 + $0x1c0] sm:$0xff]  ;;  %v1252_v62 = vld [vmem:[%s8090_s2 + $0x228] sm:$0xff] }
 0x104   : > { %4038 = vmatprep.subr.bf16.mxu1 %v4037_v5  ;;  %v4055_v63 = vpack.c.bf16 %v1243_v60, %v1239_v56  ;;  %v3037_v2 = vld [vmem:[%s8089_s1 + $0x940] sm:$0xff]  ;;  %v3055_v60 = vld [vmem:[%s8089_s1 + $0x9d0] sm:$0xff] }
 0x105   : > { %3896 = vmatpush1.bf16.msra.mxu0 %v3895_v4  ;;  %v3017_v4 = vld [vmem:[%s8089_s1 + $0x8a0] sm:$0xff] }
 0x106   : > { %3898 = vmatprep.subr.bf16.mxu0 %v3897_v7  ;;  %v1211_v7 = vld [vmem:[%s8090_s2 + $0xe0] sm:$0xff] }
 0x107   : > { %v4039_v13 = vpack.c.bf16 %v1211_v7, %v1207_v6  ;;  %v1251_v5 = vld [vmem:[%s8090_s2 + $0x220] sm:$0xff]  ;;  %v3937_v6 = vpack.c.bf16 %v3040_v0, %v3038_v61  ;;  %v3039_v7 = vld [vmem:[%s8089_s1 + $0x950] sm:$0xff] }
 0x108   : > { %827 = vmatmul.mubr.f32.vlgmr.msra.gmra.mrb[0].mxu0 %v665_v15  ;;  %v3919_v15 = vpack.c.bf16 %v3019_v9, %v3017_v4  ;;  %v1247_v4 = vld [vmem:[%s8090_s2 + $0x200] sm:$0xff]  ;;  %v1260_v9 = vld [vmem:[%s8090_s2 + $0x268] sm:$0xff]  ;;  %v3939_v26 = vpack.c.bf16 %v3039_v7, %v3037_v2 }
 0x109   : > { %3900 = vmatpush1.bf16.msra.mxu0 %v3899_v16  ;;  %832 = vmatprep.mubr.f32.mxu0 %v676_v21  ;;  %v3021_v16 = vld [vmem:[%s8089_s1 + $0x8c0] sm:$0xff]  ;;  %v3023_v21 = vld [vmem:[%s8089_s1 + $0x8d0] sm:$0xff]  ;;  %v4059_v12 = vpack.c.bf16 %v1251_v5, %v1247_v4  ;;  %v1296_v7 = vld [vmem:[%s8090_s2 + $0x388] sm:$0xff] }
 0x10a   : > { %3902 = vmatprep.subr.bf16.mxu0 %v3901_v18  ;;  %v1215_v18 = vld [vmem:[%s8090_s2 + $0x100] sm:$0xff]  ;;  %4040 = vmatpush1.bf16.msra.mxu1 %v4039_v13 }
 0x10b   : > { %4042 = vmatprep.subr.bf16.mxu1 %v4041_v17  ;;  %v3041_v13 = vld [vmem:[%s8089_s1 + $0x960] sm:$0xff] }
 0x10c   : > { %833 = vmatmul.mubr.f32.gmra.mrb[2].mxu0 %v674_v22  ;;  %v4043_v22 = vpack.c.bf16 %v1219_v19, %v1215_v18  ;;  %v1259_v17 = vld [vmem:[%s8090_s2 + $0x260] sm:$0xff]  ;;  %v3941_v18 = vpack.c.bf16 %v3044_v11, %v3042_v10  ;;  %v3043_v19 = vld [vmem:[%s8089_s1 + $0x970] sm:$0xff]  ;;  %v3064_v10 = vld [vmem:[%s8089_s1 + $0xa18] sm:$0xff] }
 0x10d   : > { %3904 = vmatpush1.bf16.msra.mxu0 %v3903_v27  ;;  %1085 = vmatprep.mubr.f32.mxu0 %v998_v30  ;;  %v3028_v27 = vld [vmem:[%s8089_s1 + $0x8f8] sm:$0xff]  ;;  %v1223_v30 = vld [vmem:[%s8090_s2 + $0x140] sm:$0xff]  ;;  %v848_v11 = vld [vmem:[#allocation3 + $0x68] sm:$0x1] }
 0x10e   : > { %3906 = vmatprep.subr.bf16.mxu0 %v3905_v36  ;;  %v3923_v36 = vpack.c.bf16 %v3023_v21, %v3021_v16  ;;  %v3925_v32 = vpack.c.bf16 %v3028_v27, %v3026_v46  ;;  %4044 = vmatpush1.bf16.msra.mxu1 %v4043_v22  ;;  %v1255_v16 = vld [vmem:[%s8090_s2 + $0x240] sm:$0xff]  ;;  %v1268_v21 = vld [vmem:[%s8090_s2 + $0x2a8] sm:$0xff]  ;;  %v3943_v27 = vpack.c.bf16 %v3043_v19, %v3041_v13 }
 0x10f   : > { %4046 = vmatprep.subr.bf16.mxu1 %v4045_v29  ;;  %v4063_v46 = vpack.c.bf16 %v1259_v17, %v1255_v16  ;;  %v3045_v22 = vld [vmem:[%s8089_s1 + $0x980] sm:$0xff] }
 0x110   : > { %v1267_v29 = vld [vmem:[%s8090_s2 + $0x2a0] sm:$0xff] }
 0x111   : > { %3908 = vmatpush1.bf16.msra.mxu0 %v3907_v39  ;;  %v4047_v39 = vpack.c.bf16 %v1227_v31, %v1223_v30  ;;  %v3945_v30 = vpack.c.bf16 %v3048_v25, %v3046_v23  ;;  %v3047_v31 = vld [vmem:[%s8089_s1 + $0x990] sm:$0xff]  ;;  %v4067_v37 = vpack.c.bf16 %v1267_v29, %v1263_v28  ;;  %v3057_v61 = vld [vmem:[%s8089_s1 + $0x9e0] sm:$0xff]  ;;  %v1007_v25 = vrot.slane %v848_v11, 1 }
 0x112   : > { %3910 = vmatprep.subr.bf16.mxu0 %v3909_v42  ;;  %v1235_v42 = vld [vmem:[%s8090_s2 + $0x1a0] sm:$0xff]  ;;  %v3947_v38 = vpack.c.bf16 %v3047_v31, %v3045_v22  ;;  %v3063_v23 = vld [vmem:[%s8089_s1 + $0xa10] sm:$0xff]  ;;  %v3068_v22 = vld [vmem:[%s8089_s1 + $0xa38] sm:$0xff] }
 0x113   : > { %4048 = vmatpush1.bf16.msra.mxu1 %v4047_v39  ;;  %v4051_v52 = vpack.c.bf16 %v1235_v42, %v1231_v41  ;;  %v3049_v39 = vld [vmem:[%s8089_s1 + $0x9a0] sm:$0xff]  ;;  %v3949_v41 = vpack.c.bf16 %v3052_v35, %v3050_v34  ;;  %v3051_v42 = vld [vmem:[%s8089_s1 + $0x9b0] sm:$0xff]  ;;  %v1008_v35 = vsel %vm992_vm2, %v997_v24, %v1007_v25 }
 0x114   : > { %4050 = vmatprep.subr.bf16.mxu1 %v4049_v47  ;;  %v1275_v47 = vld [vmem:[%s8090_s2 + $0x2e0] sm:$0xff]  ;;  %v3951_v51 = vpack.c.bf16 %v3051_v42, %v3049_v39  ;;  %v3067_v34 = vld [vmem:[%s8089_s1 + $0xa30] sm:$0xff] }
 0x115   : > { %3912 = vmatpush1.bf16.msra.mxu0 %v3911_v55  ;;  %v4053_v55 = vpack.c.bf16 %v1244_v49, %v1240_v48  ;;  %v3054_v48 = vld [vmem:[%s8089_s1 + $0x9c8] sm:$0xff]  ;;  %v3056_v49 = vld [vmem:[%s8089_s1 + $0x9d8] sm:$0xff]  ;;  %v4071_v50 = vpack.c.bf16 %v1275_v47, %v1271_v44  ;;  %v1291_v4 = vld [vmem:[%s8090_s2 + $0x360] sm:$0xff] }
 0x116   : > { %3914 = vmatprep.subr.bf16.mxu0 %v3913_v59  ;;  %v1248_v59 = vld [vmem:[%s8090_s2 + $0x208] sm:$0xff]  ;;  %v3953_v56 = vpack.c.bf16 %v3056_v49, %v3054_v48  ;;  %v1299_v19 = vld [vmem:[%s8090_s2 + $0x3a0] sm:$0xff]  ;;  %v3072_v44 = vld [vmem:[%s8089_s1 + $0xa58] sm:$0xff] }
 0x117   : > { %4052 = vmatpush1.bf16.msra.mxu1 %v4051_v52  ;;  %v3053_v52 = vld [vmem:[%s8089_s1 + $0x9c0] sm:$0xff]  ;;  %v3071_v42 = vld [vmem:[%s8089_s1 + $0xa50] sm:$0xff]  ;;  %v3076_v48 = vld [vmem:[%s8089_s1 + $0xa78] sm:$0xff] }
 0x118   : > { %4054 = vmatprep.subr.bf16.mxu1 %v4053_v55  ;;  %v1283_v55 = vld [vmem:[%s8090_s2 + $0x320] sm:$0xff] }
 0x119   : > { %3916 = vmatpush1.bf16.msra.mxu0 %v3915_v3  ;;  %v4057_v3 = vpack.c.bf16 %v1252_v62, %v1248_v59  ;;  %v3058_v59 = vld [vmem:[%s8089_s1 + $0x9e8] sm:$0xff]  ;;  %v3060_v62 = vld [vmem:[%s8089_s1 + $0x9f8] sm:$0xff]  ;;  %v4075_v0 = vpack.c.bf16 %v1283_v55, %v1279_v54  ;;  %v3089_v11 = vld [vmem:[%s8089_s1 + $0xae0] sm:$0xff] }
 0x11a   : > { %3918 = vmatprep.subr.bf16.mxu0 %v3917_v8  ;;  %v1256_v8 = vld [vmem:[%s8090_s2 + $0x248] sm:$0xff]  ;;  %v3957_v5 = vpack.c.bf16 %v3060_v62, %v3058_v59  ;;  %v3080_v54 = vld [vmem:[%s8089_s1 + $0xa98] sm:$0xff]  ;;  %v3097_v25 = vld [vmem:[%s8089_s1 + $0xb20] sm:$0xff] }
 0x11b   : > { %4056 = vmatpush1.bf16.msra.mxu1 %v4055_v63  ;;  %v3955_v63 = vpack.c.bf16 %v3055_v60, %v3053_v52  ;;  %v3075_v52 = vld [vmem:[%s8089_s1 + $0xa70] sm:$0xff]  ;;  %v3077_v60 = vld [vmem:[%s8089_s1 + $0xa80] sm:$0xff]  ;;  %v3084_v59 = vld [vmem:[%s8089_s1 + $0xab8] sm:$0xff] }
 0x11c   : > { %4058 = vmatprep.subr.bf16.mxu1 %v4057_v3  ;;  %v1287_v3 = vld [vmem:[%s8090_s2 + $0x340] sm:$0xff] }
 0x11d   : > { %3920 = vmatpush1.bf16.msra.mxu0 %v3919_v15  ;;  %v4061_v15 = vpack.c.bf16 %v1260_v9, %v1256_v8  ;;  %v1300_v8 = vld [vmem:[%s8090_s2 + $0x3a8] sm:$0xff] }
 0x11e   : > { %3922 = vmatprep.subr.bf16.mxu0 %v3921_v20  ;;  %v1264_v20 = vld [vmem:[%s8090_s2 + $0x288] sm:$0xff]  ;;  %v4081_v17 = vpack.c.bf16 %v1300_v8, %v1296_v7  ;;  %v3092_v8 = vld [vmem:[%s8089_s1 + $0xaf8] sm:$0xff] }
 0x11f   : > { %4060 = vmatpush1.bf16.msra.mxu1 %v4059_v12  ;;  %v3062_v9 = vld [vmem:[%s8089_s1 + $0xa08] sm:$0xff]  ;;  %v4079_v12 = vpack.c.bf16 %v1291_v4, %v1287_v3 }
 0x120   : > { %4062 = vmatprep.subr.bf16.mxu1 %v4061_v15  ;;  %v4714_v15 = vld [vmem:[#allocation3 + $0x40] sm:$0xff]  ;;  %v3090_v7 = vld [vmem:[%s8089_s1 + $0xae8] sm:$0xff] }
 0x121   : > { %3924 = vmatpush1.bf16.msra.mxu0 %v3923_v36  ;;  %v4065_v36 = vpack.c.bf16 %v1268_v21, %v1264_v20  ;;  %v994_v16 = vrot.slane %v4714_v15, 1  ;;  %v3961_v20 = vpack.c.bf16 %v3064_v10, %v3062_v9  ;;  %v3061_v21 = vld [vmem:[%s8089_s1 + $0xa00] sm:$0xff]  ;;  %v3989_v10 = vpack.c.bf16 %v3092_v8, %v3090_v7 }
 0x122   : > { %3926 = vmatprep.subr.bf16.mxu0 %v3925_v32  ;;  %v1272_v32 = vld [vmem:[%s8090_s2 + $0x2c8] sm:$0xff] }
 0x123   : > { %4064 = vmatpush1.bf16.msra.mxu1 %v4063_v46  ;;  %v847_v46 = vld [vmem:[#allocation3 + $0x60] sm:$0x1] }
 0x124   : > { %4066 = vmatprep.subr.bf16.mxu1 %v4065_v36  ;;  %v842_v36 = vld [vmem:[#allocation3 + $0x38] sm:$0xfe]  ;;  %v1005_v31 = vrot.slane %v847_v46, 1  ;;  %v3099_v46 = vld [vmem:[%s8089_s1 + $0xb30] sm:$0xff] }
 0x125   : > { %3928 = vmatpush1.bf16.msra.mxu0 %v3927_v40  ;;  %v4069_v40 = vpack.c.bf16 %v1276_v33, %v1272_v32  ;;  %v3065_v33 = vld [vmem:[%s8089_s1 + $0xa20] sm:$0xff] }
 0x126   : > { %3930 = vmatprep.subr.bf16.mxu0 %v3929_v43  ;;  %v1280_v43 = vld [vmem:[%s8090_s2 + $0x308] sm:$0xff]  ;;  %v3967_v47 = vpack.c.bf16 %v3067_v34, %v3065_v33  ;;  %v1006_v14 = vsel %vm992_vm2, %v994_v16, %v1005_v31 }
 0x127   : > { %4068 = vmatpush1.bf16.msra.mxu1 %v4067_v37  ;;  %v1002_v37 = vrot.slane %v842_v36, 1  ;;  %v3999_v36 = vpack.c.bf16 %v3099_v46, %v3097_v25  ;;  %v3106_v31 = vld [vmem:[%s8089_s1 + $0xb68] sm:$0xff] }
 0x128   : > { %4070 = vmatprep.subr.bf16.mxu1 %v4069_v40  ;;  %v3070_v40 = vld [vmem:[%s8089_s1 + $0xa48] sm:$0xff] }
 0x129   : > { %3932 = vmatpush1.bf16.msra.mxu0 %v3931_v53  ;;  %v4073_v53 = vpack.c.bf16 %v1284_v45, %v1280_v43  ;;  %v3969_v24 = vpack.c.bf16 %v3072_v44, %v3070_v40  ;;  %v3074_v45 = vld [vmem:[%s8089_s1 + $0xa68] sm:$0xff]  ;;  %v3112_v44 = vld [vmem:[%s8089_s1 + $0xb98] sm:$0xff] }
 0x12a   : > { %3934 = vmatprep.subr.bf16.mxu0 %v3933_v57  ;;  %v1288_v57 = vld [vmem:[%s8090_s2 + $0x348] sm:$0xff] }
 0x12b   : > { %4072 = vmatpush1.bf16.msra.mxu1 %v4071_v50  ;;  %v4077_v2 = vpack.c.bf16 %v1292_v58, %v1288_v57  ;;  %v3973_v50 = vpack.c.bf16 %v3076_v48, %v3074_v45  ;;  %v3079_v57 = vld [vmem:[%s8089_s1 + $0xa90] sm:$0xff]  ;;  %v3082_v58 = vld [vmem:[%s8089_s1 + $0xaa8] sm:$0xff] }
 0x12c   : > { %4074 = vmatprep.subr.bf16.mxu1 %v4073_v53  ;;  %v3078_v53 = vld [vmem:[%s8089_s1 + $0xa88] sm:$0xff]  ;;  %v3979_v62 = vpack.c.bf16 %v3079_v57, %v3077_v60  ;;  %v3124_v57 = vld [vmem:[%s8089_s1 + $0xbf8] sm:$0xff] }
 0x12d   : > { %3936 = vmatpush1.bf16.msra.mxu0 %v3935_v1  ;;  %v3059_v1 = vld [vmem:[%s8089_s1 + $0x9f0] sm:$0xff]  ;;  %v3110_v40 = vld [vmem:[%s8089_s1 + $0xb88] sm:$0xff] }
 0x12e   : > { %3938 = vmatprep.subr.bf16.mxu0 %v3937_v6  ;;  %v839_v6 = vld [vmem:[#allocation3 + $0x20] sm:$0xfe]  ;;  %v3122_v60 = vld [vmem:[%s8089_s1 + $0xbe8] sm:$0xff] }
 0x12f   : > { %4076 = vmatpush1.bf16.msra.mxu1 %v4075_v0  ;;  %v993_v13 = vrot.slane %v839_v6, 1  ;;  %v3081_v0 = vld [vmem:[%s8089_s1 + $0xaa0] sm:$0xff]  ;;  %v3087_v6 = vld [vmem:[%s8089_s1 + $0xad0] sm:$0xff] }
 0x130   : > { %4078 = vmatprep.subr.bf16.mxu1 %v4077_v2  ;;  %v3088_v2 = vld [vmem:[%s8089_s1 + $0xad8] sm:$0xff] }
 0x131   : > { %3940 = vmatpush1.bf16.msra.mxu0 %v3939_v26  ;;  %v3959_v26 = vpack.c.bf16 %v3059_v1, %v3057_v61  ;;  %v995_v29 = vsel %vm992_vm2, %v993_v13, %v994_v16  ;;  %v3981_v61 = vpack.c.bf16 %v3084_v59, %v3082_v58  ;;  %v3086_v1 = vld [vmem:[%s8089_s1 + $0xac8] sm:$0xff]  ;;  %v3096_v13 = vld [vmem:[%s8089_s1 + $0xb18] sm:$0xff]  ;;  %v4021_v59 = vpack.c.bf16 %v3124_v57, %v3122_v60  ;;  %v1225_v57 = vld [vmem:[%s8090_s2 + $0x150] sm:$0xff] }
 0x132   : > { %3942 = vmatprep.subr.bf16.mxu0 %v3941_v18  ;;  %v1295_v18 = vld [vmem:[%s8090_s2 + $0x380] sm:$0xff]  ;;  %v3985_v4 = vpack.c.bf16 %v3088_v2, %v3086_v1 }
 0x133   : > { %4080 = vmatpush1.bf16.msra.mxu1 %v4079_v12  ;;  %v4083_v28 = vpack.c.bf16 %v1299_v19, %v1295_v18  ;;  %v3091_v12 = vld [vmem:[%s8089_s1 + $0xaf0] sm:$0xff]  ;;  %v3098_v19 = vld [vmem:[%s8089_s1 + $0xb28] sm:$0xff] }
 0x134   : > { %4082 = vmatprep.subr.bf16.mxu1 %v4081_v17  ;;  %v3991_v15 = vpack.c.bf16 %v3091_v12, %v3089_v11  ;;  %v3093_v17 = vld [vmem:[%s8089_s1 + $0xb00] sm:$0xff]  ;;  %v3095_v18 = vld [vmem:[%s8089_s1 + $0xb10] sm:$0xff]  ;;  %v1304_v11 = vld [vmem:[%s8090_s2 + $0x3c8] sm:$0xff] }
 0x135   : > { %3944 = vmatpush1.bf16.msra.mxu0 %v3943_v27  ;;  %v3066_v27 = vld [vmem:[%s8089_s1 + $0xa28] sm:$0xff] }
 0x136   : > { %3946 = vmatprep.subr.bf16.mxu0 %v3945_v30  ;;  %v3963_v30 = vpack.c.bf16 %v3063_v23, %v3061_v21  ;;  %v3965_v32 = vpack.c.bf16 %v3068_v22, %v3066_v27  ;;  %v3995_v21 = vpack.c.bf16 %v3095_v18, %v3093_v17  ;;  %v3102_v27 = vld [vmem:[%s8089_s1 + $0xb48] sm:$0xff]  ;;  %v3104_v22 = vld [vmem:[%s8089_s1 + $0xb58] sm:$0xff]  ;;  %v1185_v18 = vld [vmem:[%s8090_s2 + $0x10] sm:$0xff] }
 0x137   : > { %4084 = vmatpush1.bf16.msra.mxu1 %v4083_v28  ;;  %v4001_v28 = vpack.c.bf16 %v3104_v22, %v3102_v27  ;;  %v1308_v12 = vld [vmem:[%s8090_s2 + $0x3e8] sm:$0xff] }
 0x139   : > { %3948 = vmatpush1.bf16.msra.mxu0 %v3947_v38  ;;  %v6018_v38 = vld [vmem:[#allocation3 + $0x58] sm:$0xff] }
 0x13a   : > { %3950 = vmatprep.subr.bf16.mxu0 %v3949_v41  ;;  %v1003_v39 = vrot.slane %v6018_v38, 1  ;;  %v3069_v41 = vld [vmem:[%s8089_s1 + $0xa40] sm:$0xff] }
 0x13b   : > { %v3971_v49 = vpack.c.bf16 %v3071_v42, %v3069_v41  ;;  %v3111_v41 = vld [vmem:[%s8089_s1 + $0xb90] sm:$0xff]  ;;  %v3114_v42 = vld [vmem:[%s8089_s1 + $0xba8] sm:$0xff]  ;;  %v1303_v38 = vld [vmem:[%s8090_s2 + $0x3c0] sm:$0xff] }
 0x13c   : > { %v1004_v43 = vsel %vm992_vm2, %v1002_v37, %v1003_v39  ;;  %v3107_v37 = vld [vmem:[%s8089_s1 + $0xb70] sm:$0xff] }
 0x13d   : > { %3952 = vmatpush1.bf16.msra.mxu0 %v3951_v51  ;;  %v3073_v51 = vld [vmem:[%s8089_s1 + $0xa60] sm:$0xff] }
 0x13e   : > { %3954 = vmatprep.subr.bf16.mxu0 %v3953_v56  ;;  %v3975_v55 = vpack.c.bf16 %v3075_v52, %v3073_v51  ;;  %v3977_v56 = vpack.c.bf16 %v3080_v54, %v3078_v53  ;;  %v3118_v51 = vld [vmem:[%s8089_s1 + $0xbc8] sm:$0xff]  ;;  %v3120_v52 = vld [vmem:[%s8089_s1 + $0xbd8] sm:$0xff] }
 0x13f   : > { %v4017_v54 = vpack.c.bf16 %v3120_v52, %v3118_v51  ;;  %v1217_v52 = vld [vmem:[%s8090_s2 + $0x110] sm:$0xff] }
 0x141   : > { %3956 = vmatpush1.bf16.msra.mxu0 %v3955_v63  ;;  %v3083_v63 = vld [vmem:[%s8089_s1 + $0xab0] sm:$0xff] }
 0x142   : > { %3958 = vmatprep.subr.bf16.mxu0 %v3957_v5  ;;  %v3983_v3 = vpack.c.bf16 %v3083_v63, %v3081_v0  ;;  %v3085_v5 = vld [vmem:[%s8089_s1 + $0xac0] sm:$0xff]  ;;  %v841_v0 = vld [vmem:[#allocation3 + $0x30] sm:$0xfe]  ;;  %v850_v63 = vld [vmem:[#allocation3 + $0x78] sm:$0x1] }
 0x143   : > { %v3987_v9 = vpack.c.bf16 %v3087_v6, %v3085_v5  ;;  %v999_v2 = vrot.slane %v841_v0, 1  ;;  %v1011_v5 = vrot.slane %v850_v63, 1  ;;  %v849_v6 = vld [vmem:[#allocation3 + $0x70] sm:$0x1] }
 0x144   : > { %v1009_v8 = vrot.slane %v849_v6, 1  ;;  %v1233_v63 = vld [vmem:[%s8090_s2 + $0x190] sm:$0xff] }
 0x145   : > { %3960 = vmatpush1.bf16.msra.mxu0 %v3959_v26  ;;  %v3094_v26 = vld [vmem:[%s8089_s1 + $0xb08] sm:$0xff]  ;;  %v1241_v6 = vld [vmem:[%s8090_s2 + $0x1d0] sm:$0xff] }
 0x146   : > { %3962 = vmatprep.subr.bf16.mxu0 %v3961_v20  ;;  %v3993_v16 = vpack.c.bf16 %v3096_v13, %v3094_v26  ;;  %v3100_v20 = vld [vmem:[%s8089_s1 + $0xb38] sm:$0xff]  ;;  %v4085_v26 = vpack.c.bf16 %v1308_v12, %v1304_v11  ;;  %v1249_v12 = vld [vmem:[%s8090_s2 + $0x210] sm:$0xff] }
 0x147   : > { %v3997_v23 = vpack.c.bf16 %v3100_v20, %v3098_v19  ;;  %v1189_v19 = vld [vmem:[%s8090_s2 + $0x30] sm:$0xff] }
 0x148   : > { %1086 = vmatmul.mubr.f32.vlgmr.msra.gmra.mrb[0].mxu0 %v995_v29  ;;  %v3101_v29 = vld [vmem:[%s8089_s1 + $0xb40] sm:$0xff]  ;;  %4086 = vmatprep.subr.bf16.mxu1 %v4085_v26  ;;  %v4091_v27 = vpack.c.bf16 %v1189_v19, %v1185_v18  ;;  %v1253_v26 = vld [vmem:[%s8090_s2 + $0x230] sm:$0xff]  ;;  %v1266_v18 = vld [vmem:[%s8090_s2 + $0x298] sm:$0xff] }
 0x149   : > { %3964 = vmatpush1.bf16.msra.mxu0 %v3963_v30  ;;  %1091 = vmatprep.mubr.f32.mxu0 %v1008_v35  ;;  %v3103_v30 = vld [vmem:[%s8089_s1 + $0xb50] sm:$0xff]  ;;  %v3105_v35 = vld [vmem:[%s8089_s1 + $0xb60] sm:$0xff]  ;;  %v1270_v19 = vld [vmem:[%s8090_s2 + $0x2b8] sm:$0xff] }
 0x14a   : > { %3966 = vmatprep.subr.bf16.mxu0 %v3965_v32  ;;  %v3108_v32 = vld [vmem:[%s8089_s1 + $0xb78] sm:$0xff]  ;;  %v4003_v33 = vpack.c.bf16 %v3103_v30, %v3101_v29  ;;  %v1197_v29 = vld [vmem:[%s8090_s2 + $0x70] sm:$0xff] }
 0x14b   : > { %v4005_v34 = vpack.c.bf16 %v3108_v32, %v3106_v31  ;;  %v1202_v31 = vld [vmem:[%s8090_s2 + $0x98] sm:$0xff] }
 0x14c   : > { %1092 = vmatmul.mubr.f32.gmra.mrb[2].mxu0 %v1006_v14  ;;  %v4009_v14 = vpack.c.bf16 %v3112_v44, %v3110_v40  ;;  %v1206_v32 = vld [vmem:[%s8090_s2 + $0xb8] sm:$0xff]  ;;  %v1201_v44 = vld [vmem:[%s8090_s2 + $0x90] sm:$0xff] }
 0x14d   : > { %3968 = vmatpush1.bf16.msra.mxu0 %v3967_v47  ;;  %1162 = vmatprep.mubr.f32.mxu0 %v1004_v43  ;;  %v4007_v47 = vpack.c.bf16 %v3107_v37, %v3105_v35  ;;  %v3116_v43 = vld [vmem:[%s8089_s1 + $0xbb8] sm:$0xff]  ;;  %v4097_v40 = vpack.c.bf16 %v1206_v32, %v1202_v31  ;;  %v1273_v31 = vld [vmem:[%s8090_s2 + $0x2d0] sm:$0xff] }
 0x14e   : > { %3970 = vmatprep.subr.bf16.mxu0 %v3969_v24  ;;  %v3109_v24 = vld [vmem:[%s8089_s1 + $0xb80] sm:$0xff]  ;;  %v4013_v48 = vpack.c.bf16 %v3116_v43, %v3114_v42  ;;  %v1209_v43 = vld [vmem:[%s8090_s2 + $0xd0] sm:$0xff] }
 0x14f   : > { %v4011_v45 = vpack.c.bf16 %v3111_v41, %v3109_v24  ;;  %v1214_v24 = vld [vmem:[%s8090_s2 + $0xf8] sm:$0xff]  ;;  %v1277_v32 = vld [vmem:[%s8090_s2 + $0x2f0] sm:$0xff] }
 0x151   : > { %3972 = vmatpush1.bf16.msra.mxu0 %v3971_v49  ;;  %v3113_v49 = vld [vmem:[%s8089_s1 + $0xba0] sm:$0xff] }
 0x152   : > { %3974 = vmatprep.subr.bf16.mxu0 %v3973_v50  ;;  %v3115_v50 = vld [vmem:[%s8089_s1 + $0xbb0] sm:$0xff] }
 0x153   : > { %v4015_v53 = vpack.c.bf16 %v3115_v50, %v3113_v49  ;;  %v1222_v49 = vld [vmem:[%s8090_s2 + $0x138] sm:$0xff] }
 0x155   : > { %3976 = vmatpush1.bf16.msra.mxu0 %v3975_v55  ;;  %v3117_v55 = vld [vmem:[%s8089_s1 + $0xbc0] sm:$0xff] }
 0x156   : > { %3978 = vmatprep.subr.bf16.mxu0 %v3977_v56  ;;  %v3119_v56 = vld [vmem:[%s8089_s1 + $0xbd0] sm:$0xff] }
 0x157   : > { %v4019_v58 = vpack.c.bf16 %v3119_v56, %v3117_v55  ;;  %v1230_v55 = vld [vmem:[%s8090_s2 + $0x178] sm:$0xff] }
 0x159   : > { %3980 = vmatpush1.bf16.msra.mxu0 %v3979_v62  ;;  %v3121_v62 = vld [vmem:[%s8089_s1 + $0xbe0] sm:$0xff] }
 0x15a   : > { %3982 = vmatprep.subr.bf16.mxu0 %v3981_v61  ;;  %v3123_v61 = vld [vmem:[%s8089_s1 + $0xbf0] sm:$0xff] }
 0x15b   : > { %v4023_v1 = vpack.c.bf16 %v3123_v61, %v3121_v62  ;;  %v1238_v62 = vld [vmem:[%s8090_s2 + $0x1b8] sm:$0xff] }
 0x15d   : > { %3984 = vmatpush1.bf16.msra.mxu0 %v3983_v3  ;;  %v4716_v3 = vld [vmem:[#allocation3 + $0x50] sm:$0xff] }
 0x15e   : > { %3986 = vmatprep.subr.bf16.mxu0 %v3985_v4  ;;  %v1000_v4 = vrot.slane %v4716_v3, 1  ;;  %v1246_v3 = vld [vmem:[%s8090_s2 + $0x1f8] sm:$0xff] }
 0x160   : > { %v1001_v7 = vsel %vm992_vm2, %v999_v2, %v1000_v4  ;;  %v1242_v2 = vld [vmem:[%s8090_s2 + $0x1d8] sm:$0xff] }
 0x161   : > { %3988 = vmatpush1.bf16.msra.mxu0 %v3987_v9  ;;  %v1012_v9 = vsel %vm992_vm2, %v1003_v39, %v1011_v5  ;;  %v1307_v39 = vld [vmem:[%s8090_s2 + $0x3e0] sm:$0xff]  ;;  %v4117_v5 = vpack.c.bf16 %v1246_v3, %v1242_v2  ;;  %v3255_v3 = vld [vmem:[%s8089_s1 + $0x1010] sm:$0xff] }
 0x162   : > { %3990 = vmatprep.subr.bf16.mxu0 %v3989_v10  ;;  %v1010_v10 = vsel %vm992_vm2, %v1000_v4, %v1009_v8  ;;  %v4087_v13 = vpack.c.bf16 %v1307_v39, %v1303_v38  ;;  %v1250_v8 = vld [vmem:[%s8090_s2 + $0x218] sm:$0xff]  ;;  %v3253_v2 = vld [vmem:[%s8089_s1 + $0x1000] sm:$0xff] }
 0x163   : > { %v1258_v38 = vld [vmem:[%s8090_s2 + $0x258] sm:$0xff] }
 0x164   : > { %4088 = vmatpush1.bf16.msra.mxu1 %v4087_v13  ;;  %v1262_v39 = vld [vmem:[%s8090_s2 + $0x278] sm:$0xff]  ;;  %v4123_v13 = vpack.c.bf16 %v1253_v26, %v1249_v12 }
 0x165   : > { %3992 = vmatpush1.bf16.msra.mxu0 %v3991_v15  ;;  %v1186_v15 = vld [vmem:[%s8090_s2 + $0x18] sm:$0xff] }
 0x166   : > { %3994 = vmatprep.subr.bf16.mxu0 %v3993_v16  ;;  %v1190_v16 = vld [vmem:[%s8090_s2 + $0x38] sm:$0xff] }
 0x167   : > { %v4089_v17 = vpack.c.bf16 %v1190_v16, %v1186_v15  ;;  %v4125_v15 = vpack.c.bf16 %v1262_v39, %v1258_v38  ;;  %v1257_v16 = vld [vmem:[%s8090_s2 + $0x250] sm:$0xff]  ;;  %v3261_v38 = vld [vmem:[%s8089_s1 + $0x1040] sm:$0xff] }
 0x168   : > { %v3263_v39 = vld [vmem:[%s8089_s1 + $0x1050] sm:$0xff] }
 0x169   : > { %3996 = vmatpush1.bf16.msra.mxu0 %v3995_v21  ;;  %4090 = vmatprep.subr.bf16.mxu1 %v4089_v17  ;;  %v1194_v21 = vld [vmem:[%s8090_s2 + $0x58] sm:$0xff]  ;;  %v1261_v17 = vld [vmem:[%s8090_s2 + $0x270] sm:$0xff] }
 0x16a   : > { %3998 = vmatprep.subr.bf16.mxu0 %v3997_v23  ;;  %v1198_v23 = vld [vmem:[%s8090_s2 + $0x78] sm:$0xff] }
 0x16d   : > { %4000 = vmatpush1.bf16.msra.mxu0 %v3999_v36  ;;  %v4093_v36 = vpack.c.bf16 %v1198_v23, %v1194_v21  ;;  %v4127_v21 = vpack.c.bf16 %v1261_v17, %v1257_v16  ;;  %v4129_v23 = vpack.c.bf16 %v1270_v19, %v1266_v18  ;;  %v3270_v16 = vld [vmem:[%s8089_s1 + $0x1088] sm:$0xff]  ;;  %v3269_v18 = vld [vmem:[%s8089_s1 + $0x1080] sm:$0xff]  ;;  %v3271_v19 = vld [vmem:[%s8089_s1 + $0x1090] sm:$0xff] }
 0x16e   : > { %4002 = vmatprep.subr.bf16.mxu0 %v4001_v28  ;;  %v1193_v28 = vld [vmem:[%s8090_s2 + $0x50] sm:$0xff] }
 0x16f   : > { %v4095_v35 = vpack.c.bf16 %v1197_v29, %v1193_v28 }
 0x171   : > { %4004 = vmatpush1.bf16.msra.mxu0 %v4003_v33 }
 0x172   : > { %4006 = vmatprep.subr.bf16.mxu0 %v4005_v34 }
 0x175   : > { %4008 = vmatpush1.bf16.msra.mxu0 %v4007_v47  ;;  %v1205_v47 = vld [vmem:[%s8090_s2 + $0xb0] sm:$0xff] }
 0x176   : > { %4010 = vmatprep.subr.bf16.mxu0 %v4009_v14  ;;  %v1210_v14 = vld [vmem:[%s8090_s2 + $0xd8] sm:$0xff]  ;;  %v4099_v41 = vpack.c.bf16 %v1205_v47, %v1201_v44  ;;  %v4135_v44 = vpack.c.bf16 %v1277_v32, %v1273_v31 }
 0x177   : > { %v4101_v42 = vpack.c.bf16 %v1214_v24, %v1210_v14  ;;  %v1281_v14 = vld [vmem:[%s8090_s2 + $0x310] sm:$0xff] }
 0x178   : > { %v1285_v24 = vld [vmem:[%s8090_s2 + $0x330] sm:$0xff] }
 0x179   : > { %4012 = vmatpush1.bf16.msra.mxu0 %v4011_v45  ;;  %v1213_v45 = vld [vmem:[%s8090_s2 + $0xf0] sm:$0xff] }
 0x17a   : > { %4014 = vmatprep.subr.bf16.mxu0 %v4013_v48  ;;  %v1218_v48 = vld [vmem:[%s8090_s2 + $0x118] sm:$0xff]  ;;  %v4103_v50 = vpack.c.bf16 %v1213_v45, %v1209_v43  ;;  %v4139_v43 = vpack.c.bf16 %v1285_v24, %v1281_v14 }
 0x17b   : > { %v4105_v51 = vpack.c.bf16 %v1222_v49, %v1218_v48  ;;  %v1289_v48 = vld [vmem:[%s8090_s2 + $0x350] sm:$0xff] }
 0x17c   : > { %v1293_v49 = vld [vmem:[%s8090_s2 + $0x370] sm:$0xff] }
 0x17d   : > { %4016 = vmatpush1.bf16.msra.mxu0 %v4015_v53  ;;  %v1221_v53 = vld [vmem:[%s8090_s2 + $0x130] sm:$0xff] }
 0x17e   : > { %4018 = vmatprep.subr.bf16.mxu0 %v4017_v54  ;;  %v1226_v54 = vld [vmem:[%s8090_s2 + $0x158] sm:$0xff]  ;;  %v4107_v56 = vpack.c.bf16 %v1221_v53, %v1217_v52  ;;  %v4143_v52 = vpack.c.bf16 %v1293_v49, %v1289_v48 }
 0x17f   : > { %v4109_v60 = vpack.c.bf16 %v1230_v55, %v1226_v54  ;;  %v1297_v54 = vld [vmem:[%s8090_s2 + $0x390] sm:$0xff] }
 0x180   : > { %v1301_v55 = vld [vmem:[%s8090_s2 + $0x3b0] sm:$0xff] }
 0x181   : > { %4020 = vmatpush1.bf16.msra.mxu0 %v4019_v58  ;;  %v1229_v58 = vld [vmem:[%s8090_s2 + $0x170] sm:$0xff] }
 0x182   : > { %4022 = vmatprep.subr.bf16.mxu0 %v4021_v59  ;;  %v1234_v59 = vld [vmem:[%s8090_s2 + $0x198] sm:$0xff]  ;;  %v4111_v61 = vpack.c.bf16 %v1229_v58, %v1225_v57  ;;  %v4147_v57 = vpack.c.bf16 %v1301_v55, %v1297_v54 }
 0x183   : > { %v4113_v0 = vpack.c.bf16 %v1238_v62, %v1234_v59  ;;  %v1305_v59 = vld [vmem:[%s8090_s2 + $0x3d0] sm:$0xff] }
 0x184   : > { %v1309_v62 = vld [vmem:[%s8090_s2 + $0x3f0] sm:$0xff] }
 0x185   : > { %4024 = vmatpush1.bf16.msra.mxu0 %v4023_v1  ;;  %v1237_v1 = vld [vmem:[%s8090_s2 + $0x1b0] sm:$0xff] }
 0x186   : > { %v4115_v4 = vpack.c.bf16 %v1237_v1, %v1233_v63  ;;  %v4151_v63 = vpack.c.bf16 %v1309_v62, %v1305_v59 }
 0x188   : > { %1163 = vmatmul.mubr.f32.vlgmr.msra.gmra.mrb[0].mxu0 %v1001_v7  ;;  %v1245_v7 = vld [vmem:[%s8090_s2 + $0x1f0] sm:$0xff] }
 0x189   : > { %1168 = vmatprep.mubr.f32.mxu0 %v1012_v9  ;;  %v1254_v9 = vld [vmem:[%s8090_s2 + $0x238] sm:$0xff] }
 0x18a   : > { %v4121_v11 = vpack.c.bf16 %v1254_v9, %v1250_v8  ;;  %v3257_v8 = vld [vmem:[%s8089_s1 + $0x1020] sm:$0xff]  ;;  %v3259_v9 = vld [vmem:[%s8089_s1 + $0x1030] sm:$0xff] }
 0x18b   : > { %v4159_v12 = vpack.c.bf16 %v3259_v9, %v3257_v8 }
 0x18c   : > { %1169 = vmatmul.mubr.f32.gmra.mrb[2].mxu0 %v1010_v10  ;;  %v4119_v10 = vpack.c.bf16 %v1245_v7, %v1241_v6  ;;  %v4155_v6 = vpack.c.bf16 %v3255_v3, %v3253_v2 }
 0x25b   : > { %v6222_v20 = vpop.f32.mrb[0].mxu0 }
 0x25c   : > { %v1166_v25 = vpop.f32.mrb[1].mxu0  ;;  %v1179_v22 = vmax.f32 %v6222_v20, 0.0  ;;  %v3266_v20 = vld [vmem:[%s8089_s1 + $0x1068] sm:$0xff] }
 0x25d   : > { %v1180_v46 = vmax.f32 %v1166_v25, 0.0  ;;  %v1265_v25 = vld [vmem:[%s8090_s2 + $0x290] sm:$0xff] }
 0x25f   : > { %v6237_v30 = vpop.f32.mrb[2].mxu0  ;;  %1375 = vmatprep.mubr.f32.mxu1 %v1180_v46 }
 0x260   : > { %v6245_v33 = vpop.f32.mrb[3].mxu0  ;;  %1376 = vmatmul.mubr.f32.vlgmr.msra.gmra.mrb[0].mxu1 %v1179_v22  ;;  %v1181_v37 = vmax.f32 %v6237_v30, 0.0  ;;  %v3272_v30 = vld [vmem:[%s8089_s1 + $0x1098] sm:$0xff] }
 0x261   : > { %v1182_v34 = vmax.f32 %v6245_v33, 0.0  ;;  %4092 = vmatpush1.bf16.msra.mxu1 %v4091_v27  ;;  %v1274_v27 = vld [vmem:[%s8090_s2 + $0x2d8] sm:$0xff]  ;;  %v4163_v33 = vpack.c.bf16 %v3263_v39, %v3261_v38  ;;  %v4169_v17 = vpack.c.bf16 %v3272_v30, %v3270_v16  ;;  %v3309_v16 = vld [vmem:[%s8089_s1 + $0x11c0] sm:$0xff]  ;;  %v3311_v30 = vld [vmem:[%s8089_s1 + $0x11d0] sm:$0xff] }
 0x262   : > { %4094 = vmatprep.subr.bf16.mxu1 %v4093_v36  ;;  %v1278_v36 = vld [vmem:[%s8090_s2 + $0x2f8] sm:$0xff] }
 0x263   : > { %1381 = vmatprep.mubr.f32.mxu1 %v1182_v34  ;;  %v4133_v29 = vpack.c.bf16 %v1278_v36, %v1274_v27  ;;  %v3273_v27 = vld [vmem:[%s8089_s1 + $0x10a0] sm:$0xff]  ;;  %v3275_v36 = vld [vmem:[%s8089_s1 + $0x10b0] sm:$0xff] }
 0x264   : > { %1382 = vmatmul.mubr.f32.gmra.mrb[2].mxu1 %v1181_v37  ;;  %v4175_v31 = vpack.c.bf16 %v3275_v36, %v3273_v27 }
 0x265   : > { %4096 = vmatpush1.bf16.msra.mxu1 %v4095_v35  ;;  %1452 = vmatprep.mubr.f32.mxu1 %v1180_v46  ;;  %v1269_v46 = vld [vmem:[%s8090_s2 + $0x2b0] sm:$0xff]  ;;  %v1282_v35 = vld [vmem:[%s8090_s2 + $0x318] sm:$0xff] }
 0x266   : > { %4098 = vmatprep.subr.bf16.mxu1 %v4097_v40  ;;  %v4131_v28 = vpack.c.bf16 %v1269_v46, %v1265_v25  ;;  %v1286_v40 = vld [vmem:[%s8090_s2 + $0x338] sm:$0xff]  ;;  %v4171_v25 = vpack.c.bf16 %v3271_v19, %v3269_v18  ;;  %v4211_v18 = vpack.c.bf16 %v3311_v30, %v3309_v16  ;;  %v3341_v16 = vld [vmem:[%s8089_s1 + $0x12c0] sm:$0xff]  ;;  %v3343_v30 = vld [vmem:[%s8089_s1 + $0x12d0] sm:$0xff] }
 0x267   : > { %v4137_v47 = vpack.c.bf16 %v1286_v40, %v1282_v35  ;;  %v3277_v35 = vld [vmem:[%s8089_s1 + $0x10c0] sm:$0xff]  ;;  %v3279_v40 = vld [vmem:[%s8089_s1 + $0x10d0] sm:$0xff] }
 0x268   : > { %v4179_v14 = vpack.c.bf16 %v3279_v40, %v3277_v35  ;;  %v3317_v35 = vld [vmem:[%s8089_s1 + $0x1200] sm:$0xff]  ;;  %v3319_v40 = vld [vmem:[%s8089_s1 + $0x1210] sm:$0xff] }
 0x269   : > { %4100 = vmatpush1.bf16.msra.mxu1 %v4099_v41  ;;  %v1290_v41 = vld [vmem:[%s8090_s2 + $0x358] sm:$0xff] }
 0x26a   : > { %4102 = vmatprep.subr.bf16.mxu1 %v4101_v42  ;;  %v1294_v42 = vld [vmem:[%s8090_s2 + $0x378] sm:$0xff] }
 0x26b   : > { %v4141_v45 = vpack.c.bf16 %v1294_v42, %v1290_v41  ;;  %v3281_v41 = vld [vmem:[%s8089_s1 + $0x10e0] sm:$0xff]  ;;  %v3283_v42 = vld [vmem:[%s8089_s1 + $0x10f0] sm:$0xff] }
 0x26c   : > { %v4183_v48 = vpack.c.bf16 %v3283_v42, %v3281_v41 }
 0x26d   : > { %4104 = vmatpush1.bf16.msra.mxu1 %v4103_v50  ;;  %v1298_v50 = vld [vmem:[%s8090_s2 + $0x398] sm:$0xff] }
 0x26e   : > { %4106 = vmatprep.subr.bf16.mxu1 %v4105_v51  ;;  %v1302_v51 = vld [vmem:[%s8090_s2 + $0x3b8] sm:$0xff] }
 0x26f   : > { %v4145_v53 = vpack.c.bf16 %v1302_v51, %v1298_v50  ;;  %v3285_v50 = vld [vmem:[%s8089_s1 + $0x1100] sm:$0xff]  ;;  %v3287_v51 = vld [vmem:[%s8089_s1 + $0x1110] sm:$0xff] }
 0x270   : > { %v4187_v54 = vpack.c.bf16 %v3287_v51, %v3285_v50 }
 0x271   : > { %4108 = vmatpush1.bf16.msra.mxu1 %v4107_v56  ;;  %v1306_v56 = vld [vmem:[%s8090_s2 + $0x3d8] sm:$0xff] }
 0x272   : > { %4110 = vmatprep.subr.bf16.mxu1 %v4109_v60  ;;  %v1310_v60 = vld [vmem:[%s8090_s2 + $0x3f8] sm:$0xff] }
 0x273   : > { %v4149_v58 = vpack.c.bf16 %v1310_v60, %v1306_v56  ;;  %v3289_v56 = vld [vmem:[%s8089_s1 + $0x1120] sm:$0xff]  ;;  %v3291_v60 = vld [vmem:[%s8089_s1 + $0x1130] sm:$0xff] }
 0x274   : > { %v4191_v59 = vpack.c.bf16 %v3291_v60, %v3289_v56  ;;  %v3326_v56 = vld [vmem:[%s8089_s1 + $0x1248] sm:$0xff]  ;;  %v3328_v60 = vld [vmem:[%s8089_s1 + $0x1258] sm:$0xff] }
 0x275   : > { %4112 = vmatpush1.bf16.msra.mxu1 %v4111_v61  ;;  %v3254_v61 = vld [vmem:[%s8089_s1 + $0x1008] sm:$0xff] }
 0x276   : > { %4114 = vmatprep.subr.bf16.mxu1 %v4113_v0  ;;  %v3256_v0 = vld [vmem:[%s8089_s1 + $0x1018] sm:$0xff] }
 0x277   : > { %v4153_v1 = vpack.c.bf16 %v3256_v0, %v3254_v61  ;;  %v3293_v61 = vld [vmem:[%s8089_s1 + $0x1140] sm:$0xff]  ;;  %v3295_v0 = vld [vmem:[%s8089_s1 + $0x1150] sm:$0xff] }
 0x278   : > { %v4195_v2 = vpack.c.bf16 %v3295_v0, %v3293_v61  ;;  %v3325_v61 = vld [vmem:[%s8089_s1 + $0x1240] sm:$0xff]  ;;  %v3327_v0 = vld [vmem:[%s8089_s1 + $0x1250] sm:$0xff] }
 0x279   : > { %4116 = vmatpush1.bf16.msra.mxu1 %v4115_v4  ;;  %v3258_v4 = vld [vmem:[%s8089_s1 + $0x1028] sm:$0xff] }
 0x27a   : > { %4118 = vmatprep.subr.bf16.mxu1 %v4117_v5  ;;  %v3260_v5 = vld [vmem:[%s8089_s1 + $0x1038] sm:$0xff] }
 0x27b   : > { %v4157_v7 = vpack.c.bf16 %v3260_v5, %v3258_v4  ;;  %v3297_v4 = vld [vmem:[%s8089_s1 + $0x1160] sm:$0xff]  ;;  %v3299_v5 = vld [vmem:[%s8089_s1 + $0x1170] sm:$0xff] }
 0x27c   : > { %v4199_v8 = vpack.c.bf16 %v3299_v5, %v3297_v4  ;;  %v3329_v4 = vld [vmem:[%s8089_s1 + $0x1260] sm:$0xff]  ;;  %v3331_v5 = vld [vmem:[%s8089_s1 + $0x1270] sm:$0xff] }
 0x27d   : > { %4120 = vmatpush1.bf16.msra.mxu1 %v4119_v10  ;;  %v3262_v10 = vld [vmem:[%s8089_s1 + $0x1048] sm:$0xff] }
 0x27e   : > { %4122 = vmatprep.subr.bf16.mxu1 %v4121_v11  ;;  %v3264_v11 = vld [vmem:[%s8089_s1 + $0x1058] sm:$0xff] }
 0x27f   : > { %v4161_v26 = vpack.c.bf16 %v3264_v11, %v3262_v10  ;;  %v3301_v10 = vld [vmem:[%s8089_s1 + $0x1180] sm:$0xff]  ;;  %v3303_v11 = vld [vmem:[%s8089_s1 + $0x1190] sm:$0xff] }
 0x280   : > { %v4203_v38 = vpack.c.bf16 %v3303_v11, %v3301_v10  ;;  %v3333_v10 = vld [vmem:[%s8089_s1 + $0x1280] sm:$0xff]  ;;  %v3335_v11 = vld [vmem:[%s8089_s1 + $0x1290] sm:$0xff] }
 0x281   : > { %4124 = vmatpush1.bf16.msra.mxu1 %v4123_v13  ;;  %v3265_v13 = vld [vmem:[%s8089_s1 + $0x1060] sm:$0xff] }
 0x282   : > { %4126 = vmatprep.subr.bf16.mxu1 %v4125_v15  ;;  %v3267_v15 = vld [vmem:[%s8089_s1 + $0x1070] sm:$0xff] }
 0x285   : > { %4128 = vmatpush1.bf16.msra.mxu1 %v4127_v21  ;;  %v3274_v21 = vld [vmem:[%s8089_s1 + $0x10a8] sm:$0xff] }
 0x286   : > { %4130 = vmatprep.subr.bf16.mxu1 %v4129_v23  ;;  %v3276_v23 = vld [vmem:[%s8089_s1 + $0x10b8] sm:$0xff] }
 0x287   : > { %v4173_v46 = vpack.c.bf16 %v3276_v23, %v3274_v21  ;;  %v3313_v21 = vld [vmem:[%s8089_s1 + $0x11e0] sm:$0xff]  ;;  %v3315_v23 = vld [vmem:[%s8089_s1 + $0x11f0] sm:$0xff] }
 0x288   : > { %v4215_v27 = vpack.c.bf16 %v3315_v23, %v3313_v21  ;;  %v3345_v21 = vld [vmem:[%s8089_s1 + $0x12e0] sm:$0xff]  ;;  %v3347_v23 = vld [vmem:[%s8089_s1 + $0x12f0] sm:$0xff] }
 0x289   : > { %4132 = vmatpush1.bf16.msra.mxu1 %v4131_v28  ;;  %v3278_v28 = vld [vmem:[%s8089_s1 + $0x10c8] sm:$0xff] }
 0x28a   : > { %4134 = vmatprep.subr.bf16.mxu1 %v4133_v29  ;;  %v3280_v29 = vld [vmem:[%s8089_s1 + $0x10d8] sm:$0xff] }
 0x28b   : > { %v4177_v32 = vpack.c.bf16 %v3280_v29, %v3278_v28  ;;  %v4717_v29 = vld [vmem:[%s4853_s19] sm:$0xff] }
 0x28d   : > { %4136 = vmatpush1.bf16.msra.mxu1 %v4135_v44  ;;  %v3282_v44 = vld [vmem:[%s8089_s1 + $0x10e8] sm:$0xff] }
 0x28e   : > { %4138 = vmatprep.subr.bf16.mxu1 %v4137_v47  ;;  %v3284_v47 = vld [vmem:[%s8089_s1 + $0x10f8] sm:$0xff] }
 0x28f   : > { %v4181_v24 = vpack.c.bf16 %v3284_v47, %v3282_v44  ;;  %v4718_v44 = vld [vmem:[%s4853_s19 + $0x8] sm:$0xff] }
 0x291   : > { %4140 = vmatpush1.bf16.msra.mxu1 %v4139_v43  ;;  %v3286_v43 = vld [vmem:[%s8089_s1 + $0x1108] sm:$0xff] }
 0x292   : > { %4142 = vmatprep.subr.bf16.mxu1 %v4141_v45  ;;  %v3288_v45 = vld [vmem:[%s8089_s1 + $0x1118] sm:$0xff] }
 0x293   : > { %v4185_v49 = vpack.c.bf16 %v3288_v45, %v3286_v43  ;;  %v4219_v45 = vpack.c.bf16 %v3319_v40, %v3317_v35  ;;  %v3356_v35 = vld [vmem:[%s8089_s1 + $0x1338] sm:$0xff] }
 0x295   : > { %4144 = vmatpush1.bf16.msra.mxu1 %v4143_v52  ;;  %v3290_v52 = vld [vmem:[%s8089_s1 + $0x1128] sm:$0xff] }
 0x296   : > { %4146 = vmatprep.subr.bf16.mxu1 %v4145_v53  ;;  %v3292_v53 = vld [vmem:[%s8089_s1 + $0x1138] sm:$0xff] }
 0x297   : > { %v4189_v55 = vpack.c.bf16 %v3292_v53, %v3290_v52  ;;  %v3321_v52 = vld [vmem:[%s8089_s1 + $0x1220] sm:$0xff]  ;;  %v3323_v53 = vld [vmem:[%s8089_s1 + $0x1230] sm:$0xff] }
 0x299   : > { %4148 = vmatpush1.bf16.msra.mxu1 %v4147_v57  ;;  %v3294_v57 = vld [vmem:[%s8089_s1 + $0x1148] sm:$0xff] }
 0x29a   : > { %4150 = vmatprep.subr.bf16.mxu1 %v4149_v58  ;;  %v3296_v58 = vld [vmem:[%s8089_s1 + $0x1158] sm:$0xff] }
 0x29b   : > { %v4193_v62 = vpack.c.bf16 %v3296_v58, %v3294_v57 }
 0x29d   : > { %4152 = vmatpush1.bf16.msra.mxu1 %v4151_v63  ;;  %v3298_v63 = vld [vmem:[%s8089_s1 + $0x1168] sm:$0xff] }
 0x29e   : > { %4154 = vmatprep.subr.bf16.mxu1 %v4153_v1  ;;  %v3300_v1 = vld [vmem:[%s8089_s1 + $0x1178] sm:$0xff] }
 0x29f   : > { %v4197_v3 = vpack.c.bf16 %v3300_v1, %v3298_v63  ;;  %v3330_v63 = vld [vmem:[%s8089_s1 + $0x1268] sm:$0xff]  ;;  %v3332_v1 = vld [vmem:[%s8089_s1 + $0x1278] sm:$0xff] }
 0x2a0   : > { %1453 = vmatmul.mubr.f32.vlgmr.msra.gmra.mrb[4].mxu1 %v1179_v22  ;;  %v3268_v22 = vld [vmem:[%s8089_s1 + $0x1078] sm:$0xff] }
 0x2a1   : > { %1458 = vmatprep.mubr.f32.mxu1 %v1182_v34  ;;  %4156 = vmatpush1.bf16.msra.mxu1 %v4155_v6  ;;  %v4165_v34 = vpack.c.bf16 %v3268_v22, %v3266_v20  ;;  %v3302_v6 = vld [vmem:[%s8089_s1 + $0x1188] sm:$0xff]  ;;  %v3305_v20 = vld [vmem:[%s8089_s1 + $0x11a0] sm:$0xff]  ;;  %v3307_v22 = vld [vmem:[%s8089_s1 + $0x11b0] sm:$0xff] }
 0x2a2   : > { %4158 = vmatprep.subr.bf16.mxu1 %v4157_v7  ;;  %v3304_v7 = vld [vmem:[%s8089_s1 + $0x1198] sm:$0xff] }
 0x2a3   : > { %v4201_v9 = vpack.c.bf16 %v3304_v7, %v3302_v6  ;;  %v3334_v6 = vld [vmem:[%s8089_s1 + $0x1288] sm:$0xff]  ;;  %v3336_v7 = vld [vmem:[%s8089_s1 + $0x1298] sm:$0xff] }
 0x2a4   : > { %1459 = vmatmul.mubr.f32.gmra.mrb[6].mxu1 %v1181_v37  ;;  %v4167_v37 = vpack.c.bf16 %v3267_v15, %v3265_v13  ;;  %v4207_v13 = vpack.c.bf16 %v3307_v22, %v3305_v20  ;;  %v3337_v20 = vld [vmem:[%s8089_s1 + $0x12a0] sm:$0xff]  ;;  %v3339_v22 = vld [vmem:[%s8089_s1 + $0x12b0] sm:$0xff] }
 0x2a5   : > { %4160 = vmatpush1.bf16.msra.mxu1 %v4159_v12  ;;  %v3306_v12 = vld [vmem:[%s8089_s1 + $0x11a8] sm:$0xff] }
 0x2a6   : > { %4162 = vmatprep.subr.bf16.mxu1 %v4161_v26  ;;  %v3308_v26 = vld [vmem:[%s8089_s1 + $0x11b8] sm:$0xff] }
 0x2a7   : > { %v4205_v39 = vpack.c.bf16 %v3308_v26, %v3306_v12  ;;  %v3338_v12 = vld [vmem:[%s8089_s1 + $0x12a8] sm:$0xff]  ;;  %v3340_v26 = vld [vmem:[%s8089_s1 + $0x12b8] sm:$0xff] }
 0x2a9   : > { %4164 = vmatpush1.bf16.msra.mxu1 %v4163_v33  ;;  %v3310_v33 = vld [vmem:[%s8089_s1 + $0x11c8] sm:$0xff] }
 0x2aa   : > { %4166 = vmatprep.subr.bf16.mxu1 %v4165_v34  ;;  %v3312_v34 = vld [vmem:[%s8089_s1 + $0x11d8] sm:$0xff] }
 0x2ab   : > { %v4209_v15 = vpack.c.bf16 %v3312_v34, %v3310_v33  ;;  %v3342_v33 = vld [vmem:[%s8089_s1 + $0x12c8] sm:$0xff]  ;;  %v3344_v34 = vld [vmem:[%s8089_s1 + $0x12d8] sm:$0xff] }
 0x2ad   : > { %4168 = vmatpush1.bf16.msra.mxu1 %v4167_v37  ;;  %v3314_v37 = vld [vmem:[%s8089_s1 + $0x11e8] sm:$0xff] }
 0x2ae   : > { %4170 = vmatprep.subr.bf16.mxu1 %v4169_v17  ;;  %v3316_v17 = vld [vmem:[%s8089_s1 + $0x11f8] sm:$0xff] }
 0x2af   : > { %v4213_v19 = vpack.c.bf16 %v3316_v17, %v3314_v37  ;;  %v3346_v37 = vld [vmem:[%s8089_s1 + $0x12e8] sm:$0xff]  ;;  %v3348_v17 = vld [vmem:[%s8089_s1 + $0x12f8] sm:$0xff] }
 0x2b1   : > { %4172 = vmatpush1.bf16.msra.mxu1 %v4171_v25  ;;  %v3318_v25 = vld [vmem:[%s8089_s1 + $0x1208] sm:$0xff] }
 0x2b2   : > { %4174 = vmatprep.subr.bf16.mxu1 %v4173_v46  ;;  %v3320_v46 = vld [vmem:[%s8089_s1 + $0x1218] sm:$0xff] }
 0x2b3   : > { %v4217_v36 = vpack.c.bf16 %v3320_v46, %v3318_v25  ;;  %v3350_v25 = vld [vmem:[%s8089_s1 + $0x1308] sm:$0xff]  ;;  %v3352_v46 = vld [vmem:[%s8089_s1 + $0x1318] sm:$0xff] }
 0x2b5   : > { %4176 = vmatpush1.bf16.msra.mxu1 %v4175_v31 }
 0x2b6   : > { %4178 = vmatprep.subr.bf16.mxu1 %v4177_v32 }
 0x2b9   : > { %4180 = vmatpush1.bf16.msra.mxu1 %v4179_v14  ;;  %v3322_v14 = vld [vmem:[%s8089_s1 + $0x1228] sm:$0xff] }
 0x2ba   : > { %4182 = vmatprep.subr.bf16.mxu1 %v4181_v24  ;;  %v3324_v24 = vld [vmem:[%s8089_s1 + $0x1238] sm:$0xff] }
 0x2bb   : > { %v4221_v51 = vpack.c.bf16 %v3324_v24, %v3322_v14  ;;  %v3353_v14 = vld [vmem:[%s8089_s1 + $0x1320] sm:$0xff]  ;;  %v3355_v24 = vld [vmem:[%s8089_s1 + $0x1330] sm:$0xff] }
 0x2bd   : > { %4184 = vmatpush1.bf16.msra.mxu1 %v4183_v48  ;;  %v4719_v48 = vld [vmem:[%s4853_s19 + $0x20] sm:$0xff] }
 0x2be   : > { %4186 = vmatprep.subr.bf16.mxu1 %v4185_v49 }
 0x2c1   : > { %4188 = vmatpush1.bf16.msra.mxu1 %v4187_v54  ;;  %v4720_v54 = vld [vmem:[%s4853_s19 + $0x28] sm:$0xff] }
 0x2c2   : > { %4190 = vmatprep.subr.bf16.mxu1 %v4189_v55 }
 0x2c5   : > { %4192 = vmatpush1.bf16.msra.mxu1 %v4191_v59  ;;  %v4223_v59 = vpack.c.bf16 %v3323_v53, %v3321_v52  ;;  %v3359_v52 = vld [vmem:[%s8089_s1 + $0x1350] sm:$0xff]  ;;  %v3362_v53 = vld [vmem:[%s8089_s1 + $0x1368] sm:$0xff] }
 0x2c6   : > { %4194 = vmatprep.subr.bf16.mxu1 %v4193_v62  ;;  %v4225_v62 = vpack.c.bf16 %v3328_v60, %v3326_v56 }
 0x2c9   : > { %4196 = vmatpush1.bf16.msra.mxu1 %v4195_v2  ;;  %v4227_v2 = vpack.c.bf16 %v3327_v0, %v3325_v61  ;;  %v3368_v61 = vld [vmem:[%s8089_s1 + $0x1398] sm:$0xff] }
 0x2ca   : > { %4198 = vmatprep.subr.bf16.mxu1 %v4197_v3  ;;  %v4229_v3 = vpack.c.bf16 %v3332_v1, %v3330_v63  ;;  %v3365_v1 = vld [vmem:[%s8089_s1 + $0x1380] sm:$0xff] }
 0x2cd   : > { %4200 = vmatpush1.bf16.msra.mxu1 %v4199_v8  ;;  %v4231_v8 = vpack.c.bf16 %v3331_v5, %v3329_v4  ;;  %v3372_v4 = vld [vmem:[%s8089_s1 + $0x13b8] sm:$0xff] }
 0x2ce   : > { %4202 = vmatprep.subr.bf16.mxu1 %v4201_v9  ;;  %v4233_v9 = vpack.c.bf16 %v3336_v7, %v3334_v6  ;;  %v3369_v7 = vld [vmem:[%s8089_s1 + $0x13a0] sm:$0xff] }
 0x2d1   : > { %4204 = vmatpush1.bf16.msra.mxu1 %v4203_v38  ;;  %v4235_v38 = vpack.c.bf16 %v3335_v11, %v3333_v10  ;;  %v3376_v10 = vld [vmem:[%s8089_s1 + $0x13d8] sm:$0xff] }
 0x2d2   : > { %4206 = vmatprep.subr.bf16.mxu1 %v4205_v39  ;;  %v4237_v39 = vpack.c.bf16 %v3340_v26, %v3338_v12  ;;  %v3373_v26 = vld [vmem:[%s8089_s1 + $0x13c0] sm:$0xff] }
 0x2d5   : > { %4208 = vmatpush1.bf16.msra.mxu1 %v4207_v13  ;;  %v4239_v13 = vpack.c.bf16 %v3339_v22, %v3337_v20  ;;  %v3380_v20 = vld [vmem:[%s8089_s1 + $0x13f8] sm:$0xff] }
 0x2d6   : > { %4210 = vmatprep.subr.bf16.mxu1 %v4209_v15  ;;  %v4241_v15 = vpack.c.bf16 %v3344_v34, %v3342_v33  ;;  %v3377_v34 = vld [vmem:[%s8089_s1 + $0x13e0] sm:$0xff] }
 0x2d9   : > { %4212 = vmatpush1.bf16.msra.mxu1 %v4211_v18  ;;  %v4243_v18 = vpack.c.bf16 %v3343_v30, %v3341_v16  ;;  %v3128_v16 = vld [vmem:[%s8089_s1 + $0xc18] sm:$0xff] }
 0x2da   : > { %4214 = vmatprep.subr.bf16.mxu1 %v4213_v19  ;;  %v4245_v19 = vpack.c.bf16 %v3348_v17, %v3346_v37  ;;  %v4721_v17 = vld [vmem:[%s4853_s19 + $0x10] sm:$0xff] }
 0x2dd   : > { %4216 = vmatpush1.bf16.msra.mxu1 %v4215_v27  ;;  %v4247_v27 = vpack.c.bf16 %v3347_v23, %v3345_v21  ;;  %v3125_v23 = vld [vmem:[%s8089_s1 + $0xc00] sm:$0xff] }
 0x2de   : > { %4218 = vmatprep.subr.bf16.mxu1 %v4217_v36  ;;  %v4249_v36 = vpack.c.bf16 %v3352_v46, %v3350_v25  ;;  %v3127_v25 = vld [vmem:[%s8089_s1 + $0xc10] sm:$0xff]  ;;  %v4722_v46 = vld [vmem:[%s4853_s19 + $0x18] sm:$0xff] }
 0x333   : > { %v1377_v28 = vpop.f32.mrb[0].mxu1 }
 0x334   : > { %v6622_v31 = vadd.f32 %v4717_v29, %v1377_v28  ;;  %v1379_v32 = vpop.f32.mrb[1].mxu1  ;;  %v3349_v28 = vld [vmem:[%s8089_s1 + $0x1300] sm:$0xff]  ;;  %v3351_v29 = vld [vmem:[%s8089_s1 + $0x1310] sm:$0xff] }
 0x335   : > { %v6631_v47 = vadd.f32 %v4718_v44, %v1379_v32  ;;  %v3354_v32 = vld [vmem:[%s8089_s1 + $0x1328] sm:$0xff]  ;;  %v4251_v40 = vpack.c.bf16 %v3351_v29, %v3349_v28  ;;  %v3132_v28 = vld [vmem:[%s8089_s1 + $0xc38] sm:$0xff] }
 0x336   : > { %v6640_v41 = vmax.f32 %v6622_v31, 0.0  ;;  %v4253_v44 = vpack.c.bf16 %v3356_v35, %v3354_v32 }
 0x337   : > { %v6643_v42 = vmax.f32 %v6631_v47, 0.0  ;;  %v1383_v43 = vpop.f32.mrb[2].mxu1 }
 0x338   : > { %1505 = vst [vmem:[#allocation3 + $0x20] sm:$0xff] %v6640_v41  ;;  %v6647_v49 = vadd.f32 %v4719_v48, %v1383_v43  ;;  %v1385_v50 = vpop.f32.mrb[3].mxu1  ;;  %v3358_v43 = vld [vmem:[%s8089_s1 + $0x1348] sm:$0xff]  ;;  %v4255_v48 = vpack.c.bf16 %v3355_v24, %v3353_v14  ;;  %v4723_v14 = vld [vmem:[%s4853_s19 + $0x30] sm:$0xff] }
 0x339   : > { %1506 = vst [vmem:[#allocation3 + $0x28] sm:$0xff] %v6643_v42  ;;  %v6657_v55 = vadd.f32 %v4720_v54, %v1385_v50  ;;  %1847 = vmatprep.mubr.f32.mxu1 %v6643_v42  ;;  %v3364_v54 = vld [vmem:[%s8089_s1 + $0x1378] sm:$0xff] }
 0x33a   : > { %v1501_v57 = vmax.f32 %v6647_v49, 0.0  ;;  %1848 = vmatmul.mubr.f32.vlgmr.msra.gmra.mrb[8].mxu1 %v6640_v41  ;;  %v4261_v60 = vpack.c.bf16 %v3364_v54, %v3362_v53  ;;  %v3134_v53 = vld [vmem:[%s8089_s1 + $0xc48] sm:$0xff]  ;;  %v3136_v54 = vld [vmem:[%s8089_s1 + $0xc58] sm:$0xff] }
 0x33b   : > { %v6669_v58 = vmax.f32 %v6657_v55, 0.0  ;;  %4220 = vmatpush1.bf16.msra.mxu1 %v4219_v45  ;;  %v3360_v45 = vld [vmem:[%s8089_s1 + $0x1358] sm:$0xff] }
 0x33c   : > { %1509 = vst [vmem:[#allocation3 + $0x40] sm:$0xff] %v1501_v57  ;;  %4222 = vmatprep.subr.bf16.mxu1 %v4221_v51  ;;  %v4257_v50 = vpack.c.bf16 %v3360_v45, %v3358_v43  ;;  %v3357_v51 = vld [vmem:[%s8089_s1 + $0x1340] sm:$0xff] }
 0x33d   : > { %1510 = vst [vmem:[#allocation3 + $0x48] sm:$0xff] %v6669_v58  ;;  %1853 = vmatprep.mubr.f32.mxu1 %v6669_v58  ;;  %v4259_v56 = vpack.c.bf16 %v3359_v52, %v3357_v51  ;;  %v4724_v51 = vld [vmem:[%s4853_s19 + $0x38] sm:$0xff] }
 0x33e   : > { %1854 = vmatmul.mubr.f32.gmra.mrb[10].mxu1 %v1501_v57  ;;  %v3361_v57 = vld [vmem:[%s8089_s1 + $0x1360] sm:$0xff] }
 0x33f   : > { %4224 = vmatpush1.bf16.msra.mxu1 %v4223_v59  ;;  %v3363_v59 = vld [vmem:[%s8089_s1 + $0x1370] sm:$0xff] }
 0x340   : > { %4226 = vmatprep.subr.bf16.mxu1 %v4225_v62  ;;  %v3366_v62 = vld [vmem:[%s8089_s1 + $0x1388] sm:$0xff]  ;;  %v4263_v0 = vpack.c.bf16 %v3363_v59, %v3361_v57  ;;  %v1953_v57 = vrot.slane %v6643_v42, 7 }
 0x341   : > { %v4265_v63 = vpack.c.bf16 %v3368_v61, %v3366_v62  ;;  %v4289_v61 = vpack.c.bf16 %v3136_v54, %v3134_v53  ;;  %v3161_v53 = vld [vmem:[%s8089_s1 + $0xd20] sm:$0xff]  ;;  %v3163_v54 = vld [vmem:[%s8089_s1 + $0xd30] sm:$0xff] }
 0x343   : > { %4228 = vmatpush1.bf16.msra.mxu1 %v4227_v2  ;;  %v3367_v2 = vld [vmem:[%s8089_s1 + $0x1390] sm:$0xff] }
 0x344   : > { %4230 = vmatprep.subr.bf16.mxu1 %v4229_v3  ;;  %v3370_v3 = vld [vmem:[%s8089_s1 + $0x13a8] sm:$0xff]  ;;  %v4267_v5 = vpack.c.bf16 %v3367_v2, %v3365_v1  ;;  %v3140_v2 = vld [vmem:[%s8089_s1 + $0xc78] sm:$0xff] }
 0x345   : > { %v4269_v6 = vpack.c.bf16 %v3372_v4, %v3370_v3  ;;  %v3138_v1 = vld [vmem:[%s8089_s1 + $0xc68] sm:$0xff] }
 0x347   : > { %4232 = vmatpush1.bf16.msra.mxu1 %v4231_v8  ;;  %v3371_v8 = vld [vmem:[%s8089_s1 + $0x13b0] sm:$0xff] }
 0x348   : > { %4234 = vmatprep.subr.bf16.mxu1 %v4233_v9  ;;  %v3374_v9 = vld [vmem:[%s8089_s1 + $0x13c8] sm:$0xff]  ;;  %v4271_v11 = vpack.c.bf16 %v3371_v8, %v3369_v7  ;;  %v3139_v7 = vld [vmem:[%s8089_s1 + $0xc70] sm:$0xff] }
 0x349   : > { %v4273_v12 = vpack.c.bf16 %v3376_v10, %v3374_v9  ;;  %v3142_v8 = vld [vmem:[%s8089_s1 + $0xc88] sm:$0xff]  ;;  %v3144_v9 = vld [vmem:[%s8089_s1 + $0xc98] sm:$0xff] }
 0x34b   : > { %4236 = vmatpush1.bf16.msra.mxu1 %v4235_v38  ;;  %v3375_v38 = vld [vmem:[%s8089_s1 + $0x13d0] sm:$0xff] }
 0x34c   : > { %4238 = vmatprep.subr.bf16.mxu1 %v4237_v39  ;;  %v3378_v39 = vld [vmem:[%s8089_s1 + $0x13e8] sm:$0xff]  ;;  %v4275_v22 = vpack.c.bf16 %v3375_v38, %v3373_v26  ;;  %v3143_v26 = vld [vmem:[%s8089_s1 + $0xc90] sm:$0xff] }
 0x34d   : > { %v4277_v33 = vpack.c.bf16 %v3380_v20, %v3378_v39  ;;  %v3146_v38 = vld [vmem:[%s8089_s1 + $0xca8] sm:$0xff]  ;;  %v3148_v39 = vld [vmem:[%s8089_s1 + $0xcb8] sm:$0xff] }
 0x34f   : > { %4240 = vmatpush1.bf16.msra.mxu1 %v4239_v13  ;;  %v3379_v13 = vld [vmem:[%s8089_s1 + $0x13f0] sm:$0xff] }
 0x350   : > { %4242 = vmatprep.subr.bf16.mxu1 %v4241_v15  ;;  %v3126_v15 = vld [vmem:[%s8089_s1 + $0xc08] sm:$0xff]  ;;  %v4279_v37 = vpack.c.bf16 %v3379_v13, %v3377_v34  ;;  %v3147_v34 = vld [vmem:[%s8089_s1 + $0xcb0] sm:$0xff] }
 0x351   : > { %v4281_v21 = vpack.c.bf16 %v3128_v16, %v3126_v15  ;;  %v3150_v13 = vld [vmem:[%s8089_s1 + $0xcc8] sm:$0xff]  ;;  %v3152_v15 = vld [vmem:[%s8089_s1 + $0xcd8] sm:$0xff] }
 0x353   : > { %4244 = vmatpush1.bf16.msra.mxu1 %v4243_v18 }
 0x354   : > { %4246 = vmatprep.subr.bf16.mxu1 %v4245_v19 }
 0x357   : > { %4248 = vmatpush1.bf16.msra.mxu1 %v4247_v27 }
 0x358   : > { %4250 = vmatprep.subr.bf16.mxu1 %v4249_v36  ;;  %v3130_v36 = vld [vmem:[%s8089_s1 + $0xc28] sm:$0xff] }
 0x359   : > { %v4285_v45 = vpack.c.bf16 %v3132_v28, %v3130_v36  ;;  %v3155_v36 = vld [vmem:[%s8089_s1 + $0xcf0] sm:$0xff]  ;;  %v3158_v28 = vld [vmem:[%s8089_s1 + $0xd08] sm:$0xff] }
 0x35b   : > { %4252 = vmatpush1.bf16.msra.mxu1 %v4251_v40  ;;  %v4283_v40 = vpack.c.bf16 %v3127_v25, %v3125_v23 }
 0x35c   : > { %4254 = vmatprep.subr.bf16.mxu1 %v4253_v44  ;;  %v1514_v44 = vld [vmem:[#allocation3 + $0x8] sm:$0x80] }
 0x35f   : > { %4256 = vmatpush1.bf16.msra.mxu1 %v4255_v48  ;;  %v3129_v48 = vld [vmem:[%s8089_s1 + $0xc20] sm:$0xff] }
 0x360   : > { %4258 = vmatprep.subr.bf16.mxu1 %v4257_v50  ;;  %v3131_v50 = vld [vmem:[%s8089_s1 + $0xc30] sm:$0xff] }
 0x361   : > { %v4287_v62 = vpack.c.bf16 %v3131_v50, %v3129_v48  ;;  %v3164_v48 = vld [vmem:[%s8089_s1 + $0xd38] sm:$0xff] }
 0x363   : > { %4260 = vmatpush1.bf16.msra.mxu1 %v4259_v56 }
 0x364   : > { %4262 = vmatprep.subr.bf16.mxu1 %v4261_v60  ;;  %v1952_v60 = vrot.slane %v1514_v44, 7 }
 0x366   : > { %v1954_v3 = vsel %vm656_vm1, %v1952_v60, %v1953_v57  ;;  %v3168_v60 = vld [vmem:[%s8089_s1 + $0xd58] sm:$0xff] }
 0x367   : > { %4264 = vmatpush1.bf16.msra.mxu1 %v4263_v0  ;;  %v3133_v0 = vld [vmem:[%s8089_s1 + $0xc40] sm:$0xff] }
 0x368   : > { %4266 = vmatprep.subr.bf16.mxu1 %v4265_v63  ;;  %v3135_v63 = vld [vmem:[%s8089_s1 + $0xc50] sm:$0xff] }
 0x369   : > { %v4291_v4 = vpack.c.bf16 %v3135_v63, %v3133_v0  ;;  %v3167_v0 = vld [vmem:[%s8089_s1 + $0xd50] sm:$0xff]  ;;  %v3170_v63 = vld [vmem:[%s8089_s1 + $0xd68] sm:$0xff] }
 0x36b   : > { %4268 = vmatpush1.bf16.msra.mxu1 %v4267_v5  ;;  %v4293_v5 = vpack.c.bf16 %v3140_v2, %v3138_v1  ;;  %v3172_v1 = vld [vmem:[%s8089_s1 + $0xd78] sm:$0xff] }
 0x36c   : > { %4270 = vmatprep.subr.bf16.mxu1 %v4269_v6  ;;  %v3137_v6 = vld [vmem:[%s8089_s1 + $0xc60] sm:$0xff] }
 0x36d   : > { %v4295_v10 = vpack.c.bf16 %v3139_v7, %v3137_v6  ;;  %v3174_v6 = vld [vmem:[%s8089_s1 + $0xd88] sm:$0xff]  ;;  %v3176_v7 = vld [vmem:[%s8089_s1 + $0xd98] sm:$0xff] }
 0x36f   : > { %4272 = vmatpush1.bf16.msra.mxu1 %v4271_v11  ;;  %v4297_v11 = vpack.c.bf16 %v3144_v9, %v3142_v8  ;;  %v4329_v9 = vpack.c.bf16 %v3176_v7, %v3174_v6  ;;  %v3197_v7 = vld [vmem:[%s8089_s1 + $0xe40] sm:$0xff] }
 0x370   : > { %4274 = vmatprep.subr.bf16.mxu1 %v4273_v12  ;;  %v3141_v12 = vld [vmem:[%s8089_s1 + $0xc80] sm:$0xff] }
 0x371   : > { %v4299_v20 = vpack.c.bf16 %v3143_v26, %v3141_v12  ;;  %v3178_v12 = vld [vmem:[%s8089_s1 + $0xda8] sm:$0xff]  ;;  %v3180_v26 = vld [vmem:[%s8089_s1 + $0xdb8] sm:$0xff] }
 0x373   : > { %v1454_v30 = vpop.f32.mrb[4].mxu1  ;;  %4276 = vmatpush1.bf16.msra.mxu1 %v4275_v22  ;;  %v4301_v22 = vpack.c.bf16 %v3148_v39, %v3146_v38  ;;  %v4333_v39 = vpack.c.bf16 %v3180_v26, %v3178_v12  ;;  %v3201_v26 = vld [vmem:[%s8089_s1 + $0xe60] sm:$0xff] }
 0x374   : > { %v6842_v18 = vadd.f32 %v4721_v17, %v1454_v30  ;;  %v1456_v19 = vpop.f32.mrb[5].mxu1  ;;  %4278 = vmatprep.subr.bf16.mxu1 %v4277_v33  ;;  %v3145_v33 = vld [vmem:[%s8089_s1 + $0xca0] sm:$0xff]  ;;  %v4305_v30 = vpack.c.bf16 %v3152_v15, %v3150_v13  ;;  %v3151_v17 = vld [vmem:[%s8089_s1 + $0xcd0] sm:$0xff] }
 0x375   : > { %v6851_v27 = vadd.f32 %v4722_v46, %v1456_v19  ;;  %v4303_v16 = vpack.c.bf16 %v3147_v34, %v3145_v33  ;;  %v3154_v19 = vld [vmem:[%s8089_s1 + $0xce8] sm:$0xff]  ;;  %v3153_v46 = vld [vmem:[%s8089_s1 + $0xce0] sm:$0xff]  ;;  %v3184_v34 = vld [vmem:[%s8089_s1 + $0xdd8] sm:$0xff] }
 0x376   : > { %v6860_v29 = vmax.f32 %v6842_v18, 0.0  ;;  %v3182_v33 = vld [vmem:[%s8089_s1 + $0xdc8] sm:$0xff] }
 0x377   : > { %v6863_v32 = vmax.f32 %v6851_v27, 0.0  ;;  %v1460_v35 = vpop.f32.mrb[6].mxu1  ;;  %4280 = vmatpush1.bf16.msra.mxu1 %v4279_v37  ;;  %v3149_v37 = vld [vmem:[%s8089_s1 + $0xcc0] sm:$0xff]  ;;  %v4337_v15 = vpack.c.bf16 %v3184_v34, %v3182_v33 }
 0x378   : > { %1507 = vst [vmem:[#allocation3 + $0x30] sm:$0xff] %v6860_v29  ;;  %v6867_v24 = vadd.f32 %v4723_v14, %v1460_v35  ;;  %v1462_v43 = vpop.f32.mrb[7].mxu1  ;;  %4282 = vmatprep.subr.bf16.mxu1 %v4281_v21  ;;  %v3156_v21 = vld [vmem:[%s8089_s1 + $0xcf8] sm:$0xff]  ;;  %v4307_v23 = vpack.c.bf16 %v3151_v17, %v3149_v37  ;;  %v3157_v14 = vld [vmem:[%s8089_s1 + $0xd00] sm:$0xff]  ;;  %v3186_v37 = vld [vmem:[%s8089_s1 + $0xde8] sm:$0xff] }
 0x379   : > { %1508 = vst [vmem:[#allocation3 + $0x38] sm:$0xff] %v6863_v32  ;;  %v6877_v52 = vadd.f32 %v4724_v51, %v1462_v43  ;;  %1924 = vmatprep.mubr.f32.mxu1 %v6863_v32  ;;  %v4309_v25 = vpack.c.bf16 %v3156_v21, %v3154_v19  ;;  %v3160_v35 = vld [vmem:[%s8089_s1 + $0xd18] sm:$0xff]  ;;  %v3159_v43 = vld [vmem:[%s8089_s1 + $0xd10] sm:$0xff]  ;;  %v3205_v34 = vld [vmem:[%s8089_s1 + $0xe80] sm:$0xff] }
 0x37a   : > { %v1503_v56 = vmax.f32 %v6867_v24, 0.0  ;;  %1925 = vmatmul.mubr.f32.vlgmr.msra.gmra.mrb[8].mxu1 %v6860_v29  ;;  %v4313_v44 = vpack.c.bf16 %v3160_v35, %v3158_v28  ;;  %v4315_v50 = vpack.c.bf16 %v3159_v43, %v3157_v14  ;;  %v3188_v17 = vld [vmem:[%s8089_s1 + $0xdf8] sm:$0xff]  ;;  %v1513_v28 = vld [vmem:[#allocation3] sm:$0x80]  ;;  %v3191_v43 = vld [vmem:[%s8089_s1 + $0xe10] sm:$0xff] }
 0x37b   : > { %v1504_v59 = vmax.f32 %v6877_v52, 0.0  ;;  %4284 = vmatpush1.bf16.msra.mxu1 %v4283_v40  ;;  %v4311_v40 = vpack.c.bf16 %v3155_v36, %v3153_v46  ;;  %v4341_v21 = vpack.c.bf16 %v3188_v17, %v3186_v37  ;;  %v3190_v46 = vld [vmem:[%s8089_s1 + $0xe08] sm:$0xff]  ;;  %v3192_v36 = vld [vmem:[%s8089_s1 + $0xe18] sm:$0xff]  ;;  %v3189_v14 = vld [vmem:[%s8089_s1 + $0xe00] sm:$0xff] }
 0x37c   : > { %1511 = vst [vmem:[#allocation3 + $0x50] sm:$0xff] %v1503_v56  ;;  %4286 = vmatprep.subr.bf16.mxu1 %v4285_v45  ;;  %v3162_v45 = vld [vmem:[%s8089_s1 + $0xd28] sm:$0xff]  ;;  %v3209_v17 = vld [vmem:[%s8089_s1 + $0xea0] sm:$0xff] }
 0x37d   : > { %1512 = vst [vmem:[#allocation3 + $0x58] sm:$0xff] %v1504_v59  ;;  %1930 = vmatprep.mubr.f32.mxu1 %v1504_v59  ;;  %v4317_v51 = vpack.c.bf16 %v3164_v48, %v3162_v45  ;;  %v4319_v59 = vpack.c.bf16 %v3163_v54, %v3161_v53  ;;  %v1949_v45 = vrot.slane %v1513_v28, 7  ;;  %v1950_v48 = vrot.slane %v6640_v41, 7  ;;  %v1521_v54 = vld [vmem:[#allocation3 + $0x40] sm:$0x7f]  ;;  %v3195_v41 = vld [vmem:[%s8089_s1 + $0xe30] sm:$0xff] }
 0x37e   : > { %1931 = vmatmul.mubr.f32.gmra.mrb[10].mxu1 %v1503_v56  ;;  %v3166_v56 = vld [vmem:[%s8089_s1 + $0xd48] sm:$0xff]  ;;  %v3215_v28 = vld [vmem:[%s8089_s1 + $0xed0] sm:$0xff] }
 0x37f   : > { %4288 = vmatpush1.bf16.msra.mxu1 %v4287_v62  ;;  %2041 = vmatprep.mubr.f32.mxu1 %v1954_v3  ;;  %v4321_v62 = vpack.c.bf16 %v3168_v60, %v3166_v56  ;;  %v4325_v3 = vpack.c.bf16 %v3172_v1, %v3170_v63  ;;  %v4347_v56 = vpack.c.bf16 %v3191_v43, %v3189_v14  ;;  %v1516_v60 = vld [vmem:[#allocation3 + $0x18] sm:$0x80]  ;;  %v3198_v63 = vld [vmem:[%s8089_s1 + $0xe48] sm:$0xff]  ;;  %v3217_v43 = vld [vmem:[%s8089_s1 + $0xee0] sm:$0xff] }
 0x380   : > { %4290 = vmatprep.subr.bf16.mxu1 %v4289_v61  ;;  %v3165_v61 = vld [vmem:[%s8089_s1 + $0xd40] sm:$0xff]  ;;  %v3200_v1 = vld [vmem:[%s8089_s1 + $0xe58] sm:$0xff] }
 0x381   : > { %v4323_v2 = vpack.c.bf16 %v3167_v0, %v3165_v61  ;;  %v1951_v61 = vsel %vm656_vm1, %v1949_v45, %v1950_v48  ;;  %v1961_v0 = vrot.slane %v1521_v54, 7  ;;  %v4353_v6 = vpack.c.bf16 %v3200_v1, %v3198_v63  ;;  %v3219_v45 = vld [vmem:[%s8089_s1 + $0xef0] sm:$0xff]  ;;  %v3221_v54 = vld [vmem:[%s8089_s1 + $0xf00] sm:$0xff]  ;;  %v3230_v63 = vld [vmem:[%s8089_s1 + $0xf48] sm:$0xff] }
 0x382   : > { %v3232_v1 = vld [vmem:[%s8089_s1 + $0xf58] sm:$0xff] }
 0x383   : > { %4292 = vmatpush1.bf16.msra.mxu1 %v4291_v4  ;;  %v3169_v4 = vld [vmem:[%s8089_s1 + $0xd60] sm:$0xff]  ;;  %v1962_v42 = vsel %vm656_vm1, %v1950_v48, %v1961_v0  ;;  %v3222_v48 = vld [vmem:[%s8089_s1 + $0xf08] sm:$0xff]  ;;  %v3227_v0 = vld [vmem:[%s8089_s1 + $0xf30] sm:$0xff] }
 0x384   : > { %4294 = vmatprep.subr.bf16.mxu1 %v4293_v5  ;;  %v3171_v5 = vld [vmem:[%s8089_s1 + $0xd70] sm:$0xff] }
 0x385   : > { %v4327_v8 = vpack.c.bf16 %v3171_v5, %v3169_v4  ;;  %v1959_v4 = vrot.slane %v6863_v32, 7 }
 0x387   : > { %4296 = vmatpush1.bf16.msra.mxu1 %v4295_v10  ;;  %v3173_v10 = vld [vmem:[%s8089_s1 + $0xd80] sm:$0xff] }
 0x388   : > { %4298 = vmatprep.subr.bf16.mxu1 %v4297_v11  ;;  %v3175_v11 = vld [vmem:[%s8089_s1 + $0xd90] sm:$0xff] }
 0x389   : > { %v4331_v38 = vpack.c.bf16 %v3175_v11, %v3173_v10 }
 0x38b   : > { %4300 = vmatpush1.bf16.msra.mxu1 %v4299_v20  ;;  %v3177_v20 = vld [vmem:[%s8089_s1 + $0xda0] sm:$0xff] }
 0x38c   : > { %4302 = vmatprep.subr.bf16.mxu1 %v4301_v22  ;;  %v3179_v22 = vld [vmem:[%s8089_s1 + $0xdb0] sm:$0xff] }
 0x38d   : > { %v4335_v13 = vpack.c.bf16 %v3179_v22, %v3177_v20  ;;  %v3208_v20 = vld [vmem:[%s8089_s1 + $0xe98] sm:$0xff] }
 0x38f   : > { %4304 = vmatpush1.bf16.msra.mxu1 %v4303_v16  ;;  %v3181_v16 = vld [vmem:[%s8089_s1 + $0xdc0] sm:$0xff] }
 0x390   : > { %4306 = vmatprep.subr.bf16.mxu1 %v4305_v30  ;;  %v3183_v30 = vld [vmem:[%s8089_s1 + $0xdd0] sm:$0xff] }
 0x391   : > { %v4339_v19 = vpack.c.bf16 %v3183_v30, %v3181_v16  ;;  %v3212_v16 = vld [vmem:[%s8089_s1 + $0xeb8] sm:$0xff] }
 0x393   : > { %4308 = vmatpush1.bf16.msra.mxu1 %v4307_v23  ;;  %v3185_v23 = vld [vmem:[%s8089_s1 + $0xde0] sm:$0xff] }
 0x394   : > { %4310 = vmatprep.subr.bf16.mxu1 %v4309_v25  ;;  %v3187_v25 = vld [vmem:[%s8089_s1 + $0xdf0] sm:$0xff] }
 0x395   : > { %v4343_v35 = vpack.c.bf16 %v3187_v25, %v3185_v23  ;;  %v3216_v23 = vld [vmem:[%s8089_s1 + $0xed8] sm:$0xff] }
 0x397   : > { %4312 = vmatpush1.bf16.msra.mxu1 %v4311_v40  ;;  %v1522_v40 = vld [vmem:[#allocation3 + $0x48] sm:$0x7f] }
 0x398   : > { %4314 = vmatprep.subr.bf16.mxu1 %v4313_v44  ;;  %v4345_v44 = vpack.c.bf16 %v3192_v36, %v3190_v46  ;;  %v1963_v53 = vrot.slane %v1522_v40, 7  ;;  %v3213_v36 = vld [vmem:[%s8089_s1 + $0xec0] sm:$0xff]  ;;  %v3220_v40 = vld [vmem:[%s8089_s1 + $0xef8] sm:$0xff] }
 0x39b   : > { %4316 = vmatpush1.bf16.msra.mxu1 %v4315_v50  ;;  %v3194_v50 = vld [vmem:[%s8089_s1 + $0xe28] sm:$0xff] }
 0x39c   : > { %4318 = vmatprep.subr.bf16.mxu1 %v4317_v51  ;;  %v3196_v51 = vld [vmem:[%s8089_s1 + $0xe38] sm:$0xff] }
 0x39f   : > { %4320 = vmatpush1.bf16.msra.mxu1 %v4319_v59  ;;  %v4349_v59 = vpack.c.bf16 %v3196_v51, %v3194_v50  ;;  %v3224_v50 = vld [vmem:[%s8089_s1 + $0xf18] sm:$0xff]  ;;  %v4375_v51 = vpack.c.bf16 %v3219_v45, %v3217_v43  ;;  %v1515_v43 = vld [vmem:[#allocation3 + $0x10] sm:$0x80] }
 0x3a0   : > { %4322 = vmatprep.subr.bf16.mxu1 %v4321_v62  ;;  %v3193_v62 = vld [vmem:[%s8089_s1 + $0xe20] sm:$0xff] }
 0x3a1   : > { %v4351_v5 = vpack.c.bf16 %v3195_v41, %v3193_v62 }
 0x3a3   : > { %4324 = vmatpush1.bf16.msra.mxu1 %v4323_v2  ;;  %v1964_v2 = vsel %vm656_vm1, %v1953_v57, %v1963_v53  ;;  %v3202_v57 = vld [vmem:[%s8089_s1 + $0xe68] sm:$0xff]  ;;  %v4377_v53 = vpack.c.bf16 %v3224_v50, %v3222_v48  ;;  %v1524_v48 = vld [vmem:[#allocation3 + $0x58] sm:$0x7f] }
 0x3a4   : > { %4326 = vmatprep.subr.bf16.mxu1 %v4325_v3  ;;  %v1958_v3 = vrot.slane %v1516_v60, 7  ;;  %v3226_v60 = vld [vmem:[%s8089_s1 + $0xf28] sm:$0xff] }
 0x3a6   : > { %v1960_v10 = vsel %vm656_vm1, %v1958_v3, %v1959_v4  ;;  %v4385_v3 = vpack.c.bf16 %v3232_v1, %v3230_v63  ;;  %v3385_v1 = vld [vmem:[%s8089_s1 + $0x1420] sm:$0xff] }
 0x3a7   : > { %4328 = vmatpush1.bf16.msra.mxu1 %v4327_v8  ;;  %v3199_v8 = vld [vmem:[%s8089_s1 + $0xe50] sm:$0xff] }
 0x3a8   : > { %4330 = vmatprep.subr.bf16.mxu1 %v4329_v9  ;;  %v3204_v9 = vld [vmem:[%s8089_s1 + $0xe78] sm:$0xff]  ;;  %v4355_v11 = vpack.c.bf16 %v3199_v8, %v3197_v7  ;;  %v3234_v7 = vld [vmem:[%s8089_s1 + $0xf68] sm:$0xff] }
 0x3a9   : > { %v4357_v12 = vpack.c.bf16 %v3204_v9, %v3202_v57  ;;  %v3236_v8 = vld [vmem:[%s8089_s1 + $0xf78] sm:$0xff]  ;;  %v3233_v9 = vld [vmem:[%s8089_s1 + $0xf60] sm:$0xff] }
 0x3aa   : > { %v4389_v57 = vpack.c.bf16 %v3236_v8, %v3234_v7 }
 0x3ab   : > { %4332 = vmatpush1.bf16.msra.mxu1 %v4331_v38  ;;  %v3203_v38 = vld [vmem:[%s8089_s1 + $0xe70] sm:$0xff] }
 0x3ac   : > { %4334 = vmatprep.subr.bf16.mxu1 %v4333_v39  ;;  %v3206_v39 = vld [vmem:[%s8089_s1 + $0xe88] sm:$0xff]  ;;  %v4359_v22 = vpack.c.bf16 %v3203_v38, %v3201_v26 }
 0x3ad   : > { %v4361_v33 = vpack.c.bf16 %v3208_v20, %v3206_v39  ;;  %v3237_v39 = vld [vmem:[%s8089_s1 + $0xf80] sm:$0xff]  ;;  %v3239_v20 = vld [vmem:[%s8089_s1 + $0xf90] sm:$0xff] }
 0x3af   : > { %4336 = vmatpush1.bf16.msra.mxu1 %v4335_v13  ;;  %v3207_v13 = vld [vmem:[%s8089_s1 + $0xe90] sm:$0xff] }
 0x3b0   : > { %4338 = vmatprep.subr.bf16.mxu1 %v4337_v15  ;;  %v3210_v15 = vld [vmem:[%s8089_s1 + $0xea8] sm:$0xff]  ;;  %v4363_v30 = vpack.c.bf16 %v3207_v13, %v3205_v34  ;;  %v4395_v34 = vpack.c.bf16 %v3239_v20, %v3237_v39  ;;  %v3395_v39 = vld [vmem:[%s8089_s1 + $0x1470] sm:$0xff] }
 0x3b1   : > { %v4365_v37 = vpack.c.bf16 %v3212_v16, %v3210_v15  ;;  %v3241_v15 = vld [vmem:[%s8089_s1 + $0xfa0] sm:$0xff]  ;;  %v3243_v16 = vld [vmem:[%s8089_s1 + $0xfb0] sm:$0xff]  ;;  %v3510_v20 = vld [vmem:[%s8090_s2 + $0x408] sm:$0xff] }
 0x3b3   : > { %4340 = vmatpush1.bf16.msra.mxu1 %v4339_v19  ;;  %v3211_v19 = vld [vmem:[%s8089_s1 + $0xeb0] sm:$0xff] }
 0x3b4   : > { %4342 = vmatprep.subr.bf16.mxu1 %v4341_v21  ;;  %v3214_v21 = vld [vmem:[%s8089_s1 + $0xec8] sm:$0xff]  ;;  %v4367_v25 = vpack.c.bf16 %v3211_v19, %v3209_v17  ;;  %v4399_v17 = vpack.c.bf16 %v3243_v16, %v3241_v15  ;;  %v3513_v15 = vld [vmem:[%s8090_s2 + $0x420] sm:$0xff] }
 0x3b5   : > { %v4369_v46 = vpack.c.bf16 %v3216_v23, %v3214_v21  ;;  %v3245_v21 = vld [vmem:[%s8089_s1 + $0xfc0] sm:$0xff]  ;;  %v3247_v23 = vld [vmem:[%s8089_s1 + $0xfd0] sm:$0xff]  ;;  %v3518_v16 = vld [vmem:[%s8090_s2 + $0x448] sm:$0xff] }
 0x3b7   : > { %4344 = vmatpush1.bf16.msra.mxu1 %v4343_v35  ;;  %v3218_v35 = vld [vmem:[%s8089_s1 + $0xee8] sm:$0xff] }
 0x3b8   : > { %4346 = vmatprep.subr.bf16.mxu1 %v4345_v44  ;;  %v4371_v44 = vpack.c.bf16 %v3215_v28, %v3213_v36  ;;  %v4373_v14 = vpack.c.bf16 %v3220_v40, %v3218_v35  ;;  %v4403_v36 = vpack.c.bf16 %v3247_v23, %v3245_v21  ;;  %v3249_v35 = vld [vmem:[%s8089_s1 + $0xfe0] sm:$0xff]  ;;  %v3251_v40 = vld [vmem:[%s8089_s1 + $0xff0] sm:$0xff] }
 0x3b9   : > { %v4407_v45 = vpack.c.bf16 %v3251_v40, %v3249_v35  ;;  %v3517_v21 = vld [vmem:[%s8090_s2 + $0x440] sm:$0xff] }
 0x3ba   : > { %2042 = vmatmul.mubr.f32.vlgmr.msra.gmra.mrb[8].mxu1 %v1951_v61  ;;  %v3225_v61 = vld [vmem:[%s8089_s1 + $0xf20] sm:$0xff] }
 0x3bb   : > { %2047 = vmatprep.mubr.f32.mxu1 %v1964_v2  ;;  %4348 = vmatpush1.bf16.msra.mxu1 %v4347_v56  ;;  %v3223_v56 = vld [vmem:[%s8089_s1 + $0xf10] sm:$0xff]  ;;  %v4383_v2 = vpack.c.bf16 %v3227_v0, %v3225_v61  ;;  %v2132_v0 = vld [vmem:[#allocation3 + $0x28] sm:$0xfe]  ;;  %v3521_v23 = vld [vmem:[%s8090_s2 + $0x460] sm:$0xff] }
 0x3bc   : > { %4350 = vmatprep.subr.bf16.mxu1 %v4349_v59  ;;  %v3228_v59 = vld [vmem:[%s8089_s1 + $0xf38] sm:$0xff]  ;;  %v4379_v62 = vpack.c.bf16 %v3223_v56, %v3221_v54  ;;  %v1955_v54 = vrot.slane %v1515_v43, 7  ;;  %v1956_v56 = vrot.slane %v6860_v29, 7  ;;  %v3387_v29 = vld [vmem:[%s8089_s1 + $0x1430] sm:$0xff]  ;;  %v2287_v8 = vrot.slane %v2132_v0, 1  ;;  %v3525_v43 = vld [vmem:[%s8090_s2 + $0x480] sm:$0xff] }
 0x3bd   : > { %v4381_v41 = vpack.c.bf16 %v3228_v59, %v3226_v60  ;;  %v3386_v60 = vld [vmem:[%s8089_s1 + $0x1428] sm:$0xff]  ;;  %v3388_v59 = vld [vmem:[%s8089_s1 + $0x1438] sm:$0xff]  ;;  %v4543_v35 = vpack.c.bf16 %v3521_v23, %v3517_v21  ;;  %v3537_v0 = vld [vmem:[%s8090_s2 + $0x4e0] sm:$0xff] }
 0x3be   : > { %2048 = vmatmul.mubr.f32.gmra.mrb[10].mxu1 %v1962_v42  ;;  %v4413_v63 = vpack.c.bf16 %v3388_v59, %v3386_v60 }
 0x3bf   : > { %4352 = vmatpush1.bf16.msra.mxu1 %v4351_v5  ;;  %2118 = vmatprep.mubr.f32.mxu1 %v1960_v10  ;;  %v3229_v5 = vld [vmem:[%s8089_s1 + $0xf40] sm:$0xff]  ;;  %v3235_v10 = vld [vmem:[%s8089_s1 + $0xf70] sm:$0xff] }
 0x3c0   : > { %4354 = vmatprep.subr.bf16.mxu1 %v4353_v6  ;;  %v3231_v6 = vld [vmem:[%s8089_s1 + $0xf50] sm:$0xff]  ;;  %v4391_v26 = vpack.c.bf16 %v3235_v10, %v3233_v9  ;;  %v3389_v10 = vld [vmem:[%s8089_s1 + $0x1440] sm:$0xff] }
 0x3c1   : > { %v4387_v42 = vpack.c.bf16 %v3231_v6, %v3229_v5  ;;  %v3390_v5 = vld [vmem:[%s8089_s1 + $0x1448] sm:$0xff]  ;;  %v3392_v6 = vld [vmem:[%s8089_s1 + $0x1458] sm:$0xff] }
 0x3c2   : > { %v4417_v9 = vpack.c.bf16 %v3392_v6, %v3390_v5  ;;  %v3408_v5 = vld [vmem:[%s8089_s1 + $0x14d8] sm:$0xff] }
 0x3c3   : > { %4356 = vmatpush1.bf16.msra.mxu1 %v4355_v11  ;;  %v3238_v11 = vld [vmem:[%s8089_s1 + $0xf88] sm:$0xff] }
 0x3c4   : > { %4358 = vmatprep.subr.bf16.mxu1 %v4357_v12  ;;  %v3240_v12 = vld [vmem:[%s8089_s1 + $0xf98] sm:$0xff] }
 0x3c5   : > { %v4393_v38 = vpack.c.bf16 %v3240_v12, %v3238_v11  ;;  %v3391_v11 = vld [vmem:[%s8089_s1 + $0x1450] sm:$0xff]  ;;  %v3396_v12 = vld [vmem:[%s8089_s1 + $0x1478] sm:$0xff] }
 0x3c7   : > { %4360 = vmatpush1.bf16.msra.mxu1 %v4359_v22  ;;  %v3242_v22 = vld [vmem:[%s8089_s1 + $0xfa8] sm:$0xff] }
 0x3c8   : > { %4362 = vmatprep.subr.bf16.mxu1 %v4361_v33  ;;  %v3244_v33 = vld [vmem:[%s8089_s1 + $0xfb8] sm:$0xff] }
 0x3c9   : > { %v4397_v13 = vpack.c.bf16 %v3244_v33, %v3242_v22  ;;  %v3514_v22 = vld [vmem:[%s8090_s2 + $0x428] sm:$0xff]  ;;  %v3509_v33 = vld [vmem:[%s8090_s2 + $0x400] sm:$0xff] }
 0x3cb   : > { %4364 = vmatpush1.bf16.msra.mxu1 %v4363_v30  ;;  %v3246_v30 = vld [vmem:[%s8089_s1 + $0xfc8] sm:$0xff] }
 0x3cc   : > { %4366 = vmatprep.subr.bf16.mxu1 %v4365_v37  ;;  %v3248_v37 = vld [vmem:[%s8089_s1 + $0xfd8] sm:$0xff] }
 0x3cd   : > { %v4401_v19 = vpack.c.bf16 %v3248_v37, %v3246_v30  ;;  %v3522_v30 = vld [vmem:[%s8090_s2 + $0x468] sm:$0xff] }
 0x3cf   : > { %4368 = vmatpush1.bf16.msra.mxu1 %v4367_v25  ;;  %v3250_v25 = vld [vmem:[%s8089_s1 + $0xfe8] sm:$0xff] }
 0x3d0   : > { %4370 = vmatprep.subr.bf16.mxu1 %v4369_v46  ;;  %v3252_v46 = vld [vmem:[%s8089_s1 + $0xff8] sm:$0xff] }
 0x3d1   : > { %v4405_v28 = vpack.c.bf16 %v3252_v46, %v3250_v25  ;;  %v3526_v25 = vld [vmem:[%s8090_s2 + $0x488] sm:$0xff] }
 0x3d2   : > { %v3398_v46 = vld [vmem:[%s8089_s1 + $0x1488] sm:$0xff] }
 0x3d3   : > { %4372 = vmatpush1.bf16.msra.mxu1 %v4371_v44  ;;  %v3382_v44 = vld [vmem:[%s8089_s1 + $0x1408] sm:$0xff] }
 0x3d4   : > { %4374 = vmatprep.subr.bf16.mxu1 %v4373_v14  ;;  %v3384_v14 = vld [vmem:[%s8089_s1 + $0x1418] sm:$0xff] }
 0x3d5   : > { %v4409_v50 = vpack.c.bf16 %v3384_v14, %v3382_v44  ;;  %v3397_v44 = vld [vmem:[%s8089_s1 + $0x1480] sm:$0xff] }
 0x3d7   : > { %4376 = vmatpush1.bf16.msra.mxu1 %v4375_v51  ;;  %v3381_v51 = vld [vmem:[%s8089_s1 + $0x1400] sm:$0xff] }
 0x3d8   : > { %4378 = vmatprep.subr.bf16.mxu1 %v4377_v53  ;;  %v3383_v53 = vld [vmem:[%s8089_s1 + $0x1410] sm:$0xff] }
 0x3d9   : > { %v4411_v61 = vpack.c.bf16 %v3383_v53, %v3381_v51  ;;  %v3534_v51 = vld [vmem:[%s8090_s2 + $0x4c8] sm:$0xff] }
 0x3da   : > { %v3538_v53 = vld [vmem:[%s8090_s2 + $0x4e8] sm:$0xff] }
 0x3db   : > { %4380 = vmatpush1.bf16.msra.mxu1 %v4379_v62  ;;  %v1967_v62 = vrot.slane %v1524_v48, 7 }
 0x3dc   : > { %4382 = vmatprep.subr.bf16.mxu1 %v4381_v41  ;;  %v1523_v41 = vld [vmem:[#allocation3 + $0x50] sm:$0x7f] }
 0x3dd   : > { %v1968_v7 = vsel %vm656_vm1, %v1959_v4, %v1967_v62  ;;  %v3394_v4 = vld [vmem:[%s8089_s1 + $0x1468] sm:$0xff]  ;;  %v3401_v62 = vld [vmem:[%s8089_s1 + $0x14a0] sm:$0xff] }
 0x3de   : > { %v4421_v37 = vpack.c.bf16 %v3396_v12, %v3394_v4  ;;  %v3550_v4 = vld [vmem:[%s8090_s2 + $0x548] sm:$0xff] }
 0x3df   : > { %4384 = vmatpush1.bf16.msra.mxu1 %v4383_v2  ;;  %v1957_v2 = vsel %vm656_vm1, %v1955_v54, %v1956_v56  ;;  %v3402_v54 = vld [vmem:[%s8089_s1 + $0x14a8] sm:$0xff] }
 0x3e0   : > { %4386 = vmatprep.subr.bf16.mxu1 %v4385_v3  ;;  %v1965_v3 = vrot.slane %v1523_v41, 7  ;;  %v4549_v41 = vpack.c.bf16 %v3538_v53, %v3534_v51  ;;  %v3554_v12 = vld [vmem:[%s8090_s2 + $0x568] sm:$0xff]  ;;  %v3417_v51 = vld [vmem:[%s8089_s1 + $0x1520] sm:$0xff] }
 0x3e2   : > { %v1966_v32 = vsel %vm656_vm1, %v1956_v56, %v1965_v3  ;;  %v3404_v56 = vld [vmem:[%s8089_s1 + $0x14b8] sm:$0xff]  ;;  %v3406_v3 = vld [vmem:[%s8089_s1 + $0x14c8] sm:$0xff] }
 0x3e3   : > { %4388 = vmatpush1.bf16.msra.mxu1 %v4387_v42  ;;  %v4415_v42 = vpack.c.bf16 %v3387_v29, %v3385_v1  ;;  %v3403_v1 = vld [vmem:[%s8089_s1 + $0x14b0] sm:$0xff]  ;;  %v3542_v29 = vld [vmem:[%s8090_s2 + $0x508] sm:$0xff] }
 0x3e4   : > { %4390 = vmatprep.subr.bf16.mxu1 %v4389_v57  ;;  %v2288_v57 = vrot.slane %v6669_v58, 1  ;;  %v3455_v58 = vld [vmem:[%s8089_s1 + $0x1650] sm:$0xff] }
 0x3e7   : > { %4392 = vmatpush1.bf16.msra.mxu1 %v4391_v26  ;;  %v2289_v26 = vsel %vm992_vm2, %v2287_v8, %v2288_v57  ;;  %v3405_v8 = vld [vmem:[%s8089_s1 + $0x14c0] sm:$0xff] }
 0x3e8   : > { %4394 = vmatprep.subr.bf16.mxu1 %v4393_v38  ;;  %v3393_v38 = vld [vmem:[%s8089_s1 + $0x1460] sm:$0xff] }
 0x3e9   : > { %v4423_v40 = vpack.c.bf16 %v3395_v39, %v3393_v38  ;;  %v3412_v38 = vld [vmem:[%s8089_s1 + $0x14f8] sm:$0xff] }
 0x3eb   : > { %4396 = vmatpush1.bf16.msra.mxu1 %v4395_v34  ;;  %v4419_v34 = vpack.c.bf16 %v3391_v11, %v3389_v10  ;;  %v3545_v10 = vld [vmem:[%s8090_s2 + $0x520] sm:$0xff]  ;;  %v4433_v11 = vpack.c.bf16 %v3408_v5, %v3406_v3 }
 0x3ec   : > { %4398 = vmatprep.subr.bf16.mxu1 %v4397_v13  ;;  %v4537_v13 = vpack.c.bf16 %v3514_v22, %v3510_v20  ;;  %v3409_v22 = vld [vmem:[%s8089_s1 + $0x14e0] sm:$0xff] }
 0x3ed   : > { %v3573_v3 = vld [vmem:[%s8090_s2 + $0x600] sm:$0xff] }
 0x3ee   : > { %4538 = vmatprep.subr.bf16.mxu0 %v4537_v13  ;;  %v3553_v13 = vld [vmem:[%s8090_s2 + $0x560] sm:$0xff] }
 0x3ef   : > { %4400 = vmatpush1.bf16.msra.mxu1 %v4399_v17  ;;  %v4539_v17 = vpack.c.bf16 %v3513_v15, %v3509_v33  ;;  %v4557_v33 = vpack.c.bf16 %v3554_v12, %v3550_v4  ;;  %v3577_v5 = vld [vmem:[%s8090_s2 + $0x620] sm:$0xff] }
 0x3f0   : > { %4402 = vmatprep.subr.bf16.mxu1 %v4401_v19  ;;  %v4541_v19 = vpack.c.bf16 %v3522_v30, %v3518_v16  ;;  %v3411_v16 = vld [vmem:[%s8089_s1 + $0x14f0] sm:$0xff]  ;;  %v3558_v30 = vld [vmem:[%s8090_s2 + $0x588] sm:$0xff]  ;;  %v3425_v4 = vld [vmem:[%s8089_s1 + $0x1560] sm:$0xff] }
 0x3f1   : > { %4540 = vmatpush1.bf16.msra.mxu0 %v4539_v17  ;;  %v3414_v17 = vld [vmem:[%s8089_s1 + $0x1508] sm:$0xff]  ;;  %v4439_v23 = vpack.c.bf16 %v3411_v16, %v3409_v22 }
 0x3f2   : > { %4542 = vmatprep.subr.bf16.mxu0 %v4541_v19  ;;  %v3416_v19 = vld [vmem:[%s8089_s1 + $0x1518] sm:$0xff]  ;;  %v3590_v22 = vld [vmem:[%s8090_s2 + $0x688] sm:$0xff] }
 0x3f3   : > { %4404 = vmatpush1.bf16.msra.mxu1 %v4403_v36  ;;  %v3400_v36 = vld [vmem:[%s8089_s1 + $0x1498] sm:$0xff] }
 0x3f4   : > { %4406 = vmatprep.subr.bf16.mxu1 %v4405_v28  ;;  %v3530_v28 = vld [vmem:[%s8090_s2 + $0x4a8] sm:$0xff]  ;;  %v4425_v48 = vpack.c.bf16 %v3400_v36, %v3398_v46  ;;  %v3557_v36 = vld [vmem:[%s8090_s2 + $0x580] sm:$0xff] }
 0x3f5   : > { %v4545_v14 = vpack.c.bf16 %v3530_v28, %v3526_v25  ;;  %4544 = vmatpush1.bf16.msra.mxu0 %v4543_v35  ;;  %v3413_v25 = vld [vmem:[%s8089_s1 + $0x1500] sm:$0xff]  ;;  %v4441_v35 = vpack.c.bf16 %v3416_v19, %v3414_v17 }
 0x3f6   : > { %v3561_v28 = vld [vmem:[%s8090_s2 + $0x5a0] sm:$0xff] }
 0x3f7   : > { %4408 = vmatpush1.bf16.msra.mxu1 %v4407_v45  ;;  %v3529_v45 = vld [vmem:[%s8090_s2 + $0x4a0] sm:$0xff]  ;;  %4546 = vmatprep.subr.bf16.mxu0 %v4545_v14  ;;  %v3570_v14 = vld [vmem:[%s8090_s2 + $0x5e8] sm:$0xff] }
 0x3f8   : > { %4410 = vmatprep.subr.bf16.mxu1 %v4409_v50  ;;  %v3399_v50 = vld [vmem:[%s8089_s1 + $0x1490] sm:$0xff]  ;;  %v4547_v60 = vpack.c.bf16 %v3529_v45, %v3525_v43  ;;  %v3418_v43 = vld [vmem:[%s8089_s1 + $0x1528] sm:$0xff]  ;;  %v3420_v45 = vld [vmem:[%s8089_s1 + $0x1538] sm:$0xff] }
 0x3f9   : > { %v4427_v59 = vpack.c.bf16 %v3399_v50, %v3397_v44  ;;  %v3566_v44 = vld [vmem:[%s8090_s2 + $0x5c8] sm:$0xff]  ;;  %v3589_v17 = vld [vmem:[%s8090_s2 + $0x680] sm:$0xff] }
 0x3fa   : > { %2119 = vmatmul.mubr.f32.vlgmr.msra.gmra.mrb[8].mxu1 %v1957_v2  ;;  %v3546_v2 = vld [vmem:[%s8090_s2 + $0x528] sm:$0xff]  ;;  %4548 = vmatpush1.bf16.msra.mxu0 %v4547_v60  ;;  %v4565_v53 = vpack.c.bf16 %v3570_v14, %v3566_v44  ;;  %v4445_v60 = vpack.c.bf16 %v3420_v45, %v3418_v43  ;;  %v3593_v19 = vld [vmem:[%s8090_s2 + $0x6a0] sm:$0xff] }
 0x3fb   : > { %2124 = vmatprep.mubr.f32.mxu1 %v1968_v7  ;;  %4412 = vmatpush1.bf16.msra.mxu1 %v4411_v61  ;;  %v3533_v61 = vld [vmem:[%s8090_s2 + $0x4c0] sm:$0xff]  ;;  %v4431_v7 = vpack.c.bf16 %v3403_v1, %v3401_v62  ;;  %v3574_v62 = vld [vmem:[%s8090_s2 + $0x608] sm:$0xff] }
 0x3fc   : > { %4414 = vmatprep.subr.bf16.mxu1 %v4413_v63  ;;  %v4429_v63 = vpack.c.bf16 %v3404_v56, %v3402_v54  ;;  %v4551_v6 = vpack.c.bf16 %v3537_v0, %v3533_v61  ;;  %4550 = vmatprep.subr.bf16.mxu0 %v4549_v41  ;;  %v3565_v54 = vld [vmem:[%s8090_s2 + $0x5c0] sm:$0xff]  ;;  %v3578_v41 = vld [vmem:[%s8090_s2 + $0x628] sm:$0xff]  ;;  %v3424_v0 = vld [vmem:[%s8089_s1 + $0x1558] sm:$0xff] }
 0x3fd   : > { %v3569_v56 = vld [vmem:[%s8090_s2 + $0x5e0] sm:$0xff]  ;;  %v3422_v61 = vld [vmem:[%s8089_s1 + $0x1548] sm:$0xff] }
 0x3fe   : > { %2125 = vmatmul.mubr.f32.gmra.mrb[10].mxu1 %v1966_v32  ;;  %v3407_v32 = vld [vmem:[%s8089_s1 + $0x14d0] sm:$0xff]  ;;  %4552 = vmatpush1.bf16.msra.mxu0 %v4551_v6  ;;  %v4449_v6 = vpack.c.bf16 %v3424_v0, %v3422_v61  ;;  %v3433_v44 = vld [vmem:[%s8089_s1 + $0x15a0] sm:$0xff] }
 0x3ff   : > { %4416 = vmatpush1.bf16.msra.mxu1 %v4415_v42  ;;  %2376 = vmatprep.mubr.f32.mxu1 %v2289_v26  ;;  %v4553_v42 = vpack.c.bf16 %v3546_v2, %v3542_v29  ;;  %v3410_v26 = vld [vmem:[%s8089_s1 + $0x14e8] sm:$0xff]  ;;  %v4435_v20 = vpack.c.bf16 %v3407_v32, %v3405_v8  ;;  %v3421_v29 = vld [vmem:[%s8089_s1 + $0x1540] sm:$0xff]  ;;  %v4569_v2 = vpack.c.bf16 %v3578_v41, %v3574_v62 }
 0x400   : > { %4418 = vmatprep.subr.bf16.mxu1 %v4417_v9  ;;  %v3541_v9 = vld [vmem:[%s8090_s2 + $0x500] sm:$0xff]  ;;  %v4437_v15 = vpack.c.bf16 %v3412_v38, %v3410_v26  ;;  %v3582_v8 = vld [vmem:[%s8090_s2 + $0x648] sm:$0xff] }
 0x401   : > { %v4555_v39 = vpack.c.bf16 %v3545_v10, %v3541_v9  ;;  %4554 = vmatprep.subr.bf16.mxu0 %v4553_v42  ;;  %v3586_v42 = vld [vmem:[%s8090_s2 + $0x668] sm:$0xff]  ;;  %v3428_v10 = vld [vmem:[%s8089_s1 + $0x1578] sm:$0xff]  ;;  %v3581_v26 = vld [vmem:[%s8090_s2 + $0x640] sm:$0xff] }
 0x402   : > { %v3426_v9 = vld [vmem:[%s8089_s1 + $0x1568] sm:$0xff]  ;;  %v4573_v12 = vpack.c.bf16 %v3586_v42, %v3582_v8  ;;  %v3585_v38 = vld [vmem:[%s8090_s2 + $0x660] sm:$0xff] }
 0x403   : > { %4420 = vmatpush1.bf16.msra.mxu1 %v4419_v34  ;;  %v3549_v34 = vld [vmem:[%s8090_s2 + $0x540] sm:$0xff]  ;;  %4556 = vmatpush1.bf16.msra.mxu0 %v4555_v39  ;;  %v4453_v39 = vpack.c.bf16 %v3428_v10, %v3426_v9 }
 0x404   : > { %4422 = vmatprep.subr.bf16.mxu1 %v4421_v37  ;;  %v3562_v37 = vld [vmem:[%s8090_s2 + $0x5a8] sm:$0xff]  ;;  %v4559_v21 = vpack.c.bf16 %v3553_v13, %v3549_v34  ;;  %4558 = vmatprep.subr.bf16.mxu0 %v4557_v33  ;;  %v3432_v13 = vld [vmem:[%s8089_s1 + $0x1598] sm:$0xff]  ;;  %v3597_v43 = vld [vmem:[%s8090_s2 + $0x6c0] sm:$0xff] }
 0x405   : > { %v4561_v46 = vpack.c.bf16 %v3562_v37, %v3558_v30  ;;  %v3594_v33 = vld [vmem:[%s8090_s2 + $0x6a8] sm:$0xff]  ;;  %v3429_v30 = vld [vmem:[%s8089_s1 + $0x1580] sm:$0xff] }
 0x406   : > { %v3430_v34 = vld [vmem:[%s8089_s1 + $0x1588] sm:$0xff]  ;;  %v4577_v37 = vpack.c.bf16 %v3594_v33, %v3590_v22  ;;  %v3601_v45 = vld [vmem:[%s8090_s2 + $0x6e0] sm:$0xff] }
 0x407   : > { %4424 = vmatpush1.bf16.msra.mxu1 %v4423_v40  ;;  %v3415_v40 = vld [vmem:[%s8089_s1 + $0x1510] sm:$0xff]  ;;  %4560 = vmatpush1.bf16.msra.mxu0 %v4559_v21  ;;  %v4457_v21 = vpack.c.bf16 %v3432_v13, %v3430_v34  ;;  %v3437_v62 = vld [vmem:[%s8089_s1 + $0x15c0] sm:$0xff]  ;;  %v2140_v33 = vld [vmem:[#allocation3 + $0x68] sm:$0x1] }
 0x408   : > { %4426 = vmatprep.subr.bf16.mxu1 %v4425_v48  ;;  %v4563_v48 = vpack.c.bf16 %v3561_v28, %v3557_v36  ;;  %v4443_v50 = vpack.c.bf16 %v3415_v40, %v3413_v25  ;;  %4562 = vmatprep.subr.bf16.mxu0 %v4561_v46  ;;  %v3598_v25 = vld [vmem:[%s8090_s2 + $0x6c8] sm:$0xff]  ;;  %v3436_v28 = vld [vmem:[%s8089_s1 + $0x15b8] sm:$0xff]  ;;  %v3605_v61 = vld [vmem:[%s8090_s2 + $0x700] sm:$0xff] }
 0x409   : > { %v3602_v46 = vld [vmem:[%s8090_s2 + $0x6e8] sm:$0xff]  ;;  %v3609_v0 = vld [vmem:[%s8090_s2 + $0x720] sm:$0xff] }
 0x40a   : > { %v3434_v36 = vld [vmem:[%s8089_s1 + $0x15a8] sm:$0xff]  ;;  %v4581_v14 = vpack.c.bf16 %v3602_v46, %v3598_v25  ;;  %v3441_v8 = vld [vmem:[%s8089_s1 + $0x15e0] sm:$0xff]  ;;  %v2298_v25 = vrot.slane %v2140_v33, 1 }
 0x40b   : > { %4428 = vmatpush1.bf16.msra.mxu1 %v4427_v59  ;;  %v3419_v59 = vld [vmem:[%s8089_s1 + $0x1530] sm:$0xff]  ;;  %4564 = vmatpush1.bf16.msra.mxu0 %v4563_v48  ;;  %v4461_v48 = vpack.c.bf16 %v3436_v28, %v3434_v36  ;;  %v3613_v9 = vld [vmem:[%s8090_s2 + $0x740] sm:$0xff] }
 0x40c   : > { %4430 = vmatprep.subr.bf16.mxu1 %v4429_v63  ;;  %v4567_v63 = vpack.c.bf16 %v3569_v56, %v3565_v54  ;;  %v4447_v1 = vpack.c.bf16 %v3419_v59, %v3417_v51  ;;  %4566 = vmatprep.subr.bf16.mxu0 %v4565_v53  ;;  %v3606_v51 = vld [vmem:[%s8090_s2 + $0x708] sm:$0xff]  ;;  %v3440_v56 = vld [vmem:[%s8089_s1 + $0x15d8] sm:$0xff]  ;;  %v3617_v10 = vld [vmem:[%s8090_s2 + $0x760] sm:$0xff] }
 0x40d   : > { %v3610_v53 = vld [vmem:[%s8090_s2 + $0x728] sm:$0xff]  ;;  %v3621_v13 = vld [vmem:[%s8090_s2 + $0x780] sm:$0xff] }
 0x40e   : > { %v3438_v54 = vld [vmem:[%s8089_s1 + $0x15c8] sm:$0xff]  ;;  %v4585_v41 = vpack.c.bf16 %v3610_v53, %v3606_v51  ;;  %v2139_v46 = vld [vmem:[#allocation3 + $0x60] sm:$0x1]  ;;  %v3456_v51 = vld [vmem:[%s8089_s1 + $0x1658] sm:$0xff]  ;;  %v2299_v53 = vsel %vm992_vm2, %v2288_v57, %v2298_v25 }
 0x40f   : > { %4432 = vmatpush1.bf16.msra.mxu1 %v4431_v7  ;;  %v3423_v7 = vld [vmem:[%s8089_s1 + $0x1550] sm:$0xff]  ;;  %4568 = vmatpush1.bf16.msra.mxu0 %v4567_v63  ;;  %v4465_v63 = vpack.c.bf16 %v3440_v56, %v3438_v54  ;;  %v3469_v33 = vld [vmem:[%s8089_s1 + $0x16c0] sm:$0xff] }
 0x410   : > { %4434 = vmatprep.subr.bf16.mxu1 %v4433_v11  ;;  %v4571_v11 = vpack.c.bf16 %v3577_v5, %v3573_v3  ;;  %v4451_v32 = vpack.c.bf16 %v3423_v7, %v3421_v29  ;;  %4570 = vmatprep.subr.bf16.mxu0 %v4569_v2  ;;  %v3614_v29 = vld [vmem:[%s8090_s2 + $0x748] sm:$0xff]  ;;  %v3444_v5 = vld [vmem:[%s8089_s1 + $0x15f8] sm:$0xff] }
 0x411   : > { %v3618_v2 = vld [vmem:[%s8090_s2 + $0x768] sm:$0xff] }
 0x412   : > { %v3442_v3 = vld [vmem:[%s8089_s1 + $0x15e8] sm:$0xff]  ;;  %v4589_v42 = vpack.c.bf16 %v3618_v2, %v3614_v29  ;;  %v3457_v2 = vld [vmem:[%s8089_s1 + $0x1660] sm:$0xff] }
 0x413   : > { %4436 = vmatpush1.bf16.msra.mxu1 %v4435_v20  ;;  %v3427_v20 = vld [vmem:[%s8089_s1 + $0x1570] sm:$0xff]  ;;  %4572 = vmatpush1.bf16.msra.mxu0 %v4571_v11  ;;  %v4469_v11 = vpack.c.bf16 %v3444_v5, %v3442_v3  ;;  %v3462_v5 = vld [vmem:[%s8089_s1 + $0x1688] sm:$0xff] }
 0x414   : > { %4438 = vmatprep.subr.bf16.mxu1 %v4437_v15  ;;  %v4575_v15 = vpack.c.bf16 %v3585_v38, %v3581_v26  ;;  %v4455_v16 = vpack.c.bf16 %v3427_v20, %v3425_v4  ;;  %4574 = vmatprep.subr.bf16.mxu0 %v4573_v12  ;;  %v3622_v4 = vld [vmem:[%s8090_s2 + $0x788] sm:$0xff]  ;;  %v3448_v38 = vld [vmem:[%s8089_s1 + $0x1618] sm:$0xff]  ;;  %v4591_v20 = vpack.c.bf16 %v3617_v10, %v3613_v9  ;;  %v3459_v3 = vld [vmem:[%s8089_s1 + $0x1670] sm:$0xff] }
 0x415   : > { %v3626_v12 = vld [vmem:[%s8090_s2 + $0x7a8] sm:$0xff]  ;;  %v3463_v9 = vld [vmem:[%s8089_s1 + $0x1690] sm:$0xff] }
 0x416   : > { %v3446_v26 = vld [vmem:[%s8089_s1 + $0x1608] sm:$0xff]  ;;  %v4593_v34 = vpack.c.bf16 %v3626_v12, %v3622_v4  ;;  %v3465_v12 = vld [vmem:[%s8089_s1 + $0x16a0] sm:$0xff] }
 0x417   : > { %4440 = vmatpush1.bf16.msra.mxu1 %v4439_v23  ;;  %v3431_v23 = vld [vmem:[%s8089_s1 + $0x1590] sm:$0xff]  ;;  %4576 = vmatpush1.bf16.msra.mxu0 %v4575_v15  ;;  %v3625_v15 = vld [vmem:[%s8090_s2 + $0x7a0] sm:$0xff]  ;;  %v3466_v10 = vld [vmem:[%s8089_s1 + $0x16a8] sm:$0xff] }
 0x418   : > { %4442 = vmatprep.subr.bf16.mxu1 %v4441_v35  ;;  %v4579_v35 = vpack.c.bf16 %v3593_v19, %v3589_v17  ;;  %v4459_v40 = vpack.c.bf16 %v3431_v23, %v3429_v30  ;;  %4578 = vmatprep.subr.bf16.mxu0 %v4577_v37  ;;  %v4473_v30 = vpack.c.bf16 %v3448_v38, %v3446_v26  ;;  %v3445_v37 = vld [vmem:[%s8089_s1 + $0x1600] sm:$0xff]  ;;  %v3447_v17 = vld [vmem:[%s8089_s1 + $0x1610] sm:$0xff]  ;;  %v3452_v23 = vld [vmem:[%s8089_s1 + $0x1638] sm:$0xff] }
 0x419   : > { %v4595_v36 = vpack.c.bf16 %v3625_v15, %v3621_v13  ;;  %v3467_v26 = vld [vmem:[%s8089_s1 + $0x16b0] sm:$0xff]  ;;  %v3470_v38 = vld [vmem:[%s8089_s1 + $0x16c8] sm:$0xff]  ;;  %v3476_v15 = vld [vmem:[%s8089_s1 + $0x16f8] sm:$0xff] }
 0x41a   : > { %v3474_v13 = vld [vmem:[%s8089_s1 + $0x16e8] sm:$0xff] }
 0x41b   : > { %4444 = vmatpush1.bf16.msra.mxu1 %v4443_v50  ;;  %v3435_v50 = vld [vmem:[%s8089_s1 + $0x15b0] sm:$0xff]  ;;  %4580 = vmatpush1.bf16.msra.mxu0 %v4579_v35  ;;  %v4475_v35 = vpack.c.bf16 %v3447_v17, %v3445_v37  ;;  %v3473_v37 = vld [vmem:[%s8089_s1 + $0x16e0] sm:$0xff] }
 0x41c   : > { %4446 = vmatprep.subr.bf16.mxu1 %v4445_v60  ;;  %v4583_v60 = vpack.c.bf16 %v3601_v45, %v3597_v43  ;;  %v4463_v59 = vpack.c.bf16 %v3435_v50, %v3433_v44  ;;  %4582 = vmatprep.subr.bf16.mxu0 %v4581_v14  ;;  %v3449_v14 = vld [vmem:[%s8089_s1 + $0x1620] sm:$0xff]  ;;  %v3451_v43 = vld [vmem:[%s8089_s1 + $0x1630] sm:$0xff]  ;;  %v3454_v50 = vld [vmem:[%s8089_s1 + $0x1648] sm:$0xff] }
 0x41d   : > { %v4479_v56 = vpack.c.bf16 %v3451_v43, %v3449_v14  ;;  %v3475_v17 = vld [vmem:[%s8089_s1 + $0x16f0] sm:$0xff]  ;;  %v3481_v14 = vld [vmem:[%s8089_s1 + $0x1720] sm:$0xff] }
 0x41e   : > { %v3483_v43 = vld [vmem:[%s8089_s1 + $0x1730] sm:$0xff] }
 0x41f   : > { %4448 = vmatpush1.bf16.msra.mxu1 %v4447_v1  ;;  %v3439_v1 = vld [vmem:[%s8089_s1 + $0x15d0] sm:$0xff]  ;;  %4584 = vmatpush1.bf16.msra.mxu0 %v4583_v60  ;;  %v7673_v60 = vld [vmem:[#allocation3 + $0x58] sm:$0xff] }
 0x420   : > { %4450 = vmatprep.subr.bf16.mxu1 %v4449_v6  ;;  %v4587_v6 = vpack.c.bf16 %v3609_v0, %v3605_v61  ;;  %v4467_v7 = vpack.c.bf16 %v3439_v1, %v3437_v62  ;;  %4586 = vmatprep.subr.bf16.mxu0 %v4585_v41  ;;  %v4481_v62 = vpack.c.bf16 %v3456_v51, %v3454_v50  ;;  %v3453_v41 = vld [vmem:[%s8089_s1 + $0x1640] sm:$0xff]  ;;  %v3458_v61 = vld [vmem:[%s8089_s1 + $0x1668] sm:$0xff]  ;;  %v3460_v0 = vld [vmem:[%s8089_s1 + $0x1678] sm:$0xff] }
 0x421   : > { %v4483_v1 = vpack.c.bf16 %v3455_v58, %v3453_v41  ;;  %v4485_v29 = vpack.c.bf16 %v3460_v0, %v3458_v61  ;;  %v4511_v50 = vpack.c.bf16 %v3483_v43, %v3481_v14  ;;  %v3491_v61 = vld [vmem:[%s8089_s1 + $0x1770] sm:$0xff]  ;;  %v3494_v0 = vld [vmem:[%s8089_s1 + $0x1788] sm:$0xff]  ;;  %v3512_v14 = vld [vmem:[%s8090_s2 + $0x418] sm:$0xff] }
 0x422   : > { %v3516_v43 = vld [vmem:[%s8090_s2 + $0x438] sm:$0xff] }
 0x423   : > { %4452 = vmatpush1.bf16.msra.mxu1 %v4451_v32  ;;  %v3443_v32 = vld [vmem:[%s8089_s1 + $0x15f0] sm:$0xff]  ;;  %4588 = vmatpush1.bf16.msra.mxu0 %v4587_v6  ;;  %v3464_v6 = vld [vmem:[%s8089_s1 + $0x1698] sm:$0xff] }
 0x424   : > { %4454 = vmatprep.subr.bf16.mxu1 %v4453_v39  ;;  %v2135_v39 = vld [vmem:[#allocation3 + $0x40] sm:$0xff]  ;;  %v4471_v22 = vpack.c.bf16 %v3443_v32, %v3441_v8  ;;  %4590 = vmatprep.subr.bf16.mxu0 %v4589_v42  ;;  %v4489_v8 = vpack.c.bf16 %v3464_v6, %v3462_v5  ;;  %v3498_v5 = vld [vmem:[%s8089_s1 + $0x17a8] sm:$0xff]  ;;  %v3500_v6 = vld [vmem:[%s8089_s1 + $0x17b8] sm:$0xff] }
 0x425   : > { %v2285_v19 = vrot.slane %v2135_v39, 1  ;;  %v3461_v42 = vld [vmem:[%s8089_s1 + $0x1680] sm:$0xff]  ;;  %v3472_v39 = vld [vmem:[%s8089_s1 + $0x16d8] sm:$0xff] }
 0x426   : > { %v4491_v32 = vpack.c.bf16 %v3463_v9, %v3461_v42  ;;  %v3497_v42 = vld [vmem:[%s8089_s1 + $0x17a0] sm:$0xff]  ;;  %v3499_v9 = vld [vmem:[%s8089_s1 + $0x17b0] sm:$0xff] }
 0x427   : > { %4456 = vmatpush1.bf16.msra.mxu1 %v4455_v16  ;;  %v2131_v16 = vld [vmem:[#allocation3 + $0x20] sm:$0xfe]  ;;  %4592 = vmatpush1.bf16.msra.mxu0 %v4591_v20  ;;  %v4495_v20 = vpack.c.bf16 %v3467_v26, %v3465_v12  ;;  %v3503_v26 = vld [vmem:[%s8089_s1 + $0x17d0] sm:$0xff] }
 0x428   : > { %4458 = vmatprep.subr.bf16.mxu1 %v4457_v21  ;;  %v3450_v21 = vld [vmem:[%s8089_s1 + $0x1628] sm:$0xff]  ;;  %v2284_v28 = vrot.slane %v2131_v16, 1  ;;  %4594 = vmatprep.subr.bf16.mxu0 %v4593_v34  ;;  %v3471_v34 = vld [vmem:[%s8089_s1 + $0x16d0] sm:$0xff]  ;;  %v3501_v12 = vld [vmem:[%s8089_s1 + $0x17c0] sm:$0xff] }
 0x429   : > { %v4477_v44 = vpack.c.bf16 %v3452_v23, %v3450_v21  ;;  %v4499_v16 = vpack.c.bf16 %v3471_v34, %v3469_v33  ;;  %v3480_v21 = vld [vmem:[%s8089_s1 + $0x1718] sm:$0xff]  ;;  %v4503_v23 = vpack.c.bf16 %v3475_v17, %v3473_v37  ;;  %v3505_v33 = vld [vmem:[%s8089_s1 + $0x17e0] sm:$0xff]  ;;  %v3507_v34 = vld [vmem:[%s8089_s1 + $0x17f0] sm:$0xff] }
 0x42a   : > { %v2286_v45 = vsel %vm992_vm2, %v2284_v28, %v2285_v19  ;;  %v3482_v28 = vld [vmem:[%s8089_s1 + $0x1728] sm:$0xff] }
 0x42b   : > { %4460 = vmatpush1.bf16.msra.mxu1 %v4459_v40  ;;  %v2134_v40 = vld [vmem:[#allocation3 + $0x38] sm:$0xfe]  ;;  %4596 = vmatpush1.bf16.msra.mxu0 %v4595_v36  ;;  %v3479_v36 = vld [vmem:[%s8089_s1 + $0x1710] sm:$0xff] }
 0x42c   : > { %4462 = vmatprep.subr.bf16.mxu1 %v4461_v48  ;;  %v2296_v48 = vrot.slane %v2139_v46, 1  ;;  %v2293_v54 = vrot.slane %v2134_v40, 1  ;;  %v3477_v46 = vld [vmem:[%s8089_s1 + $0x1700] sm:$0xff] }
 0x42d   : > { %v4507_v40 = vpack.c.bf16 %v3479_v36, %v3477_v46 }
 0x42e   : > { %v2297_v57 = vsel %vm992_vm2, %v2285_v19, %v2296_v48  ;;  %v3478_v19 = vld [vmem:[%s8089_s1 + $0x1708] sm:$0xff]  ;;  %v3488_v48 = vld [vmem:[%s8089_s1 + $0x1758] sm:$0xff] }
 0x42f   : > { %4464 = vmatpush1.bf16.msra.mxu1 %v4463_v59  ;;  %v2294_v59 = vrot.slane %v7673_v60, 1  ;;  %v4505_v25 = vpack.c.bf16 %v3480_v21, %v3478_v19  ;;  %v2141_v19 = vld [vmem:[#allocation3 + $0x70] sm:$0x1]  ;;  %v3633_v60 = vld [vmem:[%s8090_s2 + $0x7e0] sm:$0xff] }
 0x430   : > { %4466 = vmatprep.subr.bf16.mxu1 %v4465_v63 }
 0x431   : > { %v2295_v63 = vsel %vm992_vm2, %v2293_v54, %v2294_v59  ;;  %v3487_v54 = vld [vmem:[%s8089_s1 + $0x1750] sm:$0xff] }
 0x433   : > { %4468 = vmatpush1.bf16.msra.mxu1 %v4467_v7  ;;  %v4487_v7 = vpack.c.bf16 %v3459_v3, %v3457_v2  ;;  %v3493_v2 = vld [vmem:[%s8089_s1 + $0x1780] sm:$0xff]  ;;  %v3495_v3 = vld [vmem:[%s8089_s1 + $0x1790] sm:$0xff] }
 0x434   : > { %4470 = vmatprep.subr.bf16.mxu1 %v4469_v11  ;;  %v3468_v11 = vld [vmem:[%s8089_s1 + $0x16b8] sm:$0xff] }
 0x435   : > { %v4493_v4 = vpack.c.bf16 %v3468_v11, %v3466_v10  ;;  %v3502_v10 = vld [vmem:[%s8089_s1 + $0x17c8] sm:$0xff]  ;;  %v3504_v11 = vld [vmem:[%s8089_s1 + $0x17d8] sm:$0xff] }
 0x437   : > { %4472 = vmatpush1.bf16.msra.mxu1 %v4471_v22  ;;  %v4497_v22 = vpack.c.bf16 %v3472_v39, %v3470_v38  ;;  %v3506_v38 = vld [vmem:[%s8089_s1 + $0x17e8] sm:$0xff]  ;;  %v3508_v39 = vld [vmem:[%s8089_s1 + $0x17f8] sm:$0xff] }
 0x438   : > { %4474 = vmatprep.subr.bf16.mxu1 %v4473_v30  ;;  %v4501_v30 = vpack.c.bf16 %v3476_v15, %v3474_v13  ;;  %v2137_v13 = vld [vmem:[#allocation3 + $0x50] sm:$0xff]  ;;  %v4535_v15 = vpack.c.bf16 %v3507_v34, %v3505_v33  ;;  %v3552_v34 = vld [vmem:[%s8090_s2 + $0x558] sm:$0xff] }
 0x439   : > { %v2291_v37 = vrot.slane %v2137_v13, 1  ;;  %v3547_v33 = vld [vmem:[%s8090_s2 + $0x530] sm:$0xff]  ;;  %v3556_v13 = vld [vmem:[%s8090_s2 + $0x578] sm:$0xff] }
 0x43a   : > { %2377 = vmatmul.mubr.f32.vlgmr.msra.gmra.mrb[8].mxu1 %v2286_v45  ;;  %v3486_v45 = vld [vmem:[%s8089_s1 + $0x1748] sm:$0xff] }
 0x43b   : > { %2382 = vmatprep.mubr.f32.mxu1 %v2299_v53  ;;  %4476 = vmatpush1.bf16.msra.mxu1 %v4475_v35  ;;  %v3484_v35 = vld [vmem:[%s8089_s1 + $0x1738] sm:$0xff]  ;;  %v4513_v51 = vpack.c.bf16 %v3488_v48, %v3486_v45  ;;  %v3485_v53 = vld [vmem:[%s8089_s1 + $0x1740] sm:$0xff]  ;;  %v4601_v45 = vpack.c.bf16 %v3516_v43, %v3512_v14  ;;  %v3511_v48 = vld [vmem:[%s8090_s2 + $0x410] sm:$0xff] }
 0x43c   : > { %4478 = vmatprep.subr.bf16.mxu1 %v4477_v44  ;;  %v4509_v44 = vpack.c.bf16 %v3484_v35, %v3482_v28  ;;  %v4515_v41 = vpack.c.bf16 %v3487_v54, %v3485_v53  ;;  %v3630_v28 = vld [vmem:[%s8090_s2 + $0x7c8] sm:$0xff]  ;;  %v3520_v53 = vld [vmem:[%s8090_s2 + $0x458] sm:$0xff] }
 0x43d   : > { %v3634_v35 = vld [vmem:[%s8090_s2 + $0x7e8] sm:$0xff]  ;;  %v3524_v54 = vld [vmem:[%s8090_s2 + $0x478] sm:$0xff] }
 0x43e   : > { %2383 = vmatmul.mubr.f32.gmra.mrb[10].mxu1 %v2297_v57  ;;  %v3489_v57 = vld [vmem:[%s8089_s1 + $0x1760] sm:$0xff]  ;;  %v3580_v14 = vld [vmem:[%s8090_s2 + $0x638] sm:$0xff] }
 0x43f   : > { %4480 = vmatpush1.bf16.msra.mxu1 %v4479_v56  ;;  %2453 = vmatprep.mubr.f32.mxu1 %v2295_v63  ;;  %v3490_v56 = vld [vmem:[%s8089_s1 + $0x1768] sm:$0xff]  ;;  %v3496_v63 = vld [vmem:[%s8089_s1 + $0x1798] sm:$0xff] }
 0x440   : > { %4482 = vmatprep.subr.bf16.mxu1 %v4481_v62  ;;  %v3492_v62 = vld [vmem:[%s8089_s1 + $0x1778] sm:$0xff] }
 0x441   : > { %v4517_v58 = vpack.c.bf16 %v3492_v62, %v3490_v56 }
 0x443   : > { %4484 = vmatpush1.bf16.msra.mxu1 %v4483_v1  ;;  %v4519_v1 = vpack.c.bf16 %v3491_v61, %v3489_v57  ;;  %v4605_v57 = vpack.c.bf16 %v3524_v54, %v3520_v53  ;;  %v3519_v61 = vld [vmem:[%s8090_s2 + $0x450] sm:$0xff]  ;;  %v3584_v53 = vld [vmem:[%s8090_s2 + $0x658] sm:$0xff] }
 0x444   : > { %4486 = vmatprep.subr.bf16.mxu1 %v4485_v29  ;;  %v4521_v29 = vpack.c.bf16 %v3496_v63, %v3494_v0  ;;  %v3523_v0 = vld [vmem:[%s8090_s2 + $0x470] sm:$0xff]  ;;  %v3588_v54 = vld [vmem:[%s8090_s2 + $0x678] sm:$0xff] }
 0x447   : > { %4488 = vmatpush1.bf16.msra.mxu1 %v4487_v7  ;;  %v4523_v7 = vpack.c.bf16 %v3495_v3, %v3493_v2 }
 0x448   : > { %4490 = vmatprep.subr.bf16.mxu1 %v4489_v8  ;;  %v4525_v8 = vpack.c.bf16 %v3500_v6, %v3498_v5  ;;  %v4607_v5 = vpack.c.bf16 %v3523_v0, %v3519_v61  ;;  %v3592_v61 = vld [vmem:[%s8090_s2 + $0x698] sm:$0xff] }
 0x449   : > { %v3596_v0 = vld [vmem:[%s8090_s2 + $0x6b8] sm:$0xff] }
 0x44b   : > { %4492 = vmatpush1.bf16.msra.mxu1 %v4491_v32  ;;  %v4527_v32 = vpack.c.bf16 %v3499_v9, %v3497_v42  ;;  %v3531_v42 = vld [vmem:[%s8090_s2 + $0x4b0] sm:$0xff]  ;;  %v3536_v9 = vld [vmem:[%s8090_s2 + $0x4d8] sm:$0xff] }
 0x44c   : > { %4494 = vmatprep.subr.bf16.mxu1 %v4493_v4  ;;  %v4529_v4 = vpack.c.bf16 %v3504_v11, %v3502_v10  ;;  %v3540_v10 = vld [vmem:[%s8090_s2 + $0x4f8] sm:$0xff] }
 0x44f   : > { %4496 = vmatpush1.bf16.msra.mxu1 %v4495_v20  ;;  %v4531_v20 = vpack.c.bf16 %v3503_v26, %v3501_v12  ;;  %v3539_v12 = vld [vmem:[%s8090_s2 + $0x4f0] sm:$0xff]  ;;  %v3544_v26 = vld [vmem:[%s8090_s2 + $0x518] sm:$0xff] }
 0x450   : > { %4498 = vmatprep.subr.bf16.mxu1 %v4497_v22  ;;  %v4533_v22 = vpack.c.bf16 %v3508_v39, %v3506_v38  ;;  %v3548_v38 = vld [vmem:[%s8090_s2 + $0x538] sm:$0xff] }
 0x453   : > { %4500 = vmatpush1.bf16.msra.mxu1 %v4499_v16  ;;  %v2142_v16 = vld [vmem:[#allocation3 + $0x78] sm:$0x1] }
 0x454   : > { %4502 = vmatprep.subr.bf16.mxu1 %v4501_v30  ;;  %v2133_v30 = vld [vmem:[#allocation3 + $0x30] sm:$0xfe]  ;;  %v2302_v17 = vrot.slane %v2142_v16, 1  ;;  %v4621_v16 = vpack.c.bf16 %v3556_v13, %v3552_v34 }
 0x455   : > { %v2290_v21 = vrot.slane %v2133_v30, 1  ;;  %v3551_v30 = vld [vmem:[%s8090_s2 + $0x550] sm:$0xff] }
 0x456   : > { %v2303_v46 = vsel %vm992_vm2, %v2294_v59, %v2302_v17  ;;  %v3560_v17 = vld [vmem:[%s8090_s2 + $0x598] sm:$0xff] }
 0x457   : > { %4504 = vmatpush1.bf16.msra.mxu1 %v4503_v23  ;;  %v2292_v23 = vsel %vm992_vm2, %v2290_v21, %v2291_v37 }
 0x458   : > { %4506 = vmatprep.subr.bf16.mxu1 %v4505_v25  ;;  %v2300_v25 = vrot.slane %v2141_v19, 1  ;;  %v3564_v19 = vld [vmem:[%s8090_s2 + $0x5b8] sm:$0xff] }
 0x45a   : > { %v2301_v36 = vsel %vm992_vm2, %v2291_v37, %v2300_v25  ;;  %v3555_v37 = vld [vmem:[%s8090_s2 + $0x570] sm:$0xff] }
 0x45b   : > { %4508 = vmatpush1.bf16.msra.mxu1 %v4507_v40  ;;  %v4597_v40 = vpack.c.bf16 %v3634_v35, %v3630_v28  ;;  %v4623_v21 = vpack.c.bf16 %v3555_v37, %v3551_v30  ;;  %v3559_v25 = vld [vmem:[%s8090_s2 + $0x590] sm:$0xff]  ;;  %v3572_v28 = vld [vmem:[%s8090_s2 + $0x5f8] sm:$0xff] }
 0x45c   : > { %4510 = vmatprep.subr.bf16.mxu1 %v4509_v44  ;;  %v3629_v44 = vld [vmem:[%s8090_s2 + $0x7c0] sm:$0xff]  ;;  %v3624_v30 = vld [vmem:[%s8090_s2 + $0x798] sm:$0xff] }
 0x45d   : > { %v4599_v59 = vpack.c.bf16 %v3633_v60, %v3629_v44  ;;  %4598 = vmatprep.subr.bf16.mxu0 %v4597_v40  ;;  %v3567_v44 = vld [vmem:[%s8090_s2 + $0x5d0] sm:$0xff]  ;;  %v3628_v37 = vld [vmem:[%s8090_s2 + $0x7b8] sm:$0xff] }
 0x45e   : > { %v3571_v60 = vld [vmem:[%s8090_s2 + $0x5f0] sm:$0xff] }
 0x45f   : > { %4512 = vmatpush1.bf16.msra.mxu1 %v4511_v50  ;;  %4600 = vmatpush1.bf16.msra.mxu0 %v4599_v59  ;;  %v3515_v50 = vld [vmem:[%s8090_s2 + $0x430] sm:$0xff]  ;;  %v3576_v59 = vld [vmem:[%s8090_s2 + $0x618] sm:$0xff]  ;;  %v4631_v43 = vpack.c.bf16 %v3571_v60, %v3567_v44 }
 0x460   : > { %4514 = vmatprep.subr.bf16.mxu1 %v4513_v51  ;;  %4602 = vmatprep.subr.bf16.mxu0 %v4601_v45  ;;  %v4633_v45 = vpack.c.bf16 %v3580_v14, %v3576_v59 }
 0x463   : > { %4516 = vmatpush1.bf16.msra.mxu1 %v4515_v41  ;;  %v4603_v41 = vpack.c.bf16 %v3515_v50, %v3511_v48  ;;  %v3575_v48 = vld [vmem:[%s8090_s2 + $0x610] sm:$0xff] }
 0x464   : > { %4518 = vmatprep.subr.bf16.mxu1 %v4517_v58  ;;  %v3579_v50 = vld [vmem:[%s8090_s2 + $0x630] sm:$0xff] }
 0x467   : > { %4520 = vmatpush1.bf16.msra.mxu1 %v4519_v1  ;;  %v3528_v1 = vld [vmem:[%s8090_s2 + $0x498] sm:$0xff] }
 0x468   : > { %4522 = vmatprep.subr.bf16.mxu1 %v4521_v29  ;;  %v3532_v29 = vld [vmem:[%s8090_s2 + $0x4b8] sm:$0xff] }
 0x46b   : > { %4524 = vmatpush1.bf16.msra.mxu1 %v4523_v7  ;;  %v4609_v7 = vpack.c.bf16 %v3532_v29, %v3528_v1  ;;  %v4641_v29 = vpack.c.bf16 %v3596_v0, %v3592_v61 }
 0x46c   : > { %4526 = vmatprep.subr.bf16.mxu1 %v4525_v8  ;;  %v3527_v8 = vld [vmem:[%s8090_s2 + $0x490] sm:$0xff] }
 0x46d   : > { %v4611_v11 = vpack.c.bf16 %v3531_v42, %v3527_v8  ;;  %v3600_v8 = vld [vmem:[%s8090_s2 + $0x6d8] sm:$0xff] }
 0x46e   : > { %v3604_v42 = vld [vmem:[%s8090_s2 + $0x6f8] sm:$0xff] }
 0x46f   : > { %4528 = vmatpush1.bf16.msra.mxu1 %v4527_v32  ;;  %v4613_v32 = vpack.c.bf16 %v3540_v10, %v3536_v9  ;;  %v4645_v10 = vpack.c.bf16 %v3604_v42, %v3600_v8 }
 0x470   : > { %4530 = vmatprep.subr.bf16.mxu1 %v4529_v4  ;;  %v3535_v4 = vld [vmem:[%s8090_s2 + $0x4d0] sm:$0xff] }
 0x471   : > { %v4615_v39 = vpack.c.bf16 %v3539_v12, %v3535_v4  ;;  %v3608_v4 = vld [vmem:[%s8090_s2 + $0x718] sm:$0xff] }
 0x472   : > { %v3612_v12 = vld [vmem:[%s8090_s2 + $0x738] sm:$0xff] }
 0x473   : > { %4532 = vmatpush1.bf16.msra.mxu1 %v4531_v20  ;;  %v4617_v20 = vpack.c.bf16 %v3548_v38, %v3544_v26  ;;  %v4649_v38 = vpack.c.bf16 %v3612_v12, %v3608_v4 }
 0x474   : > { %4534 = vmatprep.subr.bf16.mxu1 %v4533_v22  ;;  %v3543_v22 = vld [vmem:[%s8090_s2 + $0x510] sm:$0xff] }
 0x477   : > { %4536 = vmatpush1.bf16.msra.mxu1 %v4535_v15  ;;  %v4619_v15 = vpack.c.bf16 %v3547_v33, %v3543_v22  ;;  %v3616_v22 = vld [vmem:[%s8090_s2 + $0x758] sm:$0xff] }
 0x478   : > { %v3620_v33 = vld [vmem:[%s8090_s2 + $0x778] sm:$0xff] }
 0x479   : > { %v4653_v13 = vpack.c.bf16 %v3620_v33, %v3616_v22 }
 0x47a   : > { %2454 = vmatmul.mubr.f32.vlgmr.msra.gmra.mrb[8].mxu1 %v2292_v23  ;;  %v4625_v23 = vpack.c.bf16 %v3564_v19, %v3560_v17  ;;  %v4657_v19 = vpack.c.bf16 %v3628_v37, %v3624_v30 }
 0x47b   : > { %2459 = vmatprep.mubr.f32.mxu1 %v2303_v46  ;;  %v3563_v46 = vld [vmem:[%s8090_s2 + $0x5b0] sm:$0xff] }
 0x47c   : > { %v4627_v35 = vpack.c.bf16 %v3563_v46, %v3559_v25  ;;  %v3632_v25 = vld [vmem:[%s8090_s2 + $0x7d8] sm:$0xff] }
 0x47d   : > { %v3636_v46 = vld [vmem:[%s8090_s2 + $0x7f8] sm:$0xff] }
 0x47e   : > { %2460 = vmatmul.mubr.f32.gmra.mrb[10].mxu1 %v2301_v36  ;;  %v3568_v36 = vld [vmem:[%s8090_s2 + $0x5d8] sm:$0xff] }
 0x47f   : > { %v4629_v40 = vpack.c.bf16 %v3572_v28, %v3568_v36  ;;  %v4661_v28 = vpack.c.bf16 %v3636_v46, %v3632_v25 }
 0x54d   : > { %v7871_v51 = vpop.f32.mrb[8].mxu1 }
 0x54e   : > { %v2457_v56 = vpop.f32.mrb[9].mxu1  ;;  %v2470_v58 = vmax.f32 %v7871_v51, 0.0 }
 0x54f   : > { %v2471_v62 = vmax.f32 %v2457_v56, 0.0  ;;  %v4635_v56 = vpack.c.bf16 %v3579_v50, %v3575_v48 }
 0x551   : > { %v7886_v63 = vpop.f32.mrb[10].mxu1  ;;  %2667 = vmatprep.mubr.f32.mxu0 %v2471_v62 }
 0x552   : > { %v7894_v2 = vpop.f32.mrb[11].mxu1  ;;  %2668 = vmatmul.mubr.f32.vlgmr.msra.gmra.mrb[4].mxu0 %v2470_v58  ;;  %v2472_v6 = vmax.f32 %v7886_v63, 0.0 }
 0x553   : > { %v2473_v3 = vmax.f32 %v7894_v2, 0.0  ;;  %4604 = vmatpush1.bf16.msra.mxu0 %v4603_v41  ;;  %v3583_v41 = vld [vmem:[%s8090_s2 + $0x650] sm:$0xff] }
 0x554   : > { %4606 = vmatprep.subr.bf16.mxu0 %v4605_v57  ;;  %v3587_v57 = vld [vmem:[%s8090_s2 + $0x670] sm:$0xff] }
 0x555   : > { %2673 = vmatprep.mubr.f32.mxu0 %v2473_v3  ;;  %v4639_v1 = vpack.c.bf16 %v3587_v57, %v3583_v41 }
 0x556   : > { %2674 = vmatmul.mubr.f32.gmra.mrb[6].mxu0 %v2472_v6 }
 0x557   : > { %4608 = vmatpush1.bf16.msra.mxu0 %v4607_v5  ;;  %2744 = vmatprep.mubr.f32.mxu0 %v2471_v62  ;;  %v4637_v62 = vpack.c.bf16 %v3588_v54, %v3584_v53  ;;  %v3591_v5 = vld [vmem:[%s8090_s2 + $0x690] sm:$0xff] }
 0x558   : > { %4610 = vmatprep.subr.bf16.mxu0 %v4609_v7  ;;  %v3595_v7 = vld [vmem:[%s8090_s2 + $0x6b0] sm:$0xff] }
 0x559   : > { %v4643_v9 = vpack.c.bf16 %v3595_v7, %v3591_v5 }
 0x55b   : > { %4612 = vmatpush1.bf16.msra.mxu0 %v4611_v11  ;;  %v3599_v11 = vld [vmem:[%s8090_s2 + $0x6d0] sm:$0xff] }
 0x55c   : > { %4614 = vmatprep.subr.bf16.mxu0 %v4613_v32  ;;  %v3603_v32 = vld [vmem:[%s8090_s2 + $0x6f0] sm:$0xff] }
 0x55d   : > { %v4647_v26 = vpack.c.bf16 %v3603_v32, %v3599_v11 }
 0x55f   : > { %4616 = vmatpush1.bf16.msra.mxu0 %v4615_v39  ;;  %v3607_v39 = vld [vmem:[%s8090_s2 + $0x710] sm:$0xff] }
 0x560   : > { %4618 = vmatprep.subr.bf16.mxu0 %v4617_v20  ;;  %v3611_v20 = vld [vmem:[%s8090_s2 + $0x730] sm:$0xff] }
 0x561   : > { %v4651_v34 = vpack.c.bf16 %v3611_v20, %v3607_v39 }
 0x563   : > { %4620 = vmatpush1.bf16.msra.mxu0 %v4619_v15  ;;  %v3615_v15 = vld [vmem:[%s8090_s2 + $0x750] sm:$0xff] }
 0x564   : > { %4622 = vmatprep.subr.bf16.mxu0 %v4621_v16  ;;  %v3619_v16 = vld [vmem:[%s8090_s2 + $0x770] sm:$0xff] }
 0x565   : > { %v4655_v17 = vpack.c.bf16 %v3619_v16, %v3615_v15 }
 0x567   : > { %4624 = vmatpush1.bf16.msra.mxu0 %v4623_v21  ;;  %v3623_v21 = vld [vmem:[%s8090_s2 + $0x790] sm:$0xff] }
 0x568   : > { %4626 = vmatprep.subr.bf16.mxu0 %v4625_v23  ;;  %v3627_v23 = vld [vmem:[%s8090_s2 + $0x7b0] sm:$0xff] }
 0x569   : > { %v4659_v36 = vpack.c.bf16 %v3627_v23, %v3623_v21 }
 0x56b   : > { %4628 = vmatpush1.bf16.msra.mxu0 %v4627_v35  ;;  %v3631_v35 = vld [vmem:[%s8090_s2 + $0x7d0] sm:$0xff] }
 0x56c   : > { %4630 = vmatprep.subr.bf16.mxu0 %v4629_v40  ;;  %v3635_v40 = vld [vmem:[%s8090_s2 + $0x7f0] sm:$0xff] }
 0x56d   : > { %v4663_v44 = vpack.c.bf16 %v3635_v40, %v3631_v35 }
 0x56f   : > { %4632 = vmatpush1.bf16.msra.mxu0 %v4631_v43 }
 0x570   : > { %4634 = vmatprep.subr.bf16.mxu0 %v4633_v45 }
 0x573   : > { %4636 = vmatpush1.bf16.msra.mxu0 %v4635_v56 }
 0x574   : > { %4638 = vmatprep.subr.bf16.mxu0 %v4637_v62 }
 0x577   : > { %4640 = vmatpush1.bf16.msra.mxu0 %v4639_v1 }
 0x578   : > { %4642 = vmatprep.subr.bf16.mxu0 %v4641_v29 }
 0x57b   : > { %4644 = vmatpush1.bf16.msra.mxu0 %v4643_v9 }
 0x57c   : > { %4646 = vmatprep.subr.bf16.mxu0 %v4645_v10 }
 0x57f   : > { %4648 = vmatpush1.bf16.msra.mxu0 %v4647_v26 }
 0x580   : > { %4650 = vmatprep.subr.bf16.mxu0 %v4649_v38 }
 0x583   : > { %4652 = vmatpush1.bf16.msra.mxu0 %v4651_v34 }
 0x584   : > { %4654 = vmatprep.subr.bf16.mxu0 %v4653_v13 }
 0x587   : > { %4656 = vmatpush1.bf16.msra.mxu0 %v4655_v17 }
 0x588   : > { %4658 = vmatprep.subr.bf16.mxu0 %v4657_v19 }
 0x58b   : > { %4660 = vmatpush1.bf16.msra.mxu0 %v4659_v36 }
 0x58c   : > { %4662 = vmatprep.subr.bf16.mxu0 %v4661_v28 }
 0x58f   : > { %4664 = vmatpush1.bf16.msra.mxu0 %v4663_v44 }
 0x592   : > { %2745 = vmatmul.mubr.f32.vlgmr.msra.gmra.mrb[8].mxu0 %v2470_v58 }
 0x593   : > { %2750 = vmatprep.mubr.f32.mxu0 %v2473_v3 }
 0x596   : > { %2751 = vmatmul.mubr.f32.gmra.mrb[10].mxu0 %v2472_v6 }
 0x625   : > { %v2669_v60 = vpop.f32.mrb[4].mxu0 }
 0x626   : > { %v2765_v59 = vadd.f32 %v2669_v60, %v6622_v31  ;;  %v2671_v14 = vpop.f32.mrb[5].mxu0 }
 0x627   : > { %v2766_v43 = vadd.f32 %v2671_v14, %v6631_v47 }
 0x628   : > { %v2789_v45 = vmax.f32 %v2765_v59, 0.0 }
 0x629   : > { %v2790_v51 = vmax.f32 %v2766_v43, 0.0  ;;  %v2675_v58 = vpop.f32.mrb[6].mxu0 }
 0x62a   : > { %2797 = vst [vmem:[%s170_s4] sm:$0xff] %v2789_v45  ;;  %v2769_v2 = vadd.f32 %v2675_v58, %v6647_v49  ;;  %v2677_v3 = vpop.f32.mrb[7].mxu0 }
 0x62b   : > { %2798 = vst [vmem:[%s170_s4 + $0x8] sm:$0xff] %v2790_v51  ;;  %v2770_v63 = vadd.f32 %v2677_v3, %v6657_v55 }
 0x62c   : > { %v2793_v6 = vmax.f32 %v2769_v2, 0.0 }
 0x62d   : > { %v2794_v31 = vmax.f32 %v2770_v63, 0.0 }
 0x62e   : > { %2801 = vst [vmem:[%s170_s4 + $0x20] sm:$0xff] %v2793_v6 }
 0x62f   : > { %2802 = vst [vmem:[%s170_s4 + $0x28] sm:$0xff] %v2794_v31 }
 0x665   : > { %v2746_v48 = vpop.f32.mrb[8].mxu0 }
 0x666   : > { %v2767_v50 = vadd.f32 %v2746_v48, %v6842_v18  ;;  %v2748_v53 = vpop.f32.mrb[9].mxu0 }
 0x667   : > { %v2768_v47 = vadd.f32 %v2748_v53, %v6851_v27 }
 0x668   : > { %v2791_v54 = vmax.f32 %v2767_v50, 0.0 }
 0x669   : > { %v2792_v56 = vmax.f32 %v2768_v47, 0.0  ;;  %v2752_v62 = vpop.f32.mrb[10].mxu0 }
 0x66a   : > { %2799 = vst [vmem:[%s170_s4 + $0x10] sm:$0xff] %v2791_v54  ;;  %v2771_v49 = vadd.f32 %v2752_v62, %v6867_v24  ;;  %v2754_v41 = vpop.f32.mrb[11].mxu0 }
 0x66b   : > { %2800 = vst [vmem:[%s170_s4 + $0x18] sm:$0xff] %v2792_v56  ;;  %v2772_v55 = vadd.f32 %v2754_v41, %v6877_v52 }
 0x66c   : > { %v2795_v57 = vmax.f32 %v2771_v49, 0.0 }
 0x66d   : > { %v2796_v61 = vmax.f32 %v2772_v55, 0.0 }
 0x66e   : > { %2803 = vst [vmem:[%s170_s4 + $0x30] sm:$0xff] %v2795_v57 }
 0x66f   : > { %2804 = vst [vmem:[%s170_s4 + $0x38] sm:$0xff] %v2796_v61 }
 0x670 PF: > { %s13_s12 = sadd.s32 1, %s4732_s12  }
 0x671   : > { %p10_p4 = scmp.ge.s32.totalorder %s13_s12, 4  }
 0x673   :  { %12 = sbr.rel (!%p10_p4) target bundleno = 1 (0x1), region = 70 }

</bundles_post_ra>
